<compile_context>
chip_gen: v6e
topology: v6e:2x2x1
jax: 0.10.0
libtpu: 0.0.40
codegen_flags: <defaults>
</compile_context>

<pallas_src>
import math

import jax
import jax.numpy as jnp
import numpy as np
from jax.experimental import pallas as pl
from jax.experimental.pallas import tpu as pltpu

# --- model hyper-parameters (feature_dim must equal hidden_dim for the
# reference module's attention / cls shapes to be consistent) ----------------
B = 2
HIDDEN = 32
FEATURE = 32
Hs, Ws = 4, 4
S = Hs * Ws
N_HEADS = 8
HEAD_DIM = HIDDEN // N_HEADS
NUM_LAYERS = 2
MAX_SEQ_LEN = 6
VOC = ["PAD", "EOS"] + [chr(ord("a") + i) for i in range(10)]
VOCAB = len(VOC)
VOCAB_PAD = 128                      # lane-dense padded vocab for the output
CHAR2ID = {c: i for i, c in enumerate(VOC)}
START_TOKEN = CHAR2ID["EOS"]
SCALE = math.sqrt(HEAD_DIM)          # == 2.0 exactly -> folding 1/SCALE is exact


def decoder_kernel(xs_ref, xf_ref, wlstm_ref, blstm_ref, ln_ref,
                   watt_ref, batt_ref, wcls_ref, bcls_ref,
                   headm_ref, headmT_ref, out_ref):
    T1, Bk, _ = xs_ref.shape                       # (T+1, B, H)
    BS, Dk = xf_ref.shape                          # (B*S, H) flat features
    Sk = BS // Bk
    NH = headm_ref.shape[1]

    # ------------- time-invariant quantities (hoisted, one-time) -------------
    ln_g = ln_ref[0:1, :]                          # (1, H)
    ln_b = ln_ref[1:2, :]                          # (1, H)
    bq = batt_ref[:, 0 * HIDDEN:1 * HIDDEN]        # pre-scaled by 1/SCALE
    bo = batt_ref[:, 3 * HIDDEN:4 * HIDDEN]
    bcls = bcls_ref[...]                           # (1, VOCAB_PAD)

    # fc_k / fc_v of the attention are time-invariant -> one fused MXU pass.
    kv = (jnp.dot(xf_ref[...], watt_ref[:, 1 * HIDDEN:3 * HIDDEN],
                  preferred_element_type=jnp.float32)
          + batt_ref[:, 1 * HIDDEN:3 * HIDDEN])    # (B*S, 2H)
    k_flat = kv[:, :HIDDEN]                        # (B*S, H)
    v_flat = kv[:, HIDDEN:]                        # (B*S, H)

    # ------------- serial part: only the stacked-LSTM recurrence -------------
    hs = [jnp.zeros((Bk, HIDDEN), jnp.float32) for _ in range(NUM_LAYERS)]
    cs = [jnp.zeros((Bk, HIDDEN), jnp.float32) for _ in range(NUM_LAYERS)]
    ht_steps = []
    for t in range(T1):                            # static trip count, unrolled
        inp = xs_ref[t]                            # (B, H) static leading index
        for i in range(NUM_LAYERS):
            gin = jnp.concatenate([inp, hs[i]], axis=1)          # (B, 2H)
            gates = (jnp.dot(gin, wlstm_ref[i],
                             preferred_element_type=jnp.float32)
                     + blstm_ref[i])                             # (B, 4H) i,f,g,o
            sig = jax.nn.sigmoid(gates)            # one EUP pass on full vreg
            g = jnp.tanh(gates[:, 2 * HIDDEN:3 * HIDDEN])
            c_new = (sig[:, 1 * HIDDEN:2 * HIDDEN] * cs[i]
                     + sig[:, 0 * HIDDEN:1 * HIDDEN] * g)
            h_new = sig[:, 3 * HIDDEN:4 * HIDDEN] * jnp.tanh(c_new)
            hs[i], cs[i] = h_new, c_new
            inp = h_new
        ht_steps.append(inp)                       # (B, H)

    # Batch-major stack of decoder states: row r = b*(T+1) + t  -> (B*(T+1), H)
    ht_all = jnp.concatenate(
        [ht_steps[t][b:b + 1, :] for b in range(Bk) for t in range(T1)], axis=0)

    # ------------- batched attention + classifier (all steps at once) --------
    # LayerNorm(q), eps=1e-6, biased variance (PyTorch semantics).
    mu = jnp.mean(ht_all, axis=-1, keepdims=True)
    var = jnp.mean((ht_all - mu) * (ht_all - mu), axis=-1, keepdims=True)
    qn = (ht_all - mu) / jnp.sqrt(var + 1e-6) * ln_g + ln_b
    q_all = (jnp.dot(qn, watt_ref[:, 0 * HIDDEN:1 * HIDDEN],
                     preferred_element_type=jnp.float32) + bq)   # (B*(T+1), H)

    o_blocks = []
    for b in range(Bk):                            # B is tiny and static
        q_b = q_all[b * T1:(b + 1) * T1, :]        # (T+1, H)
        k_b = k_flat[b * Sk:(b + 1) * Sk, :]       # (S, H)
        v_b = v_flat[b * Sk:(b + 1) * Sk, :]       # (S, H)
        qk = q_b[:, None, :] * k_b[None, :, :]     # (T+1, S, H)
        scores = jnp.dot(qk.reshape(T1 * Sk, Dk), headm_ref[...],
                         preferred_element_type=jnp.float32
                         ).reshape(T1, Sk, NH)     # per-head scores
        m = jnp.max(scores, axis=1, keepdims=True)
        e = jnp.exp(scores - m)
        att = e / jnp.sum(e, axis=1, keepdims=True)              # softmax / keys
        att_full = jnp.dot(att.reshape(T1 * Sk, NH), headmT_ref[...],
                           preferred_element_type=jnp.float32
                           ).reshape(T1, Sk, Dk)
        o_blocks.append(jnp.sum(att_full * v_b[None, :, :], axis=1))  # (T+1, H)
    o_all = jnp.concatenate(o_blocks, axis=0)                         # (B*(T+1), H)
    o_all = (jnp.dot(o_all, watt_ref[:, 3 * HIDDEN:4 * HIDDEN],
                     preferred_element_type=jnp.float32) + bo)
    # TODO(synk): nn.Dropout treated as identity (eval-mode semantics).

    # Classifier: single (B*(T+1), 2H) x (2H, 128) dot, single unmasked store.
    logits = (jnp.dot(jnp.concatenate([o_all, ht_all], axis=1), wcls_ref[...],
                      preferred_element_type=jnp.float32) + bcls)
    out_ref[...] = logits


def decoder_forward(x, holistic_feature, target, p):
    """x: (B, C, H, W) NCHW, holistic_feature: (B, hidden), target: (B, T) int."""
    Bx, C, Hh, Ww = x.shape
    Ss = Hh * Ww
    T = target.shape[1]
    xf = jnp.transpose(x.reshape(Bx, C, Ss), (0, 2, 1)
                       ).reshape(Bx * Ss, C).astype(jnp.float32)   # flat (B*S, D)

    # Glue: pre-gather per-timestep LSTM inputs (embedding lookups).
    start_emb = jnp.broadcast_to(p["emb"][START_TOKEN][None, :], (Bx, HIDDEN))
    tgt_emb = jnp.transpose(p["emb"][target[:, :T - 1]], (1, 0, 2))   # (T-1,B,D)
    xs = jnp.concatenate([holistic_feature[None], start_emb[None], tgt_emb],
                         axis=0)                                      # (T+1,B,D)

    # Pack the small parameter arrays into a few lane-dense slabs
    # (folded LSTM biases, fused gate weights, 1/SCALE folded into wq/bq,
    # padded classifier).
    wlstm = jnp.concatenate([p["wih"], p["whh"]], axis=1)            # (L, 2H, 4H)
    blstm = p["bih"] + p["bhh"]                                      # (L, 1, 4H)
    ln = jnp.concatenate([p["ln_g"], p["ln_b"]], axis=0)             # (2, H)
    watt = jnp.concatenate([p["wq"] / SCALE, p["wk"], p["wv"], p["wo"]],
                           axis=1)                                   # (H, 4H)
    batt = jnp.concatenate([p["bq"] / SCALE, p["bk"], p["bv"], p["bo"]],
                           axis=1)                                   # (1, 4H)
    wcls = jnp.pad(p["wcls"], ((0, 0), (0, VOCAB_PAD - VOCAB)))      # (2H, 128)
    bcls = jnp.pad(p["bcls"], ((0, 0), (0, VOCAB_PAD - VOCAB)))      # (1, 128)

    # Head-indicator matrices, precomputed on host (removed from kernel prologue).
    hid = np.arange(HIDDEN) // HEAD_DIM
    head_m_np = (hid[:, None] == np.arange(N_HEADS)[None, :]).astype(np.float32)
    head_m = jnp.asarray(head_m_np)                                  # (H, Hh)
    head_mT = jnp.asarray(np.ascontiguousarray(head_m_np.T))         # (Hh, H)

    vmem = pl.BlockSpec(memory_space=pltpu.MemorySpace.VMEM)

    # Single grid-less call (latency-bound decoder; total VMEM footprint
    # <100 KiB).  For many-ROI inference, add a leading "parallel" grid axis
    # over ROI chunks so v7x can spread work across both TensorCores.
    out_full = pl.pallas_call(
        decoder_kernel,
        out_shape=jax.ShapeDtypeStruct((Bx * (T + 1), VOCAB_PAD), jnp.float32),
        in_specs=[vmem] * 11,
        out_specs=vmem,
    )(xs, xf, wlstm, blstm, ln, watt, batt, wcls, bcls, head_m, head_mT)

    # Rows are batch-major (b, t): drop padded lanes and the t=0 holistic step.
    return out_full.reshape(Bx, T + 1, VOCAB_PAD)[:, 1:, :VOCAB]


def reference_decoder(x, holistic, target, p):
    """Pure-JAX replica of the PyTorch forward (for correctness checking).

    Runs at default matmul precision, the same precision the kernel uses,
    so the comparison is fair per the perf-review guidance."""
    Bx, C, Hh, Ww = x.shape
    xf = jnp.transpose(x.reshape(Bx, C, Hh * Ww), (0, 2, 1))
    T = target.shape[1]
    h = [jnp.zeros((Bx, HIDDEN), jnp.float32) for _ in range(NUM_LAYERS)]
    c = [jnp.zeros((Bx, HIDDEN), jnp.float32) for _ in range(NUM_LAYERS)]
    outs = []
    for t in range(T + 1):
        if t == 0:
            xt = holistic
        elif t == 1:
            xt = p["emb"][jnp.full((Bx,), START_TOKEN, jnp.int32)]
        else:
            xt = p["emb"][target[:, t - 2]]
        inp = xt
        for i in range(NUM_LAYERS):
            gates = (inp @ p["wih"][i] + p["bih"][i, 0]
                     + h[i] @ p["whh"][i] + p["bhh"][i, 0])
            gi, gf, gg, go = jnp.split(gates, 4, axis=1)
            c[i] = jax.nn.sigmoid(gf) * c[i] + jax.nn.sigmoid(gi) * jnp.tanh(gg)
            h[i] = jax.nn.sigmoid(go) * jnp.tanh(c[i])
            inp = h[i]
        ht = h[-1]
        mu = jnp.mean(ht, axis=-1, keepdims=True)
        var = jnp.mean((ht - mu) ** 2, axis=-1, keepdims=True)
        qn = (ht - mu) / jnp.sqrt(var + 1e-6) * p["ln_g"][0] + p["ln_b"][0]
        q = qn @ p["wq"] + p["bq"][0]
        k = xf @ p["wk"] + p["bk"][0]
        v = xf @ p["wv"] + p["bv"][0]
        qh = q.reshape(Bx, N_HEADS, HEAD_DIM)
        kh = k.reshape(Bx, Hh * Ww, N_HEADS, HEAD_DIM)
        vh = v.reshape(Bx, Hh * Ww, N_HEADS, HEAD_DIM)
        att = jnp.einsum("bhd,bshd->bhs", qh / SCALE, kh)
        att = jax.nn.softmax(att, axis=-1)
        o = jnp.einsum("bhs,bshd->bhd", att, vh).reshape(Bx, HIDDEN)
        o = o @ p["wo"] + p["bo"][0]
        cat = jnp.concatenate([o, ht], axis=1)
        outs.append(cat @ p["wcls"] + p["bcls"][0])
    out = jnp.stack(outs, axis=1)
    return out[:, 1:, :]


if __name__ == "__main__":
    key = jax.random.PRNGKey(0)
    ks = jax.random.split(key, 32)

    def rnd(i, shape, scale=0.1):
        return jax.random.normal(ks[i], shape, dtype=jnp.float32) * scale

    params = {
        "wih": rnd(0, (NUM_LAYERS, HIDDEN, 4 * HIDDEN)),
        "whh": rnd(1, (NUM_LAYERS, HIDDEN, 4 * HIDDEN)),
        "bih": rnd(2, (NUM_LAYERS, 1, 4 * HIDDEN)),
        "bhh": rnd(3, (NUM_LAYERS, 1, 4 * HIDDEN)),
        "ln_g": jnp.ones((1, HIDDEN), jnp.float32),
        "ln_b": jnp.zeros((1, HIDDEN), jnp.float32),
        "wq": rnd(4, (HIDDEN, HIDDEN)), "bq": rnd(5, (1, HIDDEN)),
        "wk": rnd(6, (HIDDEN, HIDDEN)), "bk": rnd(7, (1, HIDDEN)),
        "wv": rnd(8, (HIDDEN, HIDDEN)), "bv": rnd(9, (1, HIDDEN)),
        "wo": rnd(10, (HIDDEN, HIDDEN)), "bo": rnd(11, (1, HIDDEN)),
        "wcls": rnd(12, (HIDDEN + FEATURE, VOCAB)), "bcls": rnd(13, (1, VOCAB)),
        "emb": rnd(14, (VOCAB, HIDDEN), scale=0.5),
    }

    x = jax.random.normal(ks[15], (B, FEATURE, Hs, Ws), dtype=jnp.float32)
    holistic = jax.random.normal(ks[16], (B, HIDDEN), dtype=jnp.float32)
    target = jax.random.randint(ks[17], (B, MAX_SEQ_LEN), 0, VOCAB)

    out = decoder_forward(x, holistic, target, params)
    out = jax.block_until_ready(out)

    ref = reference_decoder(x, holistic, target, params)
    # Both kernel and reference use default (single-bf16-pass) MXU precision;
    # 2e-3 covers the remaining accumulation-order / fusion-structure noise.
    np.testing.assert_allclose(np.asarray(out), np.asarray(ref),
                               rtol=2e-3, atol=2e-3)
    assert out.shape == (B, MAX_SEQ_LEN, VOCAB)
    print("KERNEL_OK")
</pallas_src>

<mosaic_0001>
module attributes {stable_mosaic.version = 11 : i64} {
  func.func @decoder_kernel(%arg0: memref<7x2x32xf32, #tpu.memory_space<vmem>>, %arg1: memref<32x32xf32, #tpu.memory_space<vmem>>, %arg2: memref<2x64x128xf32, #tpu.memory_space<vmem>>, %arg3: memref<2x1x128xf32, #tpu.memory_space<vmem>>, %arg4: memref<2x32xf32, #tpu.memory_space<vmem>>, %arg5: memref<32x128xf32, #tpu.memory_space<vmem>>, %arg6: memref<1x128xf32, #tpu.memory_space<vmem>>, %arg7: memref<64x128xf32, #tpu.memory_space<vmem>>, %arg8: memref<1x128xf32, #tpu.memory_space<vmem>>, %arg9: memref<32x8xf32, #tpu.memory_space<vmem>>, %arg10: memref<8x32xf32, #tpu.memory_space<vmem>>, %arg11: memref<14x128xf32, #tpu.memory_space<vmem>>) attributes {dimension_semantics = [], scalar_prefetch = 0 : i64, scratch_operands = 0 : i64, tpu.core_type = #tpu.core_type<tc>} {
    %c0 = arith.constant 0 : index
    %c0_0 = arith.constant 0 : index
    %0 = vector.load %arg4[%c0, %c0_0] : memref<2x32xf32, #tpu.memory_space<vmem>>, vector<1x32xf32>
    %c1 = arith.constant 1 : index
    %c0_1 = arith.constant 0 : index
    %1 = vector.load %arg4[%c1, %c0_1] : memref<2x32xf32, #tpu.memory_space<vmem>>, vector<1x32xf32>
    %c0_2 = arith.constant 0 : index
    %c0_3 = arith.constant 0 : index
    %2 = vector.load %arg6[%c0_2, %c0_3] : memref<1x128xf32, #tpu.memory_space<vmem>>, vector<1x32xf32>
    %c0_4 = arith.constant 0 : index
    %c96 = arith.constant 96 : index
    %3 = vector.load %arg6[%c0_4, %c96] : memref<1x128xf32, #tpu.memory_space<vmem>>, vector<1x32xf32>
    %c0_5 = arith.constant 0 : index
    %c0_6 = arith.constant 0 : index
    %4 = vector.load %arg8[%c0_5, %c0_6] : memref<1x128xf32, #tpu.memory_space<vmem>>, vector<1x128xf32>
    %c0_7 = arith.constant 0 : index
    %c0_8 = arith.constant 0 : index
    %5 = vector.load %arg1[%c0_7, %c0_8] : memref<32x32xf32, #tpu.memory_space<vmem>>, vector<32x32xf32>
    %c0_9 = arith.constant 0 : index
    %c32 = arith.constant 32 : index
    %6 = vector.load %arg5[%c0_9, %c32] : memref<32x128xf32, #tpu.memory_space<vmem>>, vector<32x64xf32>
    %cst = arith.constant dense<0.000000e+00> : vector<32x64xf32>
    %7 = tpu.matmul %5, %6, %cst {dimension_numbers = #tpu.dot_dimension_numbers<[1], [0], [0], [1], [0, 0, 1, 1], [], []>} : vector<32x32xf32>, vector<32x64xf32>, vector<32x64xf32> -> vector<32x64xf32>
    %c0_10 = arith.constant 0 : index
    %c32_11 = arith.constant 32 : index
    %8 = vector.load %arg6[%c0_10, %c32_11] : memref<1x128xf32, #tpu.memory_space<vmem>>, vector<1x64xf32>
    %9 = vector.broadcast %8 : vector<1x64xf32> to vector<32x64xf32>
    %10 = arith.addf %7, %9 : vector<32x64xf32>
    %11 = vector.extract_strided_slice %10 {offsets = [0, 0], sizes = [32, 32], strides = [1, 1]} : vector<32x64xf32> to vector<32x32xf32>
    %12 = vector.extract_strided_slice %10 {offsets = [0, 32], sizes = [32, 32], strides = [1, 1]} : vector<32x64xf32> to vector<32x32xf32>
    %cst_12 = arith.constant 0.000000e+00 : f32
    %13 = vector.broadcast %cst_12 : f32 to vector<2x32xf32>
    %cst_13 = arith.constant 0.000000e+00 : f32
    %14 = vector.broadcast %cst_13 : f32 to vector<2x32xf32>
    %cst_14 = arith.constant 0.000000e+00 : f32
    %15 = vector.broadcast %cst_14 : f32 to vector<2x32xf32>
    %cst_15 = arith.constant 0.000000e+00 : f32
    %16 = vector.broadcast %cst_15 : f32 to vector<2x32xf32>
    %c0_16 = arith.constant 0 : index
    %c0_17 = arith.constant 0 : index
    %c0_18 = arith.constant 0 : index
    %17 = vector.load %arg0[%c0_16, %c0_17, %c0_18] : memref<7x2x32xf32, #tpu.memory_space<vmem>>, vector<1x2x32xf32>
    %18 = vector.shape_cast %17 : vector<1x2x32xf32> to vector<2x32xf32>
    %19 = tpu.concatenate %18, %13 in 1 : vector<2x32xf32>, vector<2x32xf32> -> vector<2x64xf32>
    %c0_19 = arith.constant 0 : index
    %c0_20 = arith.constant 0 : index
    %c0_21 = arith.constant 0 : index
    %20 = vector.load %arg2[%c0_19, %c0_20, %c0_21] : memref<2x64x128xf32, #tpu.memory_space<vmem>>, vector<1x64x128xf32>
    %21 = vector.shape_cast %20 : vector<1x64x128xf32> to vector<64x128xf32>
    %cst_22 = arith.constant dense<0.000000e+00> : vector<2x128xf32>
    %22 = tpu.matmul %19, %21, %cst_22 {dimension_numbers = #tpu.dot_dimension_numbers<[1], [0], [0], [1], [0, 0, 1, 1], [], []>} : vector<2x64xf32>, vector<64x128xf32>, vector<2x128xf32> -> vector<2x128xf32>
    %c0_23 = arith.constant 0 : index
    %c0_24 = arith.constant 0 : index
    %c0_25 = arith.constant 0 : index
    %23 = vector.load %arg3[%c0_23, %c0_24, %c0_25] : memref<2x1x128xf32, #tpu.memory_space<vmem>>, vector<1x1x128xf32>
    %24 = vector.shape_cast %23 : vector<1x1x128xf32> to vector<1x128xf32>
    %25 = vector.broadcast %24 : vector<1x128xf32> to vector<2x128xf32>
    %26 = arith.addf %22, %25 : vector<2x128xf32>
    %27 = arith.negf %26 : vector<2x128xf32>
    %28 = math.exp %27 : vector<2x128xf32>
    %cst_26 = arith.constant 1.000000e+00 : f32
    %29 = vector.broadcast %cst_26 : f32 to vector<2x128xf32>
    %30 = arith.addf %29, %28 : vector<2x128xf32>
    %31 = arith.divf %29, %30 : vector<2x128xf32>
    %32 = vector.extract_strided_slice %26 {offsets = [0, 64], sizes = [2, 32], strides = [1, 1]} : vector<2x128xf32> to vector<2x32xf32>
    %33 = math.tanh %32 : vector<2x32xf32>
    %34 = vector.extract_strided_slice %31 {offsets = [0, 32], sizes = [2, 32], strides = [1, 1]} : vector<2x128xf32> to vector<2x32xf32>
    %35 = arith.mulf %34, %15 : vector<2x32xf32>
    %36 = vector.extract_strided_slice %31 {offsets = [0, 0], sizes = [2, 32], strides = [1, 1]} : vector<2x128xf32> to vector<2x32xf32>
    %37 = arith.mulf %36, %33 : vector<2x32xf32>
    %38 = arith.addf %35, %37 : vector<2x32xf32>
    %39 = vector.extract_strided_slice %31 {offsets = [0, 96], sizes = [2, 32], strides = [1, 1]} : vector<2x128xf32> to vector<2x32xf32>
    %40 = math.tanh %38 : vector<2x32xf32>
    %41 = arith.mulf %39, %40 : vector<2x32xf32>
    %42 = tpu.concatenate %41, %14 in 1 : vector<2x32xf32>, vector<2x32xf32> -> vector<2x64xf32>
    %c1_27 = arith.constant 1 : index
    %c0_28 = arith.constant 0 : index
    %c0_29 = arith.constant 0 : index
    %43 = vector.load %arg2[%c1_27, %c0_28, %c0_29] : memref<2x64x128xf32, #tpu.memory_space<vmem>>, vector<1x64x128xf32>
    %44 = vector.shape_cast %43 : vector<1x64x128xf32> to vector<64x128xf32>
    %cst_30 = arith.constant dense<0.000000e+00> : vector<2x128xf32>
    %45 = tpu.matmul %42, %44, %cst_30 {dimension_numbers = #tpu.dot_dimension_numbers<[1], [0], [0], [1], [0, 0, 1, 1], [], []>} : vector<2x64xf32>, vector<64x128xf32>, vector<2x128xf32> -> vector<2x128xf32>
    %c1_31 = arith.constant 1 : index
    %c0_32 = arith.constant 0 : index
    %c0_33 = arith.constant 0 : index
    %46 = vector.load %arg3[%c1_31, %c0_32, %c0_33] : memref<2x1x128xf32, #tpu.memory_space<vmem>>, vector<1x1x128xf32>
    %47 = vector.shape_cast %46 : vector<1x1x128xf32> to vector<1x128xf32>
    %48 = vector.broadcast %47 : vector<1x128xf32> to vector<2x128xf32>
    %49 = arith.addf %45, %48 : vector<2x128xf32>
    %50 = arith.negf %49 : vector<2x128xf32>
    %51 = math.exp %50 : vector<2x128xf32>
    %cst_34 = arith.constant 1.000000e+00 : f32
    %52 = vector.broadcast %cst_34 : f32 to vector<2x128xf32>
    %53 = arith.addf %52, %51 : vector<2x128xf32>
    %54 = arith.divf %52, %53 : vector<2x128xf32>
    %55 = vector.extract_strided_slice %49 {offsets = [0, 64], sizes = [2, 32], strides = [1, 1]} : vector<2x128xf32> to vector<2x32xf32>
    %56 = math.tanh %55 : vector<2x32xf32>
    %57 = vector.extract_strided_slice %54 {offsets = [0, 32], sizes = [2, 32], strides = [1, 1]} : vector<2x128xf32> to vector<2x32xf32>
    %58 = arith.mulf %57, %16 : vector<2x32xf32>
    %59 = vector.extract_strided_slice %54 {offsets = [0, 0], sizes = [2, 32], strides = [1, 1]} : vector<2x128xf32> to vector<2x32xf32>
    %60 = arith.mulf %59, %56 : vector<2x32xf32>
    %61 = arith.addf %58, %60 : vector<2x32xf32>
    %62 = vector.extract_strided_slice %54 {offsets = [0, 96], sizes = [2, 32], strides = [1, 1]} : vector<2x128xf32> to vector<2x32xf32>
    %63 = math.tanh %61 : vector<2x32xf32>
    %64 = arith.mulf %62, %63 : vector<2x32xf32>
    %c1_35 = arith.constant 1 : index
    %c0_36 = arith.constant 0 : index
    %c0_37 = arith.constant 0 : index
    %65 = vector.load %arg0[%c1_35, %c0_36, %c0_37] : memref<7x2x32xf32, #tpu.memory_space<vmem>>, vector<1x2x32xf32>
    %66 = vector.shape_cast %65 : vector<1x2x32xf32> to vector<2x32xf32>
    %67 = tpu.concatenate %66, %41 in 1 : vector<2x32xf32>, vector<2x32xf32> -> vector<2x64xf32>
    %c0_38 = arith.constant 0 : index
    %c0_39 = arith.constant 0 : index
    %c0_40 = arith.constant 0 : index
    %68 = vector.load %arg2[%c0_38, %c0_39, %c0_40] : memref<2x64x128xf32, #tpu.memory_space<vmem>>, vector<1x64x128xf32>
    %69 = vector.shape_cast %68 : vector<1x64x128xf32> to vector<64x128xf32>
    %cst_41 = arith.constant dense<0.000000e+00> : vector<2x128xf32>
    %70 = tpu.matmul %67, %69, %cst_41 {dimension_numbers = #tpu.dot_dimension_numbers<[1], [0], [0], [1], [0, 0, 1, 1], [], []>} : vector<2x64xf32>, vector<64x128xf32>, vector<2x128xf32> -> vector<2x128xf32>
    %c0_42 = arith.constant 0 : index
    %c0_43 = arith.constant 0 : index
    %c0_44 = arith.constant 0 : index
    %71 = vector.load %arg3[%c0_42, %c0_43, %c0_44] : memref<2x1x128xf32, #tpu.memory_space<vmem>>, vector<1x1x128xf32>
    %72 = vector.shape_cast %71 : vector<1x1x128xf32> to vector<1x128xf32>
    %73 = vector.broadcast %72 : vector<1x128xf32> to vector<2x128xf32>
    %74 = arith.addf %70, %73 : vector<2x128xf32>
    %75 = arith.negf %74 : vector<2x128xf32>
    %76 = math.exp %75 : vector<2x128xf32>
    %cst_45 = arith.constant 1.000000e+00 : f32
    %77 = vector.broadcast %cst_45 : f32 to vector<2x128xf32>
    %78 = arith.addf %77, %76 : vector<2x128xf32>
    %79 = arith.divf %77, %78 : vector<2x128xf32>
    %80 = vector.extract_strided_slice %74 {offsets = [0, 64], sizes = [2, 32], strides = [1, 1]} : vector<2x128xf32> to vector<2x32xf32>
    %81 = math.tanh %80 : vector<2x32xf32>
    %82 = vector.extract_strided_slice %79 {offsets = [0, 32], sizes = [2, 32], strides = [1, 1]} : vector<2x128xf32> to vector<2x32xf32>
    %83 = arith.mulf %82, %38 : vector<2x32xf32>
    %84 = vector.extract_strided_slice %79 {offsets = [0, 0], sizes = [2, 32], strides = [1, 1]} : vector<2x128xf32> to vector<2x32xf32>
    %85 = arith.mulf %84, %81 : vector<2x32xf32>
    %86 = arith.addf %83, %85 : vector<2x32xf32>
    %87 = vector.extract_strided_slice %79 {offsets = [0, 96], sizes = [2, 32], strides = [1, 1]} : vector<2x128xf32> to vector<2x32xf32>
    %88 = math.tanh %86 : vector<2x32xf32>
    %89 = arith.mulf %87, %88 : vector<2x32xf32>
    %90 = tpu.concatenate %89, %64 in 1 : vector<2x32xf32>, vector<2x32xf32> -> vector<2x64xf32>
    %c1_46 = arith.constant 1 : index
    %c0_47 = arith.constant 0 : index
    %c0_48 = arith.constant 0 : index
    %91 = vector.load %arg2[%c1_46, %c0_47, %c0_48] : memref<2x64x128xf32, #tpu.memory_space<vmem>>, vector<1x64x128xf32>
    %92 = vector.shape_cast %91 : vector<1x64x128xf32> to vector<64x128xf32>
    %cst_49 = arith.constant dense<0.000000e+00> : vector<2x128xf32>
    %93 = tpu.matmul %90, %92, %cst_49 {dimension_numbers = #tpu.dot_dimension_numbers<[1], [0], [0], [1], [0, 0, 1, 1], [], []>} : vector<2x64xf32>, vector<64x128xf32>, vector<2x128xf32> -> vector<2x128xf32>
    %c1_50 = arith.constant 1 : index
    %c0_51 = arith.constant 0 : index
    %c0_52 = arith.constant 0 : index
    %94 = vector.load %arg3[%c1_50, %c0_51, %c0_52] : memref<2x1x128xf32, #tpu.memory_space<vmem>>, vector<1x1x128xf32>
    %95 = vector.shape_cast %94 : vector<1x1x128xf32> to vector<1x128xf32>
    %96 = vector.broadcast %95 : vector<1x128xf32> to vector<2x128xf32>
    %97 = arith.addf %93, %96 : vector<2x128xf32>
    %98 = arith.negf %97 : vector<2x128xf32>
    %99 = math.exp %98 : vector<2x128xf32>
    %cst_53 = arith.constant 1.000000e+00 : f32
    %100 = vector.broadcast %cst_53 : f32 to vector<2x128xf32>
    %101 = arith.addf %100, %99 : vector<2x128xf32>
    %102 = arith.divf %100, %101 : vector<2x128xf32>
    %103 = vector.extract_strided_slice %97 {offsets = [0, 64], sizes = [2, 32], strides = [1, 1]} : vector<2x128xf32> to vector<2x32xf32>
    %104 = math.tanh %103 : vector<2x32xf32>
    %105 = vector.extract_strided_slice %102 {offsets = [0, 32], sizes = [2, 32], strides = [1, 1]} : vector<2x128xf32> to vector<2x32xf32>
    %106 = arith.mulf %105, %61 : vector<2x32xf32>
    %107 = vector.extract_strided_slice %102 {offsets = [0, 0], sizes = [2, 32], strides = [1, 1]} : vector<2x128xf32> to vector<2x32xf32>
    %108 = arith.mulf %107, %104 : vector<2x32xf32>
    %109 = arith.addf %106, %108 : vector<2x32xf32>
    %110 = vector.extract_strided_slice %102 {offsets = [0, 96], sizes = [2, 32], strides = [1, 1]} : vector<2x128xf32> to vector<2x32xf32>
    %111 = math.tanh %109 : vector<2x32xf32>
    %112 = arith.mulf %110, %111 : vector<2x32xf32>
    %c2 = arith.constant 2 : index
    %c0_54 = arith.constant 0 : index
    %c0_55 = arith.constant 0 : index
    %113 = vector.load %arg0[%c2, %c0_54, %c0_55] : memref<7x2x32xf32, #tpu.memory_space<vmem>>, vector<1x2x32xf32>
    %114 = vector.shape_cast %113 : vector<1x2x32xf32> to vector<2x32xf32>
    %115 = tpu.concatenate %114, %89 in 1 : vector<2x32xf32>, vector<2x32xf32> -> vector<2x64xf32>
    %c0_56 = arith.constant 0 : index
    %c0_57 = arith.constant 0 : index
    %c0_58 = arith.constant 0 : index
    %116 = vector.load %arg2[%c0_56, %c0_57, %c0_58] : memref<2x64x128xf32, #tpu.memory_space<vmem>>, vector<1x64x128xf32>
    %117 = vector.shape_cast %116 : vector<1x64x128xf32> to vector<64x128xf32>
    %cst_59 = arith.constant dense<0.000000e+00> : vector<2x128xf32>
    %118 = tpu.matmul %115, %117, %cst_59 {dimension_numbers = #tpu.dot_dimension_numbers<[1], [0], [0], [1], [0, 0, 1, 1], [], []>} : vector<2x64xf32>, vector<64x128xf32>, vector<2x128xf32> -> vector<2x128xf32>
    %c0_60 = arith.constant 0 : index
    %c0_61 = arith.constant 0 : index
    %c0_62 = arith.constant 0 : index
    %119 = vector.load %arg3[%c0_60, %c0_61, %c0_62] : memref<2x1x128xf32, #tpu.memory_space<vmem>>, vector<1x1x128xf32>
    %120 = vector.shape_cast %119 : vector<1x1x128xf32> to vector<1x128xf32>
    %121 = vector.broadcast %120 : vector<1x128xf32> to vector<2x128xf32>
    %122 = arith.addf %118, %121 : vector<2x128xf32>
    %123 = arith.negf %122 : vector<2x128xf32>
    %124 = math.exp %123 : vector<2x128xf32>
    %cst_63 = arith.constant 1.000000e+00 : f32
    %125 = vector.broadcast %cst_63 : f32 to vector<2x128xf32>
    %126 = arith.addf %125, %124 : vector<2x128xf32>
    %127 = arith.divf %125, %126 : vector<2x128xf32>
    %128 = vector.extract_strided_slice %122 {offsets = [0, 64], sizes = [2, 32], strides = [1, 1]} : vector<2x128xf32> to vector<2x32xf32>
    %129 = math.tanh %128 : vector<2x32xf32>
    %130 = vector.extract_strided_slice %127 {offsets = [0, 32], sizes = [2, 32], strides = [1, 1]} : vector<2x128xf32> to vector<2x32xf32>
    %131 = arith.mulf %130, %86 : vector<2x32xf32>
    %132 = vector.extract_strided_slice %127 {offsets = [0, 0], sizes = [2, 32], strides = [1, 1]} : vector<2x128xf32> to vector<2x32xf32>
    %133 = arith.mulf %132, %129 : vector<2x32xf32>
    %134 = arith.addf %131, %133 : vector<2x32xf32>
    %135 = vector.extract_strided_slice %127 {offsets = [0, 96], sizes = [2, 32], strides = [1, 1]} : vector<2x128xf32> to vector<2x32xf32>
    %136 = math.tanh %134 : vector<2x32xf32>
    %137 = arith.mulf %135, %136 : vector<2x32xf32>
    %138 = tpu.concatenate %137, %112 in 1 : vector<2x32xf32>, vector<2x32xf32> -> vector<2x64xf32>
    %c1_64 = arith.constant 1 : index
    %c0_65 = arith.constant 0 : index
    %c0_66 = arith.constant 0 : index
    %139 = vector.load %arg2[%c1_64, %c0_65, %c0_66] : memref<2x64x128xf32, #tpu.memory_space<vmem>>, vector<1x64x128xf32>
    %140 = vector.shape_cast %139 : vector<1x64x128xf32> to vector<64x128xf32>
    %cst_67 = arith.constant dense<0.000000e+00> : vector<2x128xf32>
    %141 = tpu.matmul %138, %140, %cst_67 {dimension_numbers = #tpu.dot_dimension_numbers<[1], [0], [0], [1], [0, 0, 1, 1], [], []>} : vector<2x64xf32>, vector<64x128xf32>, vector<2x128xf32> -> vector<2x128xf32>
    %c1_68 = arith.constant 1 : index
    %c0_69 = arith.constant 0 : index
    %c0_70 = arith.constant 0 : index
    %142 = vector.load %arg3[%c1_68, %c0_69, %c0_70] : memref<2x1x128xf32, #tpu.memory_space<vmem>>, vector<1x1x128xf32>
    %143 = vector.shape_cast %142 : vector<1x1x128xf32> to vector<1x128xf32>
    %144 = vector.broadcast %143 : vector<1x128xf32> to vector<2x128xf32>
    %145 = arith.addf %141, %144 : vector<2x128xf32>
    %146 = arith.negf %145 : vector<2x128xf32>
    %147 = math.exp %146 : vector<2x128xf32>
    %cst_71 = arith.constant 1.000000e+00 : f32
    %148 = vector.broadcast %cst_71 : f32 to vector<2x128xf32>
    %149 = arith.addf %148, %147 : vector<2x128xf32>
    %150 = arith.divf %148, %149 : vector<2x128xf32>
    %151 = vector.extract_strided_slice %145 {offsets = [0, 64], sizes = [2, 32], strides = [1, 1]} : vector<2x128xf32> to vector<2x32xf32>
    %152 = math.tanh %151 : vector<2x32xf32>
    %153 = vector.extract_strided_slice %150 {offsets = [0, 32], sizes = [2, 32], strides = [1, 1]} : vector<2x128xf32> to vector<2x32xf32>
    %154 = arith.mulf %153, %109 : vector<2x32xf32>
    %155 = vector.extract_strided_slice %150 {offsets = [0, 0], sizes = [2, 32], strides = [1, 1]} : vector<2x128xf32> to vector<2x32xf32>
    %156 = arith.mulf %155, %152 : vector<2x32xf32>
    %157 = arith.addf %154, %156 : vector<2x32xf32>
    %158 = vector.extract_strided_slice %150 {offsets = [0, 96], sizes = [2, 32], strides = [1, 1]} : vector<2x128xf32> to vector<2x32xf32>
    %159 = math.tanh %157 : vector<2x32xf32>
    %160 = arith.mulf %158, %159 : vector<2x32xf32>
    %c3 = arith.constant 3 : index
    %c0_72 = arith.constant 0 : index
    %c0_73 = arith.constant 0 : index
    %161 = vector.load %arg0[%c3, %c0_72, %c0_73] : memref<7x2x32xf32, #tpu.memory_space<vmem>>, vector<1x2x32xf32>
    %162 = vector.shape_cast %161 : vector<1x2x32xf32> to vector<2x32xf32>
    %163 = tpu.concatenate %162, %137 in 1 : vector<2x32xf32>, vector<2x32xf32> -> vector<2x64xf32>
    %c0_74 = arith.constant 0 : index
    %c0_75 = arith.constant 0 : index
    %c0_76 = arith.constant 0 : index
    %164 = vector.load %arg2[%c0_74, %c0_75, %c0_76] : memref<2x64x128xf32, #tpu.memory_space<vmem>>, vector<1x64x128xf32>
    %165 = vector.shape_cast %164 : vector<1x64x128xf32> to vector<64x128xf32>
    %cst_77 = arith.constant dense<0.000000e+00> : vector<2x128xf32>
    %166 = tpu.matmul %163, %165, %cst_77 {dimension_numbers = #tpu.dot_dimension_numbers<[1], [0], [0], [1], [0, 0, 1, 1], [], []>} : vector<2x64xf32>, vector<64x128xf32>, vector<2x128xf32> -> vector<2x128xf32>
    %c0_78 = arith.constant 0 : index
    %c0_79 = arith.constant 0 : index
    %c0_80 = arith.constant 0 : index
    %167 = vector.load %arg3[%c0_78, %c0_79, %c0_80] : memref<2x1x128xf32, #tpu.memory_space<vmem>>, vector<1x1x128xf32>
    %168 = vector.shape_cast %167 : vector<1x1x128xf32> to vector<1x128xf32>
    %169 = vector.broadcast %168 : vector<1x128xf32> to vector<2x128xf32>
    %170 = arith.addf %166, %169 : vector<2x128xf32>
    %171 = arith.negf %170 : vector<2x128xf32>
    %172 = math.exp %171 : vector<2x128xf32>
    %cst_81 = arith.constant 1.000000e+00 : f32
    %173 = vector.broadcast %cst_81 : f32 to vector<2x128xf32>
    %174 = arith.addf %173, %172 : vector<2x128xf32>
    %175 = arith.divf %173, %174 : vector<2x128xf32>
    %176 = vector.extract_strided_slice %170 {offsets = [0, 64], sizes = [2, 32], strides = [1, 1]} : vector<2x128xf32> to vector<2x32xf32>
    %177 = math.tanh %176 : vector<2x32xf32>
    %178 = vector.extract_strided_slice %175 {offsets = [0, 32], sizes = [2, 32], strides = [1, 1]} : vector<2x128xf32> to vector<2x32xf32>
    %179 = arith.mulf %178, %134 : vector<2x32xf32>
    %180 = vector.extract_strided_slice %175 {offsets = [0, 0], sizes = [2, 32], strides = [1, 1]} : vector<2x128xf32> to vector<2x32xf32>
    %181 = arith.mulf %180, %177 : vector<2x32xf32>
    %182 = arith.addf %179, %181 : vector<2x32xf32>
    %183 = vector.extract_strided_slice %175 {offsets = [0, 96], sizes = [2, 32], strides = [1, 1]} : vector<2x128xf32> to vector<2x32xf32>
    %184 = math.tanh %182 : vector<2x32xf32>
    %185 = arith.mulf %183, %184 : vector<2x32xf32>
    %186 = tpu.concatenate %185, %160 in 1 : vector<2x32xf32>, vector<2x32xf32> -> vector<2x64xf32>
    %c1_82 = arith.constant 1 : index
    %c0_83 = arith.constant 0 : index
    %c0_84 = arith.constant 0 : index
    %187 = vector.load %arg2[%c1_82, %c0_83, %c0_84] : memref<2x64x128xf32, #tpu.memory_space<vmem>>, vector<1x64x128xf32>
    %188 = vector.shape_cast %187 : vector<1x64x128xf32> to vector<64x128xf32>
    %cst_85 = arith.constant dense<0.000000e+00> : vector<2x128xf32>
    %189 = tpu.matmul %186, %188, %cst_85 {dimension_numbers = #tpu.dot_dimension_numbers<[1], [0], [0], [1], [0, 0, 1, 1], [], []>} : vector<2x64xf32>, vector<64x128xf32>, vector<2x128xf32> -> vector<2x128xf32>
    %c1_86 = arith.constant 1 : index
    %c0_87 = arith.constant 0 : index
    %c0_88 = arith.constant 0 : index
    %190 = vector.load %arg3[%c1_86, %c0_87, %c0_88] : memref<2x1x128xf32, #tpu.memory_space<vmem>>, vector<1x1x128xf32>
    %191 = vector.shape_cast %190 : vector<1x1x128xf32> to vector<1x128xf32>
    %192 = vector.broadcast %191 : vector<1x128xf32> to vector<2x128xf32>
    %193 = arith.addf %189, %192 : vector<2x128xf32>
    %194 = arith.negf %193 : vector<2x128xf32>
    %195 = math.exp %194 : vector<2x128xf32>
    %cst_89 = arith.constant 1.000000e+00 : f32
    %196 = vector.broadcast %cst_89 : f32 to vector<2x128xf32>
    %197 = arith.addf %196, %195 : vector<2x128xf32>
    %198 = arith.divf %196, %197 : vector<2x128xf32>
    %199 = vector.extract_strided_slice %193 {offsets = [0, 64], sizes = [2, 32], strides = [1, 1]} : vector<2x128xf32> to vector<2x32xf32>
    %200 = math.tanh %199 : vector<2x32xf32>
    %201 = vector.extract_strided_slice %198 {offsets = [0, 32], sizes = [2, 32], strides = [1, 1]} : vector<2x128xf32> to vector<2x32xf32>
    %202 = arith.mulf %201, %157 : vector<2x32xf32>
    %203 = vector.extract_strided_slice %198 {offsets = [0, 0], sizes = [2, 32], strides = [1, 1]} : vector<2x128xf32> to vector<2x32xf32>
    %204 = arith.mulf %203, %200 : vector<2x32xf32>
    %205 = arith.addf %202, %204 : vector<2x32xf32>
    %206 = vector.extract_strided_slice %198 {offsets = [0, 96], sizes = [2, 32], strides = [1, 1]} : vector<2x128xf32> to vector<2x32xf32>
    %207 = math.tanh %205 : vector<2x32xf32>
    %208 = arith.mulf %206, %207 : vector<2x32xf32>
    %c4 = arith.constant 4 : index
    %c0_90 = arith.constant 0 : index
    %c0_91 = arith.constant 0 : index
    %209 = vector.load %arg0[%c4, %c0_90, %c0_91] : memref<7x2x32xf32, #tpu.memory_space<vmem>>, vector<1x2x32xf32>
    %210 = vector.shape_cast %209 : vector<1x2x32xf32> to vector<2x32xf32>
    %211 = tpu.concatenate %210, %185 in 1 : vector<2x32xf32>, vector<2x32xf32> -> vector<2x64xf32>
    %c0_92 = arith.constant 0 : index
    %c0_93 = arith.constant 0 : index
    %c0_94 = arith.constant 0 : index
    %212 = vector.load %arg2[%c0_92, %c0_93, %c0_94] : memref<2x64x128xf32, #tpu.memory_space<vmem>>, vector<1x64x128xf32>
    %213 = vector.shape_cast %212 : vector<1x64x128xf32> to vector<64x128xf32>
    %cst_95 = arith.constant dense<0.000000e+00> : vector<2x128xf32>
    %214 = tpu.matmul %211, %213, %cst_95 {dimension_numbers = #tpu.dot_dimension_numbers<[1], [0], [0], [1], [0, 0, 1, 1], [], []>} : vector<2x64xf32>, vector<64x128xf32>, vector<2x128xf32> -> vector<2x128xf32>
    %c0_96 = arith.constant 0 : index
    %c0_97 = arith.constant 0 : index
    %c0_98 = arith.constant 0 : index
    %215 = vector.load %arg3[%c0_96, %c0_97, %c0_98] : memref<2x1x128xf32, #tpu.memory_space<vmem>>, vector<1x1x128xf32>
    %216 = vector.shape_cast %215 : vector<1x1x128xf32> to vector<1x128xf32>
    %217 = vector.broadcast %216 : vector<1x128xf32> to vector<2x128xf32>
    %218 = arith.addf %214, %217 : vector<2x128xf32>
    %219 = arith.negf %218 : vector<2x128xf32>
    %220 = math.exp %219 : vector<2x128xf32>
    %cst_99 = arith.constant 1.000000e+00 : f32
    %221 = vector.broadcast %cst_99 : f32 to vector<2x128xf32>
    %222 = arith.addf %221, %220 : vector<2x128xf32>
    %223 = arith.divf %221, %222 : vector<2x128xf32>
    %224 = vector.extract_strided_slice %218 {offsets = [0, 64], sizes = [2, 32], strides = [1, 1]} : vector<2x128xf32> to vector<2x32xf32>
    %225 = math.tanh %224 : vector<2x32xf32>
    %226 = vector.extract_strided_slice %223 {offsets = [0, 32], sizes = [2, 32], strides = [1, 1]} : vector<2x128xf32> to vector<2x32xf32>
    %227 = arith.mulf %226, %182 : vector<2x32xf32>
    %228 = vector.extract_strided_slice %223 {offsets = [0, 0], sizes = [2, 32], strides = [1, 1]} : vector<2x128xf32> to vector<2x32xf32>
    %229 = arith.mulf %228, %225 : vector<2x32xf32>
    %230 = arith.addf %227, %229 : vector<2x32xf32>
    %231 = vector.extract_strided_slice %223 {offsets = [0, 96], sizes = [2, 32], strides = [1, 1]} : vector<2x128xf32> to vector<2x32xf32>
    %232 = math.tanh %230 : vector<2x32xf32>
    %233 = arith.mulf %231, %232 : vector<2x32xf32>
    %234 = tpu.concatenate %233, %208 in 1 : vector<2x32xf32>, vector<2x32xf32> -> vector<2x64xf32>
    %c1_100 = arith.constant 1 : index
    %c0_101 = arith.constant 0 : index
    %c0_102 = arith.constant 0 : index
    %235 = vector.load %arg2[%c1_100, %c0_101, %c0_102] : memref<2x64x128xf32, #tpu.memory_space<vmem>>, vector<1x64x128xf32>
    %236 = vector.shape_cast %235 : vector<1x64x128xf32> to vector<64x128xf32>
    %cst_103 = arith.constant dense<0.000000e+00> : vector<2x128xf32>
    %237 = tpu.matmul %234, %236, %cst_103 {dimension_numbers = #tpu.dot_dimension_numbers<[1], [0], [0], [1], [0, 0, 1, 1], [], []>} : vector<2x64xf32>, vector<64x128xf32>, vector<2x128xf32> -> vector<2x128xf32>
    %c1_104 = arith.constant 1 : index
    %c0_105 = arith.constant 0 : index
    %c0_106 = arith.constant 0 : index
    %238 = vector.load %arg3[%c1_104, %c0_105, %c0_106] : memref<2x1x128xf32, #tpu.memory_space<vmem>>, vector<1x1x128xf32>
    %239 = vector.shape_cast %238 : vector<1x1x128xf32> to vector<1x128xf32>
    %240 = vector.broadcast %239 : vector<1x128xf32> to vector<2x128xf32>
    %241 = arith.addf %237, %240 : vector<2x128xf32>
    %242 = arith.negf %241 : vector<2x128xf32>
    %243 = math.exp %242 : vector<2x128xf32>
    %cst_107 = arith.constant 1.000000e+00 : f32
    %244 = vector.broadcast %cst_107 : f32 to vector<2x128xf32>
    %245 = arith.addf %244, %243 : vector<2x128xf32>
    %246 = arith.divf %244, %245 : vector<2x128xf32>
    %247 = vector.extract_strided_slice %241 {offsets = [0, 64], sizes = [2, 32], strides = [1, 1]} : vector<2x128xf32> to vector<2x32xf32>
    %248 = math.tanh %247 : vector<2x32xf32>
    %249 = vector.extract_strided_slice %246 {offsets = [0, 32], sizes = [2, 32], strides = [1, 1]} : vector<2x128xf32> to vector<2x32xf32>
    %250 = arith.mulf %249, %205 : vector<2x32xf32>
    %251 = vector.extract_strided_slice %246 {offsets = [0, 0], sizes = [2, 32], strides = [1, 1]} : vector<2x128xf32> to vector<2x32xf32>
    %252 = arith.mulf %251, %248 : vector<2x32xf32>
    %253 = arith.addf %250, %252 : vector<2x32xf32>
    %254 = vector.extract_strided_slice %246 {offsets = [0, 96], sizes = [2, 32], strides = [1, 1]} : vector<2x128xf32> to vector<2x32xf32>
    %255 = math.tanh %253 : vector<2x32xf32>
    %256 = arith.mulf %254, %255 : vector<2x32xf32>
    %c5 = arith.constant 5 : index
    %c0_108 = arith.constant 0 : index
    %c0_109 = arith.constant 0 : index
    %257 = vector.load %arg0[%c5, %c0_108, %c0_109] : memref<7x2x32xf32, #tpu.memory_space<vmem>>, vector<1x2x32xf32>
    %258 = vector.shape_cast %257 : vector<1x2x32xf32> to vector<2x32xf32>
    %259 = tpu.concatenate %258, %233 in 1 : vector<2x32xf32>, vector<2x32xf32> -> vector<2x64xf32>
    %c0_110 = arith.constant 0 : index
    %c0_111 = arith.constant 0 : index
    %c0_112 = arith.constant 0 : index
    %260 = vector.load %arg2[%c0_110, %c0_111, %c0_112] : memref<2x64x128xf32, #tpu.memory_space<vmem>>, vector<1x64x128xf32>
    %261 = vector.shape_cast %260 : vector<1x64x128xf32> to vector<64x128xf32>
    %cst_113 = arith.constant dense<0.000000e+00> : vector<2x128xf32>
    %262 = tpu.matmul %259, %261, %cst_113 {dimension_numbers = #tpu.dot_dimension_numbers<[1], [0], [0], [1], [0, 0, 1, 1], [], []>} : vector<2x64xf32>, vector<64x128xf32>, vector<2x128xf32> -> vector<2x128xf32>
    %c0_114 = arith.constant 0 : index
    %c0_115 = arith.constant 0 : index
    %c0_116 = arith.constant 0 : index
    %263 = vector.load %arg3[%c0_114, %c0_115, %c0_116] : memref<2x1x128xf32, #tpu.memory_space<vmem>>, vector<1x1x128xf32>
    %264 = vector.shape_cast %263 : vector<1x1x128xf32> to vector<1x128xf32>
    %265 = vector.broadcast %264 : vector<1x128xf32> to vector<2x128xf32>
    %266 = arith.addf %262, %265 : vector<2x128xf32>
    %267 = arith.negf %266 : vector<2x128xf32>
    %268 = math.exp %267 : vector<2x128xf32>
    %cst_117 = arith.constant 1.000000e+00 : f32
    %269 = vector.broadcast %cst_117 : f32 to vector<2x128xf32>
    %270 = arith.addf %269, %268 : vector<2x128xf32>
    %271 = arith.divf %269, %270 : vector<2x128xf32>
    %272 = vector.extract_strided_slice %266 {offsets = [0, 64], sizes = [2, 32], strides = [1, 1]} : vector<2x128xf32> to vector<2x32xf32>
    %273 = math.tanh %272 : vector<2x32xf32>
    %274 = vector.extract_strided_slice %271 {offsets = [0, 32], sizes = [2, 32], strides = [1, 1]} : vector<2x128xf32> to vector<2x32xf32>
    %275 = arith.mulf %274, %230 : vector<2x32xf32>
    %276 = vector.extract_strided_slice %271 {offsets = [0, 0], sizes = [2, 32], strides = [1, 1]} : vector<2x128xf32> to vector<2x32xf32>
    %277 = arith.mulf %276, %273 : vector<2x32xf32>
    %278 = arith.addf %275, %277 : vector<2x32xf32>
    %279 = vector.extract_strided_slice %271 {offsets = [0, 96], sizes = [2, 32], strides = [1, 1]} : vector<2x128xf32> to vector<2x32xf32>
    %280 = math.tanh %278 : vector<2x32xf32>
    %281 = arith.mulf %279, %280 : vector<2x32xf32>
    %282 = tpu.concatenate %281, %256 in 1 : vector<2x32xf32>, vector<2x32xf32> -> vector<2x64xf32>
    %c1_118 = arith.constant 1 : index
    %c0_119 = arith.constant 0 : index
    %c0_120 = arith.constant 0 : index
    %283 = vector.load %arg2[%c1_118, %c0_119, %c0_120] : memref<2x64x128xf32, #tpu.memory_space<vmem>>, vector<1x64x128xf32>
    %284 = vector.shape_cast %283 : vector<1x64x128xf32> to vector<64x128xf32>
    %cst_121 = arith.constant dense<0.000000e+00> : vector<2x128xf32>
    %285 = tpu.matmul %282, %284, %cst_121 {dimension_numbers = #tpu.dot_dimension_numbers<[1], [0], [0], [1], [0, 0, 1, 1], [], []>} : vector<2x64xf32>, vector<64x128xf32>, vector<2x128xf32> -> vector<2x128xf32>
    %c1_122 = arith.constant 1 : index
    %c0_123 = arith.constant 0 : index
    %c0_124 = arith.constant 0 : index
    %286 = vector.load %arg3[%c1_122, %c0_123, %c0_124] : memref<2x1x128xf32, #tpu.memory_space<vmem>>, vector<1x1x128xf32>
    %287 = vector.shape_cast %286 : vector<1x1x128xf32> to vector<1x128xf32>
    %288 = vector.broadcast %287 : vector<1x128xf32> to vector<2x128xf32>
    %289 = arith.addf %285, %288 : vector<2x128xf32>
    %290 = arith.negf %289 : vector<2x128xf32>
    %291 = math.exp %290 : vector<2x128xf32>
    %cst_125 = arith.constant 1.000000e+00 : f32
    %292 = vector.broadcast %cst_125 : f32 to vector<2x128xf32>
    %293 = arith.addf %292, %291 : vector<2x128xf32>
    %294 = arith.divf %292, %293 : vector<2x128xf32>
    %295 = vector.extract_strided_slice %289 {offsets = [0, 64], sizes = [2, 32], strides = [1, 1]} : vector<2x128xf32> to vector<2x32xf32>
    %296 = math.tanh %295 : vector<2x32xf32>
    %297 = vector.extract_strided_slice %294 {offsets = [0, 32], sizes = [2, 32], strides = [1, 1]} : vector<2x128xf32> to vector<2x32xf32>
    %298 = arith.mulf %297, %253 : vector<2x32xf32>
    %299 = vector.extract_strided_slice %294 {offsets = [0, 0], sizes = [2, 32], strides = [1, 1]} : vector<2x128xf32> to vector<2x32xf32>
    %300 = arith.mulf %299, %296 : vector<2x32xf32>
    %301 = arith.addf %298, %300 : vector<2x32xf32>
    %302 = vector.extract_strided_slice %294 {offsets = [0, 96], sizes = [2, 32], strides = [1, 1]} : vector<2x128xf32> to vector<2x32xf32>
    %303 = math.tanh %301 : vector<2x32xf32>
    %304 = arith.mulf %302, %303 : vector<2x32xf32>
    %c6 = arith.constant 6 : index
    %c0_126 = arith.constant 0 : index
    %c0_127 = arith.constant 0 : index
    %305 = vector.load %arg0[%c6, %c0_126, %c0_127] : memref<7x2x32xf32, #tpu.memory_space<vmem>>, vector<1x2x32xf32>
    %306 = vector.shape_cast %305 : vector<1x2x32xf32> to vector<2x32xf32>
    %307 = tpu.concatenate %306, %281 in 1 : vector<2x32xf32>, vector<2x32xf32> -> vector<2x64xf32>
    %c0_128 = arith.constant 0 : index
    %c0_129 = arith.constant 0 : index
    %c0_130 = arith.constant 0 : index
    %308 = vector.load %arg2[%c0_128, %c0_129, %c0_130] : memref<2x64x128xf32, #tpu.memory_space<vmem>>, vector<1x64x128xf32>
    %309 = vector.shape_cast %308 : vector<1x64x128xf32> to vector<64x128xf32>
    %cst_131 = arith.constant dense<0.000000e+00> : vector<2x128xf32>
    %310 = tpu.matmul %307, %309, %cst_131 {dimension_numbers = #tpu.dot_dimension_numbers<[1], [0], [0], [1], [0, 0, 1, 1], [], []>} : vector<2x64xf32>, vector<64x128xf32>, vector<2x128xf32> -> vector<2x128xf32>
    %c0_132 = arith.constant 0 : index
    %c0_133 = arith.constant 0 : index
    %c0_134 = arith.constant 0 : index
    %311 = vector.load %arg3[%c0_132, %c0_133, %c0_134] : memref<2x1x128xf32, #tpu.memory_space<vmem>>, vector<1x1x128xf32>
    %312 = vector.shape_cast %311 : vector<1x1x128xf32> to vector<1x128xf32>
    %313 = vector.broadcast %312 : vector<1x128xf32> to vector<2x128xf32>
    %314 = arith.addf %310, %313 : vector<2x128xf32>
    %315 = arith.negf %314 : vector<2x128xf32>
    %316 = math.exp %315 : vector<2x128xf32>
    %cst_135 = arith.constant 1.000000e+00 : f32
    %317 = vector.broadcast %cst_135 : f32 to vector<2x128xf32>
    %318 = arith.addf %317, %316 : vector<2x128xf32>
    %319 = arith.divf %317, %318 : vector<2x128xf32>
    %320 = vector.extract_strided_slice %314 {offsets = [0, 64], sizes = [2, 32], strides = [1, 1]} : vector<2x128xf32> to vector<2x32xf32>
    %321 = math.tanh %320 : vector<2x32xf32>
    %322 = vector.extract_strided_slice %319 {offsets = [0, 32], sizes = [2, 32], strides = [1, 1]} : vector<2x128xf32> to vector<2x32xf32>
    %323 = arith.mulf %322, %278 : vector<2x32xf32>
    %324 = vector.extract_strided_slice %319 {offsets = [0, 0], sizes = [2, 32], strides = [1, 1]} : vector<2x128xf32> to vector<2x32xf32>
    %325 = arith.mulf %324, %321 : vector<2x32xf32>
    %326 = arith.addf %323, %325 : vector<2x32xf32>
    %327 = vector.extract_strided_slice %319 {offsets = [0, 96], sizes = [2, 32], strides = [1, 1]} : vector<2x128xf32> to vector<2x32xf32>
    %328 = math.tanh %326 : vector<2x32xf32>
    %329 = arith.mulf %327, %328 : vector<2x32xf32>
    %330 = tpu.concatenate %329, %304 in 1 : vector<2x32xf32>, vector<2x32xf32> -> vector<2x64xf32>
    %c1_136 = arith.constant 1 : index
    %c0_137 = arith.constant 0 : index
    %c0_138 = arith.constant 0 : index
    %331 = vector.load %arg2[%c1_136, %c0_137, %c0_138] : memref<2x64x128xf32, #tpu.memory_space<vmem>>, vector<1x64x128xf32>
    %332 = vector.shape_cast %331 : vector<1x64x128xf32> to vector<64x128xf32>
    %cst_139 = arith.constant dense<0.000000e+00> : vector<2x128xf32>
    %333 = tpu.matmul %330, %332, %cst_139 {dimension_numbers = #tpu.dot_dimension_numbers<[1], [0], [0], [1], [0, 0, 1, 1], [], []>} : vector<2x64xf32>, vector<64x128xf32>, vector<2x128xf32> -> vector<2x128xf32>
    %c1_140 = arith.constant 1 : index
    %c0_141 = arith.constant 0 : index
    %c0_142 = arith.constant 0 : index
    %334 = vector.load %arg3[%c1_140, %c0_141, %c0_142] : memref<2x1x128xf32, #tpu.memory_space<vmem>>, vector<1x1x128xf32>
    %335 = vector.shape_cast %334 : vector<1x1x128xf32> to vector<1x128xf32>
    %336 = vector.broadcast %335 : vector<1x128xf32> to vector<2x128xf32>
    %337 = arith.addf %333, %336 : vector<2x128xf32>
    %338 = arith.negf %337 : vector<2x128xf32>
    %339 = math.exp %338 : vector<2x128xf32>
    %cst_143 = arith.constant 1.000000e+00 : f32
    %340 = vector.broadcast %cst_143 : f32 to vector<2x128xf32>
    %341 = arith.addf %340, %339 : vector<2x128xf32>
    %342 = arith.divf %340, %341 : vector<2x128xf32>
    %343 = vector.extract_strided_slice %337 {offsets = [0, 64], sizes = [2, 32], strides = [1, 1]} : vector<2x128xf32> to vector<2x32xf32>
    %344 = math.tanh %343 : vector<2x32xf32>
    %345 = vector.extract_strided_slice %342 {offsets = [0, 32], sizes = [2, 32], strides = [1, 1]} : vector<2x128xf32> to vector<2x32xf32>
    %346 = arith.mulf %345, %301 : vector<2x32xf32>
    %347 = vector.extract_strided_slice %342 {offsets = [0, 0], sizes = [2, 32], strides = [1, 1]} : vector<2x128xf32> to vector<2x32xf32>
    %348 = arith.mulf %347, %344 : vector<2x32xf32>
    %349 = arith.addf %346, %348 : vector<2x32xf32>
    %350 = vector.extract_strided_slice %342 {offsets = [0, 96], sizes = [2, 32], strides = [1, 1]} : vector<2x128xf32> to vector<2x32xf32>
    %351 = math.tanh %349 : vector<2x32xf32>
    %352 = arith.mulf %350, %351 : vector<2x32xf32>
    %353 = vector.extract_strided_slice %64 {offsets = [0, 0], sizes = [1, 32], strides = [1, 1]} : vector<2x32xf32> to vector<1x32xf32>
    %354 = vector.extract_strided_slice %112 {offsets = [0, 0], sizes = [1, 32], strides = [1, 1]} : vector<2x32xf32> to vector<1x32xf32>
    %355 = vector.extract_strided_slice %160 {offsets = [0, 0], sizes = [1, 32], strides = [1, 1]} : vector<2x32xf32> to vector<1x32xf32>
    %356 = vector.extract_strided_slice %208 {offsets = [0, 0], sizes = [1, 32], strides = [1, 1]} : vector<2x32xf32> to vector<1x32xf32>
    %357 = vector.extract_strided_slice %256 {offsets = [0, 0], sizes = [1, 32], strides = [1, 1]} : vector<2x32xf32> to vector<1x32xf32>
    %358 = vector.extract_strided_slice %304 {offsets = [0, 0], sizes = [1, 32], strides = [1, 1]} : vector<2x32xf32> to vector<1x32xf32>
    %359 = vector.extract_strided_slice %352 {offsets = [0, 0], sizes = [1, 32], strides = [1, 1]} : vector<2x32xf32> to vector<1x32xf32>
    %360 = vector.extract_strided_slice %64 {offsets = [1, 0], sizes = [1, 32], strides = [1, 1]} : vector<2x32xf32> to vector<1x32xf32>
    %361 = vector.extract_strided_slice %112 {offsets = [1, 0], sizes = [1, 32], strides = [1, 1]} : vector<2x32xf32> to vector<1x32xf32>
    %362 = vector.extract_strided_slice %160 {offsets = [1, 0], sizes = [1, 32], strides = [1, 1]} : vector<2x32xf32> to vector<1x32xf32>
    %363 = vector.extract_strided_slice %208 {offsets = [1, 0], sizes = [1, 32], strides = [1, 1]} : vector<2x32xf32> to vector<1x32xf32>
    %364 = vector.extract_strided_slice %256 {offsets = [1, 0], sizes = [1, 32], strides = [1, 1]} : vector<2x32xf32> to vector<1x32xf32>
    %365 = vector.extract_strided_slice %304 {offsets = [1, 0], sizes = [1, 32], strides = [1, 1]} : vector<2x32xf32> to vector<1x32xf32>
    %366 = vector.extract_strided_slice %352 {offsets = [1, 0], sizes = [1, 32], strides = [1, 1]} : vector<2x32xf32> to vector<1x32xf32>
    %367 = tpu.concatenate %353, %354, %355, %356, %357, %358, %359, %360, %361, %362, %363, %364, %365, %366 in 0 : vector<1x32xf32>, vector<1x32xf32>, vector<1x32xf32>, vector<1x32xf32>, vector<1x32xf32>, vector<1x32xf32>, vector<1x32xf32>, vector<1x32xf32>, vector<1x32xf32>, vector<1x32xf32>, vector<1x32xf32>, vector<1x32xf32>, vector<1x32xf32>, vector<1x32xf32> -> vector<14x32xf32>
    %cst_144 = arith.constant dense<0.000000e+00> : vector<14xf32>
    %368 = vector.multi_reduction <add>, %367, %cst_144 [1] : vector<14x32xf32> to vector<14xf32>
    %369 = vector.shape_cast %368 : vector<14xf32> to vector<14x1xf32>
    %cst_145 = arith.constant 3.200000e+01 : f32
    %370 = vector.broadcast %cst_145 : f32 to vector<14x1xf32>
    %371 = arith.divf %369, %370 : vector<14x1xf32>
    %372 = vector.broadcast %371 : vector<14x1xf32> to vector<14x32xf32>
    %373 = arith.subf %367, %372 : vector<14x32xf32>
    %374 = vector.broadcast %371 : vector<14x1xf32> to vector<14x32xf32>
    %375 = arith.subf %367, %374 : vector<14x32xf32>
    %376 = arith.mulf %373, %375 : vector<14x32xf32>
    %cst_146 = arith.constant dense<0.000000e+00> : vector<14xf32>
    %377 = vector.multi_reduction <add>, %376, %cst_146 [1] : vector<14x32xf32> to vector<14xf32>
    %378 = vector.shape_cast %377 : vector<14xf32> to vector<14x1xf32>
    %cst_147 = arith.constant 3.200000e+01 : f32
    %379 = vector.broadcast %cst_147 : f32 to vector<14x1xf32>
    %380 = arith.divf %378, %379 : vector<14x1xf32>
    %381 = vector.broadcast %371 : vector<14x1xf32> to vector<14x32xf32>
    %382 = arith.subf %367, %381 : vector<14x32xf32>
    %cst_148 = arith.constant 9.99999997E-7 : f32
    %383 = vector.broadcast %cst_148 : f32 to vector<14x1xf32>
    %384 = arith.addf %380, %383 : vector<14x1xf32>
    %385 = math.sqrt %384 : vector<14x1xf32>
    %386 = vector.broadcast %385 : vector<14x1xf32> to vector<14x32xf32>
    %387 = arith.divf %382, %386 : vector<14x32xf32>
    %388 = vector.broadcast %0 : vector<1x32xf32> to vector<14x32xf32>
    %389 = arith.mulf %387, %388 : vector<14x32xf32>
    %390 = vector.broadcast %1 : vector<1x32xf32> to vector<14x32xf32>
    %391 = arith.addf %389, %390 : vector<14x32xf32>
    %c0_149 = arith.constant 0 : index
    %c0_150 = arith.constant 0 : index
    %392 = vector.load %arg5[%c0_149, %c0_150] : memref<32x128xf32, #tpu.memory_space<vmem>>, vector<32x32xf32>
    %cst_151 = arith.constant dense<0.000000e+00> : vector<14x32xf32>
    %393 = tpu.matmul %391, %392, %cst_151 {dimension_numbers = #tpu.dot_dimension_numbers<[1], [0], [0], [1], [0, 0, 1, 1], [], []>} : vector<14x32xf32>, vector<32x32xf32>, vector<14x32xf32> -> vector<14x32xf32>
    %394 = vector.broadcast %2 : vector<1x32xf32> to vector<14x32xf32>
    %395 = arith.addf %393, %394 : vector<14x32xf32>
    %396 = vector.extract_strided_slice %395 {offsets = [0, 0], sizes = [7, 32], strides = [1, 1]} : vector<14x32xf32> to vector<7x32xf32>
    %397 = vector.extract_strided_slice %11 {offsets = [0, 0], sizes = [16, 32], strides = [1, 1]} : vector<32x32xf32> to vector<16x32xf32>
    %398 = vector.extract_strided_slice %12 {offsets = [0, 0], sizes = [16, 32], strides = [1, 1]} : vector<32x32xf32> to vector<16x32xf32>
    %399 = vector.shape_cast %396 : vector<7x32xf32> to vector<7x1x32xf32>
    %400 = vector.shape_cast %397 : vector<16x32xf32> to vector<1x16x32xf32>
    %401 = vector.broadcast %399 : vector<7x1x32xf32> to vector<7x16x32xf32>
    %402 = vector.broadcast %400 : vector<1x16x32xf32> to vector<7x16x32xf32>
    %403 = arith.mulf %401, %402 : vector<7x16x32xf32>
    %404 = vector.shape_cast %403 : vector<7x16x32xf32> to vector<112x32xf32>
    %c0_152 = arith.constant 0 : index
    %c0_153 = arith.constant 0 : index
    %405 = vector.load %arg9[%c0_152, %c0_153] : memref<32x8xf32, #tpu.memory_space<vmem>>, vector<32x8xf32>
    %cst_154 = arith.constant dense<0.000000e+00> : vector<112x8xf32>
    %406 = tpu.matmul %404, %405, %cst_154 {dimension_numbers = #tpu.dot_dimension_numbers<[1], [0], [0], [1], [0, 0, 1, 1], [], []>} : vector<112x32xf32>, vector<32x8xf32>, vector<112x8xf32> -> vector<112x8xf32>
    %407 = vector.shape_cast %406 : vector<112x8xf32> to vector<7x16x8xf32>
    %cst_155 = arith.constant dense<0xFF800000> : vector<7x8xf32>
    %408 = vector.multi_reduction <maximumf>, %407, %cst_155 [1] : vector<7x16x8xf32> to vector<7x8xf32>
    %409 = vector.shape_cast %408 : vector<7x8xf32> to vector<7x1x8xf32>
    %410 = vector.broadcast %409 : vector<7x1x8xf32> to vector<7x16x8xf32>
    %411 = arith.subf %407, %410 : vector<7x16x8xf32>
    %412 = math.exp %411 : vector<7x16x8xf32>
    %cst_156 = arith.constant dense<0.000000e+00> : vector<7x8xf32>
    %413 = vector.multi_reduction <add>, %412, %cst_156 [1] : vector<7x16x8xf32> to vector<7x8xf32>
    %414 = vector.shape_cast %413 : vector<7x8xf32> to vector<7x1x8xf32>
    %415 = vector.broadcast %414 : vector<7x1x8xf32> to vector<7x16x8xf32>
    %416 = arith.divf %412, %415 : vector<7x16x8xf32>
    %417 = vector.shape_cast %416 : vector<7x16x8xf32> to vector<112x8xf32>
    %c0_157 = arith.constant 0 : index
    %c0_158 = arith.constant 0 : index
    %418 = vector.load %arg10[%c0_157, %c0_158] : memref<8x32xf32, #tpu.memory_space<vmem>>, vector<8x32xf32>
    %cst_159 = arith.constant dense<0.000000e+00> : vector<112x32xf32>
    %419 = tpu.matmul %417, %418, %cst_159 {dimension_numbers = #tpu.dot_dimension_numbers<[1], [0], [0], [1], [0, 0, 1, 1], [], []>} : vector<112x8xf32>, vector<8x32xf32>, vector<112x32xf32> -> vector<112x32xf32>
    %420 = vector.shape_cast %419 : vector<112x32xf32> to vector<7x16x32xf32>
    %421 = vector.shape_cast %398 : vector<16x32xf32> to vector<1x16x32xf32>
    %422 = vector.broadcast %421 : vector<1x16x32xf32> to vector<7x16x32xf32>
    %423 = arith.mulf %420, %422 : vector<7x16x32xf32>
    %cst_160 = arith.constant dense<0.000000e+00> : vector<7x32xf32>
    %424 = vector.multi_reduction <add>, %423, %cst_160 [1] : vector<7x16x32xf32> to vector<7x32xf32>
    %425 = vector.extract_strided_slice %395 {offsets = [7, 0], sizes = [7, 32], strides = [1, 1]} : vector<14x32xf32> to vector<7x32xf32>
    %426 = vector.extract_strided_slice %11 {offsets = [16, 0], sizes = [16, 32], strides = [1, 1]} : vector<32x32xf32> to vector<16x32xf32>
    %427 = vector.extract_strided_slice %12 {offsets = [16, 0], sizes = [16, 32], strides = [1, 1]} : vector<32x32xf32> to vector<16x32xf32>
    %428 = vector.shape_cast %425 : vector<7x32xf32> to vector<7x1x32xf32>
    %429 = vector.shape_cast %426 : vector<16x32xf32> to vector<1x16x32xf32>
    %430 = vector.broadcast %428 : vector<7x1x32xf32> to vector<7x16x32xf32>
    %431 = vector.broadcast %429 : vector<1x16x32xf32> to vector<7x16x32xf32>
    %432 = arith.mulf %430, %431 : vector<7x16x32xf32>
    %433 = vector.shape_cast %432 : vector<7x16x32xf32> to vector<112x32xf32>
    %c0_161 = arith.constant 0 : index
    %c0_162 = arith.constant 0 : index
    %434 = vector.load %arg9[%c0_161, %c0_162] : memref<32x8xf32, #tpu.memory_space<vmem>>, vector<32x8xf32>
    %cst_163 = arith.constant dense<0.000000e+00> : vector<112x8xf32>
    %435 = tpu.matmul %433, %434, %cst_163 {dimension_numbers = #tpu.dot_dimension_numbers<[1], [0], [0], [1], [0, 0, 1, 1], [], []>} : vector<112x32xf32>, vector<32x8xf32>, vector<112x8xf32> -> vector<112x8xf32>
    %436 = vector.shape_cast %435 : vector<112x8xf32> to vector<7x16x8xf32>
    %cst_164 = arith.constant dense<0xFF800000> : vector<7x8xf32>
    %437 = vector.multi_reduction <maximumf>, %436, %cst_164 [1] : vector<7x16x8xf32> to vector<7x8xf32>
    %438 = vector.shape_cast %437 : vector<7x8xf32> to vector<7x1x8xf32>
    %439 = vector.broadcast %438 : vector<7x1x8xf32> to vector<7x16x8xf32>
    %440 = arith.subf %436, %439 : vector<7x16x8xf32>
    %441 = math.exp %440 : vector<7x16x8xf32>
    %cst_165 = arith.constant dense<0.000000e+00> : vector<7x8xf32>
    %442 = vector.multi_reduction <add>, %441, %cst_165 [1] : vector<7x16x8xf32> to vector<7x8xf32>
    %443 = vector.shape_cast %442 : vector<7x8xf32> to vector<7x1x8xf32>
    %444 = vector.broadcast %443 : vector<7x1x8xf32> to vector<7x16x8xf32>
    %445 = arith.divf %441, %444 : vector<7x16x8xf32>
    %446 = vector.shape_cast %445 : vector<7x16x8xf32> to vector<112x8xf32>
    %c0_166 = arith.constant 0 : index
    %c0_167 = arith.constant 0 : index
    %447 = vector.load %arg10[%c0_166, %c0_167] : memref<8x32xf32, #tpu.memory_space<vmem>>, vector<8x32xf32>
    %cst_168 = arith.constant dense<0.000000e+00> : vector<112x32xf32>
    %448 = tpu.matmul %446, %447, %cst_168 {dimension_numbers = #tpu.dot_dimension_numbers<[1], [0], [0], [1], [0, 0, 1, 1], [], []>} : vector<112x8xf32>, vector<8x32xf32>, vector<112x32xf32> -> vector<112x32xf32>
    %449 = vector.shape_cast %448 : vector<112x32xf32> to vector<7x16x32xf32>
    %450 = vector.shape_cast %427 : vector<16x32xf32> to vector<1x16x32xf32>
    %451 = vector.broadcast %450 : vector<1x16x32xf32> to vector<7x16x32xf32>
    %452 = arith.mulf %449, %451 : vector<7x16x32xf32>
    %cst_169 = arith.constant dense<0.000000e+00> : vector<7x32xf32>
    %453 = vector.multi_reduction <add>, %452, %cst_169 [1] : vector<7x16x32xf32> to vector<7x32xf32>
    %454 = tpu.concatenate %424, %453 in 0 : vector<7x32xf32>, vector<7x32xf32> -> vector<14x32xf32>
    %c0_170 = arith.constant 0 : index
    %c96_171 = arith.constant 96 : index
    %455 = vector.load %arg5[%c0_170, %c96_171] : memref<32x128xf32, #tpu.memory_space<vmem>>, vector<32x32xf32>
    %cst_172 = arith.constant dense<0.000000e+00> : vector<14x32xf32>
    %456 = tpu.matmul %454, %455, %cst_172 {dimension_numbers = #tpu.dot_dimension_numbers<[1], [0], [0], [1], [0, 0, 1, 1], [], []>} : vector<14x32xf32>, vector<32x32xf32>, vector<14x32xf32> -> vector<14x32xf32>
    %457 = vector.broadcast %3 : vector<1x32xf32> to vector<14x32xf32>
    %458 = arith.addf %456, %457 : vector<14x32xf32>
    %459 = tpu.concatenate %458, %367 in 1 : vector<14x32xf32>, vector<14x32xf32> -> vector<14x64xf32>
    %c0_173 = arith.constant 0 : index
    %c0_174 = arith.constant 0 : index
    %460 = vector.load %arg7[%c0_173, %c0_174] : memref<64x128xf32, #tpu.memory_space<vmem>>, vector<64x128xf32>
    %cst_175 = arith.constant dense<0.000000e+00> : vector<14x128xf32>
    %461 = tpu.matmul %459, %460, %cst_175 {dimension_numbers = #tpu.dot_dimension_numbers<[1], [0], [0], [1], [0, 0, 1, 1], [], []>} : vector<14x64xf32>, vector<64x128xf32>, vector<14x128xf32> -> vector<14x128xf32>
    %462 = vector.broadcast %4 : vector<1x128xf32> to vector<14x128xf32>
    %463 = arith.addf %461, %462 : vector<14x128xf32>
    %c0_176 = arith.constant 0 : index
    %c0_177 = arith.constant 0 : index
    %464 = vector.load %arg11[%c0_176, %c0_177] : memref<14x128xf32, #tpu.memory_space<vmem>>, vector<14x128xf32>
    tpu.vector_store %arg11[%c0_176, %c0_177], %463 {strides = array<i32>} : memref<14x128xf32, #tpu.memory_space<vmem>>, vector<14x128xf32>,
    return
  }
}

</mosaic_0001>

<bundles_post_ra>
// kernel: tpu_custom_call.1
= control target key start
LH: loop header
LB: loop body
LE: loop exit
PB: predicated region body
PF: predicated region fallthrough
CT: control target
= control target key end

     0   :  { %16 = vsyncpa [#allocation3], 0  ;;  %s5891_s0 = inlined_call_operand.hbm [shape: f32[7,2,32], index: 0, kind: input, shape index: {}]   ;;  %s5892_s1 = inlined_call_operand.vmem [shape: f32[32,32], index: 1, kind: input, shape index: {}]   ;;  %s5893_s2 = inlined_call_operand.hbm [shape: f32[2,64,128], index: 2, kind: input, shape index: {}]   ;;  %s5894_s3 = inlined_call_operand.vmem [shape: f32[2,1,128], index: 3, kind: input, shape index: {}]   ;;  %s5895_s4 = inlined_call_operand.vmem [shape: f32[2,32], index: 4, kind: input, shape index: {}]   ;;  %s5896_s5 = inlined_call_operand.hbm [shape: f32[32,128], index: 5, kind: input, shape index: {}]   ;;  %s5897_s6 = inlined_call_operand.vmem [shape: f32[1,128], index: 6, kind: input, shape index: {}]   ;;  %s5898_s7 = inlined_call_operand.hbm [shape: f32[64,128], index: 7, kind: input, shape index: {}]   ;;  %s5899_s8 = inlined_call_operand.vmem [shape: f32[1,128], index: 8, kind: input, shape index: {}]   ;;  %s5900_s9 = inlined_call_operand.vmem [shape: f32[32,8], index: 9, kind: input, shape index: {}]   ;;  %s5901_s10 = inlined_call_operand.vmem [shape: f32[8,32], index: 10, kind: input, shape index: {}]   ;;  %s5902_s11 = inlined_call_operand.hbm [shape: f32[14,128], index: 11, kind: output, shape index: {}]  }
   0x1   :  { %17 = vsyncpa [#allocation6], 0 }
   0x2   :  { %18 = vsyncpa [#allocation9], 0 }
   0x3   :  { %19 = vsyncpa [#allocation4], 0  ;;  %s4739_s17 = smov [#allocation5]  }
   0x4   :  { %s39_s18 = sshll.u32 %s4739_s17, 4  ;;  %s40_s18 = int_to_ptr.vmem [resolvable:$true] %s39_s18 }
   0x5   :  { %s4639_s19 = scalar_lea.vmem %s40_s18, 2048  ;;  %p4644_p1 = scmp.lt.s32.totalorder %s40_s18, %s40_s18 }
   0x6   :  { %p4640_p0 = scmp.ne.s32.totalorder %s40_s18, %s4639_s19  ;;  %p4645_p2 = scmp.lt.s32.totalorder %s4639_s19, %s4639_s19 }
   0x8   :  { %p4646_p3 = por %p4645_p2, %p4644_p1 }
   0xa   :  { %p4647_p4 = pnand %p4646_p3, %p4640_p0 }
   0xc   :  { %4650 = shalt.err (!%p4647_p4)
}
   0xd   :  { %s4740_s20 = smov 128   ;;  %s4741_s21 = smov 8  }
   0xe   :  { %45 = dma.hbm_to_vmem [thread:$0]  %s5893_s2, 2048, %s40_s18, [#allocation6], %s4740_s20, %s4740_s20, %s4741_s21  }
   0xf   :  { %s4742_s24 = smov [#allocation2]  }
  0x10   :  { %s25_s25 = sshll.u32 %s4742_s24, 4  ;;  %s26_s25 = int_to_ptr.vmem [resolvable:$true] %s25_s25 }
  0x11   :  { %s4659_s26 = scalar_lea.vmem %s26_s25, 224  ;;  %p4664_p6 = scmp.lt.s32.totalorder %s26_s25, %s26_s25 }
  0x12   :  { %p4660_p5 = scmp.ne.s32.totalorder %s26_s25, %s4659_s26  ;;  %p4665_p7 = scmp.lt.s32.totalorder %s4659_s26, %s4659_s26 }
  0x14   :  { %p4666_p8 = por %p4665_p7, %p4664_p6 }
  0x16   :  { %p4667_p9 = pnand %p4666_p8, %p4660_p5 }
  0x18   :  { %4670 = shalt.err (!%p4667_p9)
}
  0x19   :  { %s4743_s27 = smov 32   ;;  %s4744_s28 = smov 2  }
  0x1a   :  { %31 = dma.hbm_to_vmem [thread:$0]  %s5891_s0, 224, %s26_s25, [#allocation3], %s4743_s27, %s4743_s27, %s4744_s28  }
  0x1b   :  { %s4745_s12 = smov [#allocation7]   ;;  %s4746_s13 = smov [#allocation8]  }
  0x1c   :  { %s55_s2 = sshll.u32 %s4745_s12, 4  ;;  %s69_s14 = sshll.u32 %s4746_s13, 4  ;;  %s56_s2 = int_to_ptr.vmem [resolvable:$true] %s55_s2  ;;  %s70_s14 = int_to_ptr.vmem [resolvable:$true] %s69_s14 }
  0x1d   :  { %s4679_s15 = scalar_lea.vmem %s56_s2, 512  ;;  %p4684_p11 = scmp.lt.s32.totalorder %s56_s2, %s56_s2 }
  0x1e   :  { %p4680_p10 = scmp.ne.s32.totalorder %s56_s2, %s4679_s15  ;;  %p4685_p12 = scmp.lt.s32.totalorder %s4679_s15, %s4679_s15 }
  0x20   :  { %p4686_p13 = por %p4685_p12, %p4684_p11 }
  0x22   :  { %p4687_p0 = pnand %p4686_p13, %p4680_p10 }
  0x24   :  { %4690 = shalt.err (!%p4687_p0)
}
  0x25   :  { %61 = dma.hbm_to_vmem [thread:$0]  %s5896_s5, 512, %s56_s2, [#allocation6], %s4740_s20, %s4740_s20, %s4741_s21  }
  0x26   :  { %s4699_s0 = scalar_lea.vmem %s70_s14, 1024  ;;  %p4704_p2 = scmp.lt.s32.totalorder %s70_s14, %s70_s14 }
  0x27   :  { %p4700_p1 = scmp.ne.s32.totalorder %s70_s14, %s4699_s0  ;;  %p4705_p3 = scmp.lt.s32.totalorder %s4699_s0, %s4699_s0 }
  0x29   :  { %p4706_p4 = por %p4705_p3, %p4704_p2 }
  0x2b   :  { %p4707_p5 = pnand %p4706_p4, %p4700_p1 }
  0x2d   :  { %4710 = shalt.err (!%p4707_p5)
}
  0x2e   :  { %75 = dma.hbm_to_vmem [thread:$0]  %s5898_s7, 1024, %s70_s14, [#allocation9], %s4740_s20, %s4740_s20, %s4741_s21  }
  0x2f   :  { %4731 = dma.done.wait [#allocation3], 224  }
  0x30   :  { %4732 = vsyncadd [#allocation3], 4294967072 }
  0x31   :  { %4733 = dma.done.wait [#allocation6], 2560  }
  0x32   :  { %4734 = vsyncadd [#allocation6], 4294964736 }
  0x33   :  { %4735 = dma.done.wait [#allocation9], 1024  }
  0x34   :  { %4736 = vsyncadd [#allocation9], 4294966272  ;;  %v4747_v0 = vmov 0.0   ;;  %vm4748_vm0 = vmmov 0   ;;  %v4839_v1 = vld [vmem:[#allocation5 + $0x38] sm:$0xff]  ;;  %v4841_v2 = vld [vmem:[#allocation5 + $0x30] sm:$0xff] }
  0x35   :  { %3980 = vmatprep.subr.mxu1 %v4747_v0  ;;  %3996 = vmatprep.mubr.msk.f32.mxu1 %vm4748_vm0, %v4747_v0  ;;  %v4845_v3 = vld [vmem:[#allocation5 + $0x28] sm:$0xff]  ;;  %v4849_v4 = vld [vmem:[#allocation5 + $0x20] sm:$0xff]  ;;  %v4853_v5 = vld [vmem:[#allocation5 + $0x18] sm:$0xff]  ;;  %vm130_vm1 = vcmask 261120   ;;  %vm245_vm2 = vcmask 523264   ;;  %s4749_s22 = smov 64  }
  0x36   :  { %3981 = vmatpush3.msra.mxu1 %v4839_v1  ;;  %v4857_v6 = vld [vmem:[#allocation5 + $0x10] sm:$0xff]  ;;  %v4861_v7 = vld [vmem:[#allocation5 + $0x8] sm:$0xff]  ;;  %v4865_v9 = vld [vmem:[#allocation5] sm:$0xff]  ;;  %s4750_s23 = smov 96   ;;  %vm1741_vm3 = vcmask 1040384   ;;  %vm1743_vm4 = vcmask 1041408  }
  0x37   :  { %3982 = vmatprep.subr.mxu1 %v4747_v0  ;;  %v228_v8 = vld [vmem:[#allocation2] sm:$0x3]  ;;  %v102_v23 = vld [vmem:[#allocation7] sm:$0xff]  ;;  %v4909_v29 = vld [vmem:[#allocation7 + $0x18] sm:$0xff]  ;;  %vm1745_vm5 = vcmask 1042432   ;;  %vm1747_vm6 = vcmask 1043456  }
  0x38   :  { %3983 = vmatpush3.msra.mxu1 %v4841_v2  ;;  %v229_v10 = vsel %vm130_vm1, %v228_v8, 0.0  ;;  %v4894_v11 = vld [vmem:[%s5894_s3] ss:$0 sm:$0xff]  ;;  %v103_v30 = vld [vmem:[#allocation7 + $0x8] sm:$0xff]  ;;  %v99_v37 = vld [vmem:[%s5892_s1 + $0x8] sm:$0xff]  ;;  %vm1749_vm7 = vcmask 1044480  }
  0x39   :  { %3984 = vmatprep.subr.mxu1 %v4747_v0  ;;  %v104_v22 = vld [vmem:[#allocation7 + $0x10] sm:$0xff]  ;;  %v4919_v38 = vld [vmem:[#allocation5 + $0x78] sm:$0xff]  ;;  %v100_v39 = vld [vmem:[%s5892_s1 + $0x10] sm:$0xff]  ;;  %vm1751_vm8 = vcmask 1045504   ;;  %vm1753_vm9 = vcmask 1046528   ;;  %vm1771_vm10 = vcmask 259072  }
  0x3a   :  { %3985 = vmatpush3.msra.mxu1 %v4845_v3  ;;  %v98_v27 = vld [vmem:[%s5892_s1] sm:$0xff]  ;;  %v101_v41 = vld [vmem:[%s5892_s1 + $0x18] sm:$0xff]  ;;  %v4938_v43 = vld [vmem:[#allocation5 + $0x60] sm:$0xff]  ;;  %vm2203_vm15 = vcmask 64512   ;;  %s4752_s30 = smov [#allocation10]  }
  0x3b   :  { %3986 = vmatprep.subr.mxu1 %v4747_v0  ;;  %3974 = vmatprep.mubr.msk.f32.mxu0 %vm130_vm1, %v98_v27  ;;  %v4926_v40 = vld [vmem:[#allocation5 + $0x70] sm:$0xff]  ;;  %v4934_v42 = vld [vmem:[#allocation5 + $0x68] sm:$0xff]  ;;  %v4945_v44 = vld [vmem:[#allocation5 + $0x58] sm:$0xff]  ;;  %s3629_s12 = sshll.u32 %s4752_s30, 4  ;;  %s3630_s12 = int_to_ptr.vmem [resolvable:$true] %s3629_s12 }
  0x3c   :  { %3987 = vmatpush3.msra.mxu1 %v4849_v4  ;;  %v4949_v45 = vld [vmem:[#allocation5 + $0x50] sm:$0xff]  ;;  %v4953_v46 = vld [vmem:[#allocation5 + $0x48] sm:$0xff]  ;;  %v4957_v47 = vld [vmem:[#allocation5 + $0x40] sm:$0xff]  ;;  %s4711_s2 = scalar_lea.vmem %s3630_s12, 256  ;;  %p4716_p7 = scmp.lt.s32.totalorder %s3630_s12, %s3630_s12 }
  0x3d   :  { %3988 = vmatprep.subr.mxu1 %v4747_v0  ;;  %v463_v48 = vld [vmem:[#allocation2 + $0x2] sm:$0x3]  ;;  %v5014_v57 = vld [vmem:[%s5894_s3 + $0x1] ss:$0 sm:$0xff]  ;;  %p4712_p6 = scmp.ne.s32.totalorder %s3630_s12, %s4711_s2  ;;  %p4717_p8 = scmp.lt.s32.totalorder %s4711_s2, %s4711_s2 }
  0x3e   :  { %3989 = vmatpush3.msra.mxu1 %v4853_v5 }
  0x3f   :  { %3990 = vmatprep.subr.mxu1 %v4747_v0  ;;  %p4718_p9 = por %p4717_p8, %p4716_p7 }
  0x40   :  { %3991 = vmatpush3.msra.mxu1 %v4857_v6 }
  0x41   :  { %3992 = vmatprep.subr.mxu1 %v4747_v0  ;;  %p4719_p10 = pnand %p4718_p9, %p4712_p6 }
  0x42   :  { %3993 = vmatpush3.msra.mxu1 %v4861_v7 }
  0x43   :  { %3994 = vmatprep.subr.mxu1 %v4747_v0 }
  0x44   :  { %3995 = vmatpush3.msra.mxu1 %v4865_v9 }
  0x45   :  { %3997 = vmatmul.mubr.msk.f32.vlgmr.msra.gmra.mxu1 %vm245_vm2, %v229_v10  ;;  %4018 = vmatprep.subr.mxu1 %v4747_v0 }
  0x46   :  { %4019 = vmatpush3.msra.mxu1 %v4839_v1  ;;  %4034 = vmatprep.mubr.msk.f32.mxu1 %vm4748_vm0, %v4747_v0 }
  0x47   :  { %4020 = vmatprep.subr.mxu1 %v4747_v0 }
  0x48   :  { %4021 = vmatpush3.msra.mxu1 %v4841_v2 }
  0x49   :  { %4022 = vmatprep.subr.mxu1 %v4747_v0 }
  0x4a   :  { %4023 = vmatpush3.msra.mxu1 %v4845_v3 }
  0x4b   :  { %4024 = vmatprep.subr.mxu1 %v4747_v0 }
  0x4c   :  { %4025 = vmatpush3.msra.mxu1 %v4849_v4 }
  0x4d   :  { %4026 = vmatprep.subr.mxu1 %v4747_v0 }
  0x4e   :  { %4027 = vmatpush3.msra.mxu1 %v4853_v5 }
  0x4f   :  { %4028 = vmatprep.subr.mxu1 %v4747_v0 }
  0x50   :  { %4029 = vmatpush3.msra.mxu1 %v4857_v6 }
  0x51   :  { %4030 = vmatprep.subr.mxu1 %v4747_v0 }
  0x52   :  { %4031 = vmatpush3.msra.mxu1 %v4861_v7 }
  0x53   :  { %4032 = vmatprep.subr.mxu1 %v4747_v0 }
  0x54   :  { %4033 = vmatpush3.msra.mxu1 %v4865_v9 }
  0x55   :  { %4056 = vmatprep.subr.mxu1 %v4747_v0 }
 0x105   :  { %v315_v12 = vpop.f32.mrf.mxu1 }
 0x106   :  { %v316_v13 = vadd.f32 %v4894_v11, %v315_v12 }
 0x107   :  { %v3998_v14 = vpop.f32.mrf.mxu1 }
 0x108   :  { %4405 = vtanh.f32 %v316_v13  ;;  %v3650_v16 = vmul.f32 -1.442695, %v316_v13 }
 0x10a   :  { %4407 = vpow2.f32 %v3650_v16 }
 0x115   :  { %v4406_v15 = vpop.eup %4405 }
 0x116   :  { %328 = vrot.lane.b32.xlu0 %v4406_v15, %s4749_s22 }
 0x117   :  { %v4408_v17 = vpop.eup %4407 }
 0x118   :  { %v322_v18 = vadd.f32 1.0, %v4408_v17 }
 0x11a   :  { %4409 = vrcp.f32 %v322_v18 }
 0x127   :  { %v4410_v19 = vpop.eup %4409 }
 0x128   :  { %v326_v24 = vmul.f32 0.0, %v4410_v19 }
 0x188   :  { %v329_v20 = vpop.permute.xlu0 %328 }
 0x189   :  { %v331_v21 = vmul.f32 %v4410_v19, %v329_v20 }
 0x18b   :  { %333 = vrot.lane.b32.xlu0 %v331_v21, %s4743_s27 }
 0x18f   :  { %119 = vrot.lane.b32.xlu0 %v104_v22, %s4750_s23 }
 0x193   :  { %115 = vrot.lane.b32.xlu0 %v102_v23, %s4750_s23 }
 0x1fd   :  { %v334_v25 = vpop.permute.xlu0 %333 }
 0x1fe   :  { %v4901_v26 = vadd.f32 %v334_v25, %v326_v24 }
 0x200   :  { %4411 = vtanh.f32 %v4901_v26 }
 0x201   :  { %v120_v33 = vpop.permute.xlu0 %119 }
 0x205   :  { %v116_v36 = vpop.permute.xlu0 %115 }
 0x20d   :  { %v4412_v28 = vpop.eup %4411 }
 0x20e   :  { %339 = vrot.lane.b32.xlu1 %v4412_v28, %s4749_s22 }
 0x212   :  { %121 = vrot.lane.b32.xlu1 %v4909_v29, %s4750_s23 }
 0x216   :  { %117 = vrot.lane.b32.xlu1 %v103_v30, %s4750_s23 }
 0x280   :  { %v340_v31 = vpop.permute.xlu1 %339 }
 0x281   :  { %v342_v32 = vmul.f32 %v4410_v19, %v340_v31 }
 0x283   :  { %344 = vrot.lane.b32.xlu1 %v342_v32, %s4743_s27  ;;  %464 = vrot.lane.b32.xlu0 %v342_v32, %s4749_s22 }
 0x284   :  { %v122_v34 = vpop.permute.xlu1 %121 }
 0x285   :  { %3966 = vmatprep.subr.mxu0 %v122_v34 }
 0x286   :  { %3967 = vmatpush3.msra.mxu0 %v122_v34 }
 0x287   :  { %3968 = vmatprep.subr.mxu0 %v120_v33 }
 0x288   :  { %3969 = vmatpush3.msra.mxu0 %v120_v33  ;;  %v118_v35 = vpop.permute.xlu1 %117 }
 0x289   :  { %3970 = vmatprep.subr.mxu0 %v118_v35 }
 0x28a   :  { %3971 = vmatpush3.msra.mxu0 %v118_v35 }
 0x28b   :  { %3972 = vmatprep.subr.mxu0 %v116_v36 }
 0x28c   :  { %3973 = vmatpush3.msra.mxu0 %v116_v36 }
 0x28d   :  { %3999 = vmatprep.subr.mxu0 %v4747_v0  ;;  %3975 = vmatmul.mubr.msk.f32.vlgmr.msra.gmra.mxu0 %vm130_vm1, %v99_v37 }
 0x28e   :  { %4000 = vmatpush3.msra.mxu0 %v4919_v38  ;;  %3977 = vmatprep.mubr.msk.f32.mxu0 %vm130_vm1, %v100_v39 }
 0x28f   :  { %4001 = vmatprep.subr.mxu0 %v4747_v0 }
 0x290   :  { %4002 = vmatpush3.msra.mxu0 %v4926_v40 }
 0x291   :  { %4003 = vmatprep.subr.mxu0 %v4747_v0  ;;  %3978 = vmatmul.mubr.msk.f32.gmra.mxu0 %vm130_vm1, %v101_v41 }
 0x292   :  { %4004 = vmatpush3.msra.mxu0 %v4934_v42  ;;  %4015 = vmatprep.mubr.msk.f32.mxu0 %vm4748_vm0, %v4747_v0 }
 0x293   :  { %4005 = vmatprep.subr.mxu0 %v4747_v0 }
 0x294   :  { %4006 = vmatpush3.msra.mxu0 %v4938_v43 }
 0x295   :  { %4007 = vmatprep.subr.mxu0 %v4747_v0 }
 0x296   :  { %4008 = vmatpush3.msra.mxu0 %v4945_v44 }
 0x297   :  { %4009 = vmatprep.subr.mxu0 %v4747_v0 }
 0x298   :  { %4010 = vmatpush3.msra.mxu0 %v4949_v45 }
 0x299   :  { %4011 = vmatprep.subr.mxu0 %v4747_v0 }
 0x29a   :  { %4012 = vmatpush3.msra.mxu0 %v4953_v46 }
 0x29b   :  { %4013 = vmatprep.subr.mxu0 %v4747_v0 }
 0x29c   :  { %4014 = vmatpush3.msra.mxu0 %v4957_v47 }
 0x29d   :  { %4037 = vmatprep.subr.mxu0 %v4747_v0 }
 0x2f5   :  { %v345_v49 = vpop.permute.xlu1 %344  ;;  %v465_v50 = vpop.permute.xlu0 %464 }
 0x2f6   :  { %v347_v51 = vsel %vm130_vm1, %v345_v49, 0.0  ;;  %v467_v52 = vsel %vm130_vm1, %v463_v48, %v465_v50  ;;  %v672_v48 = vld [vmem:[#allocation2 + $0x4] sm:$0x3] }
 0x2f7   :  { %4016 = vmatmul.mubr.msk.f32.vlgmr.msra.gmra.mxu0 %vm245_vm2, %v347_v51  ;;  %4035 = vmatmul.mubr.msk.f32.vlgmr.msra.gmra.mxu1 %vm245_vm2, %v467_v52 }
 0x2f8   :  { %4038 = vmatpush3.msra.mxu0 %v4919_v38  ;;  %4057 = vmatpush3.msra.mxu1 %v4839_v1 }
 0x2f9   :  { %4039 = vmatprep.subr.mxu0 %v4747_v0  ;;  %4058 = vmatprep.subr.mxu1 %v4747_v0 }
 0x2fa   :  { %4040 = vmatpush3.msra.mxu0 %v4926_v40  ;;  %4059 = vmatpush3.msra.mxu1 %v4841_v2 }
 0x2fb   :  { %4041 = vmatprep.subr.mxu0 %v4747_v0  ;;  %4060 = vmatprep.subr.mxu1 %v4747_v0 }
 0x2fc   :  { %4042 = vmatpush3.msra.mxu0 %v4934_v42  ;;  %4061 = vmatpush3.msra.mxu1 %v4845_v3 }
 0x2fd   :  { %4043 = vmatprep.subr.mxu0 %v4747_v0  ;;  %4062 = vmatprep.subr.mxu1 %v4747_v0 }
 0x2fe   :  { %4044 = vmatpush3.msra.mxu0 %v4938_v43  ;;  %4063 = vmatpush3.msra.mxu1 %v4849_v4 }
 0x2ff   :  { %4045 = vmatprep.subr.mxu0 %v4747_v0  ;;  %4064 = vmatprep.subr.mxu1 %v4747_v0 }
 0x300   :  { %4046 = vmatpush3.msra.mxu0 %v4945_v44  ;;  %4065 = vmatpush3.msra.mxu1 %v4853_v5 }
 0x301   :  { %4047 = vmatprep.subr.mxu0 %v4747_v0  ;;  %4066 = vmatprep.subr.mxu1 %v4747_v0 }
 0x302   :  { %4048 = vmatpush3.msra.mxu0 %v4949_v45  ;;  %4053 = vmatprep.mubr.msk.f32.mxu0 %vm4748_vm0, %v4747_v0 }
 0x303   :  { %4049 = vmatprep.subr.mxu0 %v4747_v0  ;;  %4067 = vmatpush3.msra.mxu1 %v4857_v6 }
 0x304   :  { %4050 = vmatpush3.msra.mxu0 %v4953_v46  ;;  %4068 = vmatprep.subr.mxu1 %v4747_v0 }
 0x305   :  { %4051 = vmatprep.subr.mxu0 %v4747_v0  ;;  %4069 = vmatpush3.msra.mxu1 %v4861_v7 }
 0x306   :  { %4052 = vmatpush3.msra.mxu0 %v4957_v47  ;;  %4070 = vmatprep.subr.mxu1 %v4747_v0 }
 0x307   :  { %4071 = vmatpush3.msra.mxu1 %v4865_v9  ;;  %4072 = vmatprep.mubr.msk.f32.mxu1 %vm4748_vm0, %v4747_v0 }
 0x308   :  { %4075 = vmatprep.subr.mxu0 %v4747_v0  ;;  %4094 = vmatprep.subr.mxu1 %v4747_v0 }
 0x34d   :  { %v5003_v53 = vpop.f32.mrf.mxu0 }
 0x34f   :  { %v5005_v54 = vpop.f32.mrf.mxu0 }
 0x351   :  { %v5007_v55 = vpop.f32.mrf.mxu0 }
 0x353   :  { %v5009_v56 = vpop.f32.mrf.mxu0 }
 0x3b7   :  { %v434_v58 = vpop.f32.mrf.mxu0  ;;  %v537_v59 = vpop.f32.mrf.mxu1 }
 0x3b8   :  { %v435_v60 = vadd.f32 %v5014_v57, %v434_v58  ;;  %v538_v61 = vadd.f32 %v4894_v11, %v537_v59 }
 0x3b9   :  { %v4017_v62 = vpop.f32.mrf.mxu0  ;;  %v4036_v63 = vpop.f32.mrf.mxu1 }
 0x3ba   :  { %4413 = vtanh.f32 %v435_v60  ;;  %v3654_v12 = vmul.f32 -1.442695, %v435_v60  ;;  %v3656_v13 = vmul.f32 -1.442695, %v538_v61 }
 0x3bb   :  { %4415 = vtanh.f32 %v538_v61 }
 0x3bc   :  { %4417 = vpow2.f32 %v3654_v12 }
 0x3bd   :  { %4419 = vpow2.f32 %v3656_v13 }
 0x3c7   :  { %v4414_v8 = vpop.eup %4413 }
 0x3c8   :  { %v4416_v10 = vpop.eup %4415  ;;  %447 = vrot.lane.b32.xlu1 %v4414_v8, %s4749_s22 }
 0x3c9   :  { %550 = vrot.lane.b32.xlu0 %v4416_v10, %s4749_s22  ;;  %v4418_v14 = vpop.eup %4417 }
 0x3ca   :  { %v4420_v15 = vpop.eup %4419  ;;  %v441_v16 = vadd.f32 1.0, %v4418_v14 }
 0x3cb   :  { %v544_v17 = vadd.f32 1.0, %v4420_v15 }
 0x3cc   :  { %4421 = vrcp.f32 %v441_v16 }
 0x3cd   :  { %4423 = vrcp.f32 %v544_v17 }
 0x3d9   :  { %v4422_v18 = vpop.eup %4421 }
 0x3da   :  { %v4424_v20 = vpop.eup %4423  ;;  %v445_v24 = vmul.f32 0.0, %v4422_v18 }
 0x3db   :  { %v548_v25 = vmul.f32 %v4424_v20, %v4901_v26 }
 0x43a   :  { %v448_v19 = vpop.permute.xlu1 %447 }
 0x43b   :  { %v551_v21 = vpop.permute.xlu0 %550  ;;  %v450_v22 = vmul.f32 %v4422_v18, %v448_v19 }
 0x43c   :  { %v553_v23 = vmul.f32 %v4424_v20, %v551_v21 }
 0x43d   :  { %452 = vrot.lane.b32.xlu1 %v450_v22, %s4743_s27 }
 0x43e   :  { %555 = vrot.lane.b32.xlu0 %v553_v23, %s4743_s27 }
 0x4af   :  { %v453_v27 = vpop.permute.xlu1 %452 }
 0x4b0   :  { %v556_v28 = vpop.permute.xlu0 %555  ;;  %v5023_v30 = vadd.f32 %v453_v27, %v445_v24 }
 0x4b1   :  { %v5025_v31 = vadd.f32 %v556_v28, %v548_v25 }
 0x4b2   :  { %4425 = vtanh.f32 %v5023_v30 }
 0x4b3   :  { %4427 = vtanh.f32 %v5025_v31 }
 0x4bf   :  { %v4426_v32 = vpop.eup %4425 }
 0x4c0   :  { %v4428_v33 = vpop.eup %4427  ;;  %458 = vrot.lane.b32.xlu1 %v4426_v32, %s4749_s22 }
 0x4c1   :  { %561 = vrot.lane.b32.xlu0 %v4428_v33, %s4749_s22 }
 0x532   :  { %v459_v34 = vpop.permute.xlu1 %458 }
 0x533   :  { %v562_v35 = vpop.permute.xlu0 %561  ;;  %v5031_v36 = vmul.f32 %v4422_v18, %v459_v34 }
 0x534   :  { %v564_v26 = vmul.f32 %v4424_v20, %v562_v35 }
 0x535   :  { %570 = vrot.lane.b32.xlu0 %v5031_v36, %s4749_s22 }
 0x536   :  { %566 = vrot.lane.b32.xlu1 %v564_v26, %s4743_s27 }
 0x53a   :  { %673 = vrot.lane.b32.xlu1 %v564_v26, %s4749_s22 }
 0x5a7   :  { %v571_v37 = vpop.permute.xlu0 %570 }
 0x5a8   :  { %v567_v39 = vpop.permute.xlu1 %566 }
 0x5a9   :  { %v573_v41 = vsel %vm130_vm1, %v567_v39, %v571_v37 }
 0x5aa   :  { %4054 = vmatmul.mubr.msk.f32.vlgmr.msra.gmra.mxu0 %vm245_vm2, %v573_v41  ;;  %v881_v41 = vld [vmem:[#allocation2 + $0x6] sm:$0x3] }
 0x5ab   :  { %4076 = vmatpush3.msra.mxu0 %v4919_v38  ;;  %4091 = vmatprep.mubr.msk.f32.mxu0 %vm4748_vm0, %v4747_v0 }
 0x5ac   :  { %v674_v49 = vpop.permute.xlu1 %673  ;;  %4077 = vmatprep.subr.mxu0 %v4747_v0 }
 0x5ad   :  { %v676_v50 = vsel %vm130_vm1, %v672_v48, %v674_v49  ;;  %4078 = vmatpush3.msra.mxu0 %v4926_v40 }
 0x5ae   :  { %4073 = vmatmul.mubr.msk.f32.vlgmr.msra.gmra.mxu1 %vm245_vm2, %v676_v50  ;;  %4079 = vmatprep.subr.mxu0 %v4747_v0 }
 0x5af   :  { %4080 = vmatpush3.msra.mxu0 %v4934_v42  ;;  %4095 = vmatpush3.msra.mxu1 %v4839_v1 }
 0x5b0   :  { %4081 = vmatprep.subr.mxu0 %v4747_v0  ;;  %4096 = vmatprep.subr.mxu1 %v4747_v0 }
 0x5b1   :  { %4082 = vmatpush3.msra.mxu0 %v4938_v43  ;;  %4097 = vmatpush3.msra.mxu1 %v4841_v2 }
 0x5b2   :  { %4083 = vmatprep.subr.mxu0 %v4747_v0  ;;  %4098 = vmatprep.subr.mxu1 %v4747_v0 }
 0x5b3   :  { %4084 = vmatpush3.msra.mxu0 %v4945_v44  ;;  %4099 = vmatpush3.msra.mxu1 %v4845_v3 }
 0x5b4   :  { %4085 = vmatprep.subr.mxu0 %v4747_v0  ;;  %4100 = vmatprep.subr.mxu1 %v4747_v0 }
 0x5b5   :  { %4086 = vmatpush3.msra.mxu0 %v4949_v45  ;;  %4101 = vmatpush3.msra.mxu1 %v4849_v4 }
 0x5b6   :  { %4087 = vmatprep.subr.mxu0 %v4747_v0  ;;  %4102 = vmatprep.subr.mxu1 %v4747_v0 }
 0x5b7   :  { %4088 = vmatpush3.msra.mxu0 %v4953_v46  ;;  %4103 = vmatpush3.msra.mxu1 %v4853_v5 }
 0x5b8   :  { %4089 = vmatprep.subr.mxu0 %v4747_v0  ;;  %4104 = vmatprep.subr.mxu1 %v4747_v0 }
 0x5b9   :  { %4090 = vmatpush3.msra.mxu0 %v4957_v47  ;;  %4105 = vmatpush3.msra.mxu1 %v4857_v6 }
 0x5ba   :  { %4106 = vmatprep.subr.mxu1 %v4747_v0  ;;  %4110 = vmatprep.mubr.msk.f32.mxu1 %vm4748_vm0, %v4747_v0 }
 0x5bb   :  { %4107 = vmatpush3.msra.mxu1 %v4861_v7  ;;  %4113 = vmatprep.subr.mxu0 %v4747_v0 }
 0x5bc   :  { %4108 = vmatprep.subr.mxu1 %v4747_v0 }
 0x5bd   :  { %4109 = vmatpush3.msra.mxu1 %v4865_v9 }
 0x5be   :  { %4132 = vmatprep.subr.mxu1 %v4747_v0 }
 0x66a   :  { %v643_v51 = vpop.f32.mrf.mxu0 }
 0x66b   :  { %v644_v52 = vadd.f32 %v5014_v57, %v643_v51 }
 0x66c   :  { %v4055_v58 = vpop.f32.mrf.mxu0 }
 0x66d   :  { %4429 = vtanh.f32 %v644_v52  ;;  %v3658_v8 = vmul.f32 -1.442695, %v644_v52 }
 0x66e   :  { %v746_v59 = vpop.f32.mrf.mxu1 }
 0x66f   :  { %v747_v60 = vadd.f32 %v4894_v11, %v746_v59 }
 0x670   :  { %v4074_v61 = vpop.f32.mrf.mxu1 }
 0x671   :  { %4431 = vtanh.f32 %v747_v60  ;;  %v3660_v10 = vmul.f32 -1.442695, %v747_v60 }
 0x672   :  { %4433 = vpow2.f32 %v3658_v8 }
 0x673   :  { %4435 = vpow2.f32 %v3660_v10 }
 0x67a   :  { %v4430_v62 = vpop.eup %4429 }
 0x67b   :  { %656 = vrot.lane.b32.xlu0 %v4430_v62, %s4749_s22 }
 0x67e   :  { %v4432_v63 = vpop.eup %4431 }
 0x67f   :  { %759 = vrot.lane.b32.xlu1 %v4432_v63, %s4749_s22  ;;  %v4434_v12 = vpop.eup %4433 }
 0x680   :  { %v650_v13 = vadd.f32 1.0, %v4434_v12  ;;  %v4436_v14 = vpop.eup %4435 }
 0x681   :  { %v753_v15 = vadd.f32 1.0, %v4436_v14 }
 0x682   :  { %4437 = vrcp.f32 %v650_v13 }
 0x683   :  { %4439 = vrcp.f32 %v753_v15 }
 0x68f   :  { %v4438_v16 = vpop.eup %4437 }
 0x690   :  { %v4440_v19 = vpop.eup %4439  ;;  %v654_v22 = vmul.f32 %v4438_v16, %v5023_v30 }
 0x691   :  { %v757_v25 = vmul.f32 %v4440_v19, %v5025_v31 }
 0x6ed   :  { %v657_v17 = vpop.permute.xlu0 %656 }
 0x6ee   :  { %v659_v18 = vmul.f32 %v4438_v16, %v657_v17 }
 0x6f0   :  { %661 = vrot.lane.b32.xlu0 %v659_v18, %s4743_s27 }
 0x6f1   :  { %v760_v20 = vpop.permute.xlu1 %759 }
 0x6f2   :  { %v762_v21 = vmul.f32 %v4440_v19, %v760_v20 }
 0x6f4   :  { %764 = vrot.lane.b32.xlu1 %v762_v21, %s4743_s27 }
 0x762   :  { %v662_v23 = vpop.permute.xlu0 %661 }
 0x763   :  { %v5084_v24 = vadd.f32 %v662_v23, %v654_v22 }
 0x765   :  { %4441 = vtanh.f32 %v5084_v24 }
 0x766   :  { %v765_v27 = vpop.permute.xlu1 %764 }
 0x767   :  { %v5088_v28 = vadd.f32 %v765_v27, %v757_v25 }
 0x769   :  { %4443 = vtanh.f32 %v5088_v28 }
 0x772   :  { %v4442_v32 = vpop.eup %4441 }
 0x773   :  { %667 = vrot.lane.b32.xlu0 %v4442_v32, %s4749_s22 }
 0x776   :  { %v4444_v33 = vpop.eup %4443 }
 0x777   :  { %770 = vrot.lane.b32.xlu1 %v4444_v33, %s4749_s22 }
 0x7e5   :  { %v668_v34 = vpop.permute.xlu0 %667 }
 0x7e6   :  { %v5093_v30 = vmul.f32 %v4438_v16, %v668_v34 }
 0x7e8   :  { %779 = vrot.lane.b32.xlu1 %v5093_v30, %s4749_s22 }
 0x7e9   :  { %v771_v35 = vpop.permute.xlu1 %770 }
 0x7ea   :  { %v773_v26 = vmul.f32 %v4440_v19, %v771_v35 }
 0x7ec   :  { %775 = vrot.lane.b32.xlu0 %v773_v26, %s4743_s27 }
 0x7f0   :  { %882 = vrot.lane.b32.xlu0 %v773_v26, %s4749_s22  ;;  %v1731_v26 = vrot.slane %v5093_v30, 1 }
 0x85a   :  { %v780_v31 = vpop.permute.xlu1 %779 }
 0x85e   :  { %v776_v37 = vpop.permute.xlu0 %775 }
 0x85f   :  { %v782_v39 = vsel %vm130_vm1, %v776_v37, %v780_v31 }
 0x860   :  { %4092 = vmatmul.mubr.msk.f32.vlgmr.msra.gmra.mxu0 %vm245_vm2, %v782_v39 }
 0x861   :  { %4114 = vmatpush3.msra.mxu0 %v4919_v38  ;;  %4129 = vmatprep.mubr.msk.f32.mxu0 %vm4748_vm0, %v4747_v0 }
 0x862   :  { %v883_v48 = vpop.permute.xlu0 %882  ;;  %4115 = vmatprep.subr.mxu0 %v4747_v0 }
 0x863   :  { %v885_v49 = vsel %vm130_vm1, %v881_v41, %v883_v48  ;;  %4116 = vmatpush3.msra.mxu0 %v4926_v40 }
 0x864   :  { %4111 = vmatmul.mubr.msk.f32.vlgmr.msra.gmra.mxu1 %vm245_vm2, %v885_v49  ;;  %4117 = vmatprep.subr.mxu0 %v4747_v0 }
 0x865   :  { %4118 = vmatpush3.msra.mxu0 %v4934_v42  ;;  %4133 = vmatpush3.msra.mxu1 %v4839_v1 }
 0x866   :  { %4119 = vmatprep.subr.mxu0 %v4747_v0  ;;  %4134 = vmatprep.subr.mxu1 %v4747_v0 }
 0x867   :  { %4120 = vmatpush3.msra.mxu0 %v4938_v43  ;;  %4135 = vmatpush3.msra.mxu1 %v4841_v2 }
 0x868   :  { %4121 = vmatprep.subr.mxu0 %v4747_v0  ;;  %4136 = vmatprep.subr.mxu1 %v4747_v0 }
 0x869   :  { %4122 = vmatpush3.msra.mxu0 %v4945_v44  ;;  %4137 = vmatpush3.msra.mxu1 %v4845_v3 }
 0x86a   :  { %4123 = vmatprep.subr.mxu0 %v4747_v0  ;;  %4138 = vmatprep.subr.mxu1 %v4747_v0 }
 0x86b   :  { %4124 = vmatpush3.msra.mxu0 %v4949_v45  ;;  %4139 = vmatpush3.msra.mxu1 %v4849_v4 }
 0x86c   :  { %4125 = vmatprep.subr.mxu0 %v4747_v0  ;;  %4140 = vmatprep.subr.mxu1 %v4747_v0 }
 0x86d   :  { %4126 = vmatpush3.msra.mxu0 %v4953_v46  ;;  %4141 = vmatpush3.msra.mxu1 %v4853_v5 }
 0x86e   :  { %4127 = vmatprep.subr.mxu0 %v4747_v0  ;;  %4142 = vmatprep.subr.mxu1 %v4747_v0 }
 0x86f   :  { %4128 = vmatpush3.msra.mxu0 %v4957_v47  ;;  %4143 = vmatpush3.msra.mxu1 %v4857_v6 }
 0x870   :  { %4144 = vmatprep.subr.mxu1 %v4747_v0  ;;  %4148 = vmatprep.mubr.msk.f32.mxu1 %vm4748_vm0, %v4747_v0 }
 0x871   :  { %4145 = vmatpush3.msra.mxu1 %v4861_v7  ;;  %4151 = vmatprep.subr.mxu0 %v4747_v0 }
 0x872   :  { %4146 = vmatprep.subr.mxu1 %v4747_v0 }
 0x873   :  { %4147 = vmatpush3.msra.mxu1 %v4865_v9 }
 0x874   :  { %4170 = vmatprep.subr.mxu1 %v4747_v0 }
 0x920   :  { %v852_v50 = vpop.f32.mrf.mxu0 }
 0x921   :  { %v853_v51 = vadd.f32 %v5014_v57, %v852_v50 }
 0x922   :  { %v4093_v52 = vpop.f32.mrf.mxu0 }
 0x923   :  { %4445 = vtanh.f32 %v853_v51  ;;  %v3662_v63 = vmul.f32 -1.442695, %v853_v51  ;;  %v1090_v52 = vld [vmem:[#allocation2 + $0x8] sm:$0x3] }
 0x924   :  { %v955_v58 = vpop.f32.mrf.mxu1 }
 0x925   :  { %v956_v59 = vadd.f32 %v4894_v11, %v955_v58 }
 0x926   :  { %v4112_v60 = vpop.f32.mrf.mxu1 }
 0x927   :  { %4447 = vtanh.f32 %v956_v59  ;;  %v3664_v8 = vmul.f32 -1.442695, %v956_v59 }
 0x928   :  { %4449 = vpow2.f32 %v3662_v63 }
 0x929   :  { %4451 = vpow2.f32 %v3664_v8 }
 0x930   :  { %v4446_v61 = vpop.eup %4445 }
 0x931   :  { %865 = vrot.lane.b32.xlu1 %v4446_v61, %s4749_s22 }
 0x934   :  { %v4448_v62 = vpop.eup %4447 }
 0x935   :  { %968 = vrot.lane.b32.xlu0 %v4448_v62, %s4749_s22  ;;  %v4450_v10 = vpop.eup %4449 }
 0x936   :  { %v859_v12 = vadd.f32 1.0, %v4450_v10  ;;  %v4452_v13 = vpop.eup %4451 }
 0x937   :  { %v962_v14 = vadd.f32 1.0, %v4452_v13 }
 0x938   :  { %4453 = vrcp.f32 %v859_v12 }
 0x939   :  { %4455 = vrcp.f32 %v962_v14 }
 0x945   :  { %v4454_v15 = vpop.eup %4453 }
 0x946   :  { %v4456_v18 = vpop.eup %4455  ;;  %v863_v21 = vmul.f32 %v4454_v15, %v5084_v24  ;;  %v1716_v24 = vrot.slane %v5093_v30, 7 }
 0x947   :  { %v966_v25 = vmul.f32 %v4456_v18, %v5088_v28 }
 0x948   :  { %v1742_v39 = vsel %vm1741_vm3, %v5031_v36, %v1716_v24 }
 0x9a3   :  { %v866_v16 = vpop.permute.xlu1 %865 }
 0x9a4   :  { %v868_v17 = vmul.f32 %v4454_v15, %v866_v16 }
 0x9a6   :  { %870 = vrot.lane.b32.xlu1 %v868_v17, %s4743_s27 }
 0x9a7   :  { %v969_v19 = vpop.permute.xlu0 %968 }
 0x9a8   :  { %v971_v20 = vmul.f32 %v4456_v18, %v969_v19 }
 0x9aa   :  { %973 = vrot.lane.b32.xlu0 %v971_v20, %s4743_s27 }
 0xa18   :  { %v871_v22 = vpop.permute.xlu1 %870 }
 0xa19   :  { %v5146_v23 = vadd.f32 %v871_v22, %v863_v21 }
 0xa1b   :  { %4457 = vtanh.f32 %v5146_v23 }
 0xa1c   :  { %v974_v27 = vpop.permute.xlu0 %973 }
 0xa1d   :  { %v5150_v32 = vadd.f32 %v974_v27, %v966_v25 }
 0xa1f   :  { %4459 = vtanh.f32 %v5150_v32 }
 0xa28   :  { %v4458_v33 = vpop.eup %4457 }
 0xa29   :  { %876 = vrot.lane.b32.xlu1 %v4458_v33, %s4749_s22 }
 0xa2c   :  { %v4460_v34 = vpop.eup %4459 }
 0xa2d   :  { %979 = vrot.lane.b32.xlu0 %v4460_v34, %s4749_s22 }
 0xa9b   :  { %v877_v35 = vpop.permute.xlu1 %876 }
 0xa9c   :  { %v879_v31 = vmul.f32 %v4454_v15, %v877_v35 }
 0xa9e   :  { %v1718_v28 = vrot.slane %v879_v31, 6  ;;  %v5157_v37 = vsel %vm1741_vm3, %v1731_v26, %v879_v31  ;;  %988 = vrot.lane.b32.xlu0 %v879_v31, %s4749_s22  ;;  %vm3391_vm3 = vcmask 1042434  }
 0xa9f   :  { %v980_v41 = vpop.permute.xlu0 %979 }
 0xaa0   :  { %v5162_v48 = vsel %vm1743_vm4, %v1742_v39, %v1718_v28  ;;  %v982_v49 = vmul.f32 %v4456_v18, %v980_v41 }
 0xaa2   :  { %984 = vrot.lane.b32.xlu1 %v982_v49, %s4743_s27 }
 0xaa6   :  { %1091 = vrot.lane.b32.xlu1 %v982_v49, %s4749_s22 }
 0xb10   :  { %v989_v30 = vpop.permute.xlu0 %988 }
 0xb14   :  { %v985_v50 = vpop.permute.xlu1 %984 }
 0xb15   :  { %v991_v51 = vsel %vm130_vm1, %v985_v50, %v989_v30  ;;  %v1299_v30 = vld [vmem:[#allocation2 + $0xa] sm:$0x3] }
 0xb16   :  { %4130 = vmatmul.mubr.msk.f32.vlgmr.msra.gmra.mxu0 %vm245_vm2, %v991_v51  ;;  %v4609_v50 = vld [vmem:[#allocation5 + $0x38] sm:$0xff] }
 0xb17   :  { %4152 = vmatpush3.msra.mxu0 %v4919_v38  ;;  %4167 = vmatprep.mubr.msk.f32.mxu0 %vm4748_vm0, %v4747_v0 }
 0xb18   :  { %v1092_v58 = vpop.permute.xlu1 %1091  ;;  %4153 = vmatprep.subr.mxu0 %v4747_v0 }
 0xb19   :  { %v1094_v59 = vsel %vm130_vm1, %v1090_v52, %v1092_v58  ;;  %4154 = vmatpush3.msra.mxu0 %v4926_v40 }
 0xb1a   :  { %4149 = vmatmul.mubr.msk.f32.vlgmr.msra.gmra.mxu1 %vm245_vm2, %v1094_v59  ;;  %4155 = vmatprep.subr.mxu0 %v4747_v0 }
 0xb1b   :  { %4156 = vmatpush3.msra.mxu0 %v4934_v42  ;;  %4171 = vmatpush3.msra.mxu1 %v4839_v1 }
 0xb1c   :  { %4157 = vmatprep.subr.mxu0 %v4747_v0  ;;  %4172 = vmatprep.subr.mxu1 %v4747_v0 }
 0xb1d   :  { %4158 = vmatpush3.msra.mxu0 %v4938_v43  ;;  %4173 = vmatpush3.msra.mxu1 %v4841_v2 }
 0xb1e   :  { %4159 = vmatprep.subr.mxu0 %v4747_v0  ;;  %4174 = vmatprep.subr.mxu1 %v4747_v0 }
 0xb1f   :  { %4160 = vmatpush3.msra.mxu0 %v4945_v44  ;;  %4175 = vmatpush3.msra.mxu1 %v4845_v3 }
 0xb20   :  { %4161 = vmatprep.subr.mxu0 %v4747_v0  ;;  %4176 = vmatprep.subr.mxu1 %v4747_v0 }
 0xb21   :  { %4162 = vmatpush3.msra.mxu0 %v4949_v45  ;;  %4177 = vmatpush3.msra.mxu1 %v4849_v4 }
 0xb22   :  { %4163 = vmatprep.subr.mxu0 %v4747_v0  ;;  %4178 = vmatprep.subr.mxu1 %v4747_v0 }
 0xb23   :  { %4164 = vmatpush3.msra.mxu0 %v4953_v46  ;;  %4179 = vmatpush3.msra.mxu1 %v4853_v5 }
 0xb24   :  { %4165 = vmatprep.subr.mxu0 %v4747_v0  ;;  %4180 = vmatprep.subr.mxu1 %v4747_v0 }
 0xb25   :  { %4166 = vmatpush3.msra.mxu0 %v4957_v47  ;;  %4181 = vmatpush3.msra.mxu1 %v4857_v6 }
 0xb26   :  { %4182 = vmatprep.subr.mxu1 %v4747_v0  ;;  %4186 = vmatprep.mubr.msk.f32.mxu1 %vm4748_vm0, %v4747_v0 }
 0xb27   :  { %4183 = vmatpush3.msra.mxu1 %v4861_v7  ;;  %4189 = vmatprep.subr.mxu0 %v4747_v0 }
 0xb28   :  { %4184 = vmatprep.subr.mxu1 %v4747_v0 }
 0xb29   :  { %4185 = vmatpush3.msra.mxu1 %v4865_v9 }
 0xb2a   :  { %4208 = vmatprep.subr.mxu1 %v4747_v0 }
 0xbd6   :  { %v1061_v1 = vpop.f32.mrf.mxu0 }
 0xbd7   :  { %v1062_v2 = vadd.f32 %v5014_v57, %v1061_v1 }
 0xbd8   :  { %v4131_v3 = vpop.f32.mrf.mxu0 }
 0xbd9   :  { %4461 = vtanh.f32 %v1062_v2  ;;  %v3666_v61 = vmul.f32 -1.442695, %v1062_v2 }
 0xbda   :  { %v1164_v4 = vpop.f32.mrf.mxu1 }
 0xbdb   :  { %v1165_v5 = vadd.f32 %v4894_v11, %v1164_v4 }
 0xbdc   :  { %v4150_v6 = vpop.f32.mrf.mxu1 }
 0xbdd   :  { %4463 = vtanh.f32 %v1165_v5  ;;  %v3668_v9 = vmul.f32 -1.442695, %v1165_v5 }
 0xbde   :  { %4465 = vpow2.f32 %v3666_v61 }
 0xbdf   :  { %4467 = vpow2.f32 %v3668_v9 }
 0xbe6   :  { %v4462_v60 = vpop.eup %4461 }
 0xbe7   :  { %1074 = vrot.lane.b32.xlu0 %v4462_v60, %s4749_s22 }
 0xbea   :  { %v4464_v7 = vpop.eup %4463 }
 0xbeb   :  { %1177 = vrot.lane.b32.xlu1 %v4464_v7, %s4749_s22  ;;  %v4466_v62 = vpop.eup %4465 }
 0xbec   :  { %v1068_v63 = vadd.f32 1.0, %v4466_v62  ;;  %v4468_v8 = vpop.eup %4467 }
 0xbed   :  { %v1171_v10 = vadd.f32 1.0, %v4468_v8 }
 0xbee   :  { %4469 = vrcp.f32 %v1068_v63 }
 0xbef   :  { %4471 = vrcp.f32 %v1171_v10 }
 0xbfb   :  { %v4470_v12 = vpop.eup %4469 }
 0xbfc   :  { %v4472_v15 = vpop.eup %4471  ;;  %v1072_v18 = vmul.f32 %v4470_v12, %v5146_v23 }
 0xbfd   :  { %v1175_v21 = vmul.f32 %v4472_v15, %v5150_v32 }
 0xc59   :  { %v1075_v13 = vpop.permute.xlu0 %1074 }
 0xc5a   :  { %v1077_v14 = vmul.f32 %v4470_v12, %v1075_v13 }
 0xc5c   :  { %1079 = vrot.lane.b32.xlu0 %v1077_v14, %s4743_s27 }
 0xc5d   :  { %v1178_v16 = vpop.permute.xlu1 %1177 }
 0xc5e   :  { %v1180_v17 = vmul.f32 %v4472_v15, %v1178_v16 }
 0xc60   :  { %1182 = vrot.lane.b32.xlu1 %v1180_v17, %s4743_s27 }
 0xcce   :  { %v1080_v19 = vpop.permute.xlu0 %1079 }
 0xccf   :  { %v5213_v20 = vadd.f32 %v1080_v19, %v1072_v18 }
 0xcd1   :  { %4473 = vtanh.f32 %v5213_v20 }
 0xcd2   :  { %v1183_v22 = vpop.permute.xlu1 %1182 }
 0xcd3   :  { %v5217_v25 = vadd.f32 %v1183_v22, %v1175_v21 }
 0xcd5   :  { %4475 = vtanh.f32 %v5217_v25 }
 0xcde   :  { %v4474_v27 = vpop.eup %4473 }
 0xcdf   :  { %1085 = vrot.lane.b32.xlu0 %v4474_v27, %s4749_s22 }
 0xce2   :  { %v4476_v33 = vpop.eup %4475 }
 0xce3   :  { %1188 = vrot.lane.b32.xlu1 %v4476_v33, %s4749_s22 }
 0xd51   :  { %v1086_v34 = vpop.permute.xlu0 %1085 }
 0xd52   :  { %v1088_v23 = vmul.f32 %v4470_v12, %v1086_v34 }
 0xd54   :  { %v1720_v24 = vrot.slane %v1088_v23, 5  ;;  %v1733_v35 = vrot.slane %v1088_v23, 7  ;;  %1197 = vrot.lane.b32.xlu1 %v1088_v23, %s4749_s22 }
 0xd55   :  { %v1189_v26 = vpop.permute.xlu1 %1188 }
 0xd56   :  { %v1191_v32 = vmul.f32 %v4472_v15, %v1189_v26  ;;  %v5225_v31 = vsel %vm1743_vm4, %v5157_v37, %v1733_v35  ;;  %v5229_v28 = vsel %vm1745_vm5, %v5162_v48, %v1720_v24  ;;  %v1508_v26 = vld [vmem:[#allocation2 + $0xc] sm:$0x3]  ;;  %vm3393_vm4 = vcmask 1043459  }
 0xd58   :  { %1193 = vrot.lane.b32.xlu0 %v1191_v32, %s4743_s27 }
 0xd5c   :  { %1300 = vrot.lane.b32.xlu0 %v1191_v32, %s4749_s22  ;;  %v4617_v32 = vld [vmem:[#allocation5 + $0x78] sm:$0xff] }
 0xdc6   :  { %v1198_v39 = vpop.permute.xlu1 %1197 }
 0xdca   :  { %v1194_v41 = vpop.permute.xlu0 %1193 }
 0xdcb   :  { %v1200_v49 = vsel %vm130_vm1, %v1194_v41, %v1198_v39  ;;  %v4618_v39 = vld [vmem:[#allocation5 + $0x70] sm:$0xff]  ;;  %v4619_v41 = vld [vmem:[#allocation5 + $0x68] sm:$0xff] }
 0xdcc   :  { %4168 = vmatmul.mubr.msk.f32.vlgmr.msra.gmra.mxu0 %vm245_vm2, %v1200_v49  ;;  %v4620_v49 = vld [vmem:[#allocation7 + $0x18] sm:$0xff] }
 0xdcd   :  { %4190 = vmatpush3.msra.mxu0 %v4919_v38  ;;  %4205 = vmatprep.mubr.msk.f32.mxu0 %vm4748_vm0, %v4747_v0  ;;  %v4610_v38 = vld [vmem:[#allocation5 + $0x30] sm:$0xff] }
 0xdce   :  { %v1301_v37 = vpop.permute.xlu0 %1300  ;;  %4191 = vmatprep.subr.mxu0 %v4747_v0 }
 0xdcf   :  { %v1303_v48 = vsel %vm130_vm1, %v1299_v30, %v1301_v37  ;;  %4192 = vmatpush3.msra.mxu0 %v4926_v40  ;;  %v4611_v40 = vld [vmem:[#allocation5 + $0x28] sm:$0xff]  ;;  %v4621_v30 = vld [vmem:[#allocation7 + $0x10] sm:$0xff]  ;;  %v4622_v37 = vld [vmem:[#allocation5 + $0x60] sm:$0xff] }
 0xdd0   :  { %4187 = vmatmul.mubr.msk.f32.vlgmr.msra.gmra.mxu1 %vm245_vm2, %v1303_v48  ;;  %4193 = vmatprep.subr.mxu0 %v4747_v0  ;;  %v4623_v48 = vld [vmem:[#allocation7 + $0x8] sm:$0xff] }
 0xdd1   :  { %4194 = vmatpush3.msra.mxu0 %v4934_v42  ;;  %4209 = vmatpush3.msra.mxu1 %v4609_v50  ;;  %v4612_v42 = vld [vmem:[#allocation5 + $0x20] sm:$0xff]  ;;  %v4624_v50 = vld [vmem:[#allocation5 + $0x58] sm:$0xff] }
 0xdd2   :  { %4195 = vmatprep.subr.mxu0 %v4747_v0  ;;  %4210 = vmatprep.subr.mxu1 %v4747_v0 }
 0xdd3   :  { %4196 = vmatpush3.msra.mxu0 %v4938_v43  ;;  %4211 = vmatpush3.msra.mxu1 %v4610_v38  ;;  %v4613_v43 = vld [vmem:[#allocation5 + $0x18] sm:$0xff]  ;;  %v4625_v38 = vld [vmem:[#allocation7] sm:$0xff] }
 0xdd4   :  { %4197 = vmatprep.subr.mxu0 %v4747_v0  ;;  %4212 = vmatprep.subr.mxu1 %v4747_v0 }
 0xdd5   :  { %4198 = vmatpush3.msra.mxu0 %v4945_v44  ;;  %4213 = vmatpush3.msra.mxu1 %v4611_v40  ;;  %v4614_v44 = vld [vmem:[#allocation5 + $0x10] sm:$0xff] }
 0xdd6   :  { %4199 = vmatprep.subr.mxu0 %v4747_v0  ;;  %4214 = vmatprep.subr.mxu1 %v4747_v0  ;;  %v4626_v40 = vld [vmem:[#allocation5 + $0x50] sm:$0xff] }
 0xdd7   :  { %4200 = vmatpush3.msra.mxu0 %v4949_v45  ;;  %4215 = vmatpush3.msra.mxu1 %v4612_v42  ;;  %v4615_v45 = vld [vmem:[#allocation5 + $0x8] sm:$0xff] }
 0xdd8   :  { %4201 = vmatprep.subr.mxu0 %v4747_v0  ;;  %4216 = vmatprep.subr.mxu1 %v4747_v0  ;;  %v4627_v42 = vld [vmem:[#allocation5 + $0x48] sm:$0xff] }
 0xdd9   :  { %4202 = vmatpush3.msra.mxu0 %v4953_v46  ;;  %4217 = vmatpush3.msra.mxu1 %v4613_v43  ;;  %v4616_v46 = vld [vmem:[#allocation5] sm:$0xff] }
 0xdda   :  { %4203 = vmatprep.subr.mxu0 %v4747_v0  ;;  %4218 = vmatprep.subr.mxu1 %v4747_v0  ;;  %v4628_v43 = vld [vmem:[#allocation5 + $0x40] sm:$0xff] }
 0xddb   :  { %4204 = vmatpush3.msra.mxu0 %v4957_v47  ;;  %4219 = vmatpush3.msra.mxu1 %v4614_v44 }
 0xddc   :  { %4220 = vmatprep.subr.mxu1 %v4747_v0  ;;  %4224 = vmatprep.mubr.msk.f32.mxu1 %vm4748_vm0, %v4747_v0 }
 0xddd   :  { %4221 = vmatpush3.msra.mxu1 %v4615_v45  ;;  %4227 = vmatprep.subr.mxu0 %v4747_v0 }
 0xdde   :  { %4222 = vmatprep.subr.mxu1 %v4747_v0 }
 0xddf   :  { %4223 = vmatpush3.msra.mxu1 %v4616_v46 }
 0xde0   :  { %4246 = vmatprep.subr.mxu1 %v4909_v29 }
 0xe8c   :  { %v1270_v51 = vpop.f32.mrf.mxu0 }
 0xe8d   :  { %v1271_v47 = vadd.f32 %v5014_v57, %v1270_v51 }
 0xe8e   :  { %v4169_v52 = vpop.f32.mrf.mxu0 }
 0xe8f   :  { %4477 = vtanh.f32 %v1271_v47  ;;  %v3670_v4 = vmul.f32 -1.442695, %v1271_v47  ;;  %v4629_v47 = vld [vmem:[%s5894_s3] ss:$0 sm:$0xff] }
 0xe90   :  { %v1373_v58 = vpop.f32.mrf.mxu1 }
 0xe91   :  { %v1374_v59 = vadd.f32 %v4894_v11, %v1373_v58 }
 0xe92   :  { %v4188_v1 = vpop.f32.mrf.mxu1 }
 0xe93   :  { %4479 = vtanh.f32 %v1374_v59  ;;  %v3672_v5 = vmul.f32 -1.442695, %v1374_v59 }
 0xe94   :  { %4481 = vpow2.f32 %v3670_v4 }
 0xe95   :  { %4483 = vpow2.f32 %v3672_v5 }
 0xe9c   :  { %v4478_v2 = vpop.eup %4477 }
 0xe9d   :  { %1283 = vrot.lane.b32.xlu1 %v4478_v2, %s4749_s22 }
 0xea0   :  { %v4480_v3 = vpop.eup %4479 }
 0xea1   :  { %1386 = vrot.lane.b32.xlu0 %v4480_v3, %s4749_s22  ;;  %v4482_v29 = vpop.eup %4481 }
 0xea2   :  { %v1277_v6 = vadd.f32 1.0, %v4482_v29  ;;  %v4484_v60 = vpop.eup %4483 }
 0xea3   :  { %v1380_v7 = vadd.f32 1.0, %v4484_v60 }
 0xea4   :  { %4485 = vrcp.f32 %v1277_v6 }
 0xea5   :  { %4487 = vrcp.f32 %v1380_v7 }
 0xeb1   :  { %v4486_v61 = vpop.eup %4485 }
 0xeb2   :  { %v4488_v62 = vpop.eup %4487  ;;  %v1281_v10 = vmul.f32 %v4486_v61, %v5213_v20 }
 0xeb3   :  { %v1384_v14 = vmul.f32 %v4488_v62, %v5217_v25 }
 0xf0f   :  { %v1284_v11 = vpop.permute.xlu1 %1283 }
 0xf10   :  { %v1286_v9 = vmul.f32 %v4486_v61, %v1284_v11 }
 0xf12   :  { %1288 = vrot.lane.b32.xlu1 %v1286_v9, %s4743_s27 }
 0xf13   :  { %v1387_v63 = vpop.permute.xlu0 %1386 }
 0xf14   :  { %v1389_v8 = vmul.f32 %v4488_v62, %v1387_v63 }
 0xf16   :  { %1391 = vrot.lane.b32.xlu0 %v1389_v8, %s4743_s27 }
 0xf84   :  { %v1289_v12 = vpop.permute.xlu1 %1288 }
 0xf85   :  { %v5272_v13 = vadd.f32 %v1289_v12, %v1281_v10 }
 0xf87   :  { %4489 = vtanh.f32 %v5272_v13 }
 0xf88   :  { %v1392_v15 = vpop.permute.xlu0 %1391 }
 0xf89   :  { %v5276_v16 = vadd.f32 %v1392_v15, %v1384_v14 }
 0xf8b   :  { %4491 = vtanh.f32 %v5276_v16 }
 0xf94   :  { %v4490_v17 = vpop.eup %4489 }
 0xf95   :  { %1294 = vrot.lane.b32.xlu1 %v4490_v17, %s4749_s22 }
 0xf98   :  { %v4492_v18 = vpop.eup %4491 }
 0xf99   :  { %1397 = vrot.lane.b32.xlu0 %v4492_v18, %s4749_s22 }
0x1007   :  { %v1295_v19 = vpop.permute.xlu1 %1294 }
0x1008   :  { %v1297_v20 = vmul.f32 %v4486_v61, %v1295_v19 }
0x100a   :  { %v1722_v21 = vrot.slane %v1297_v20, 4  ;;  %v1735_v22 = vrot.slane %v1297_v20, 6  ;;  %1406 = vrot.lane.b32.xlu0 %v1297_v20, %s4749_s22 }
0x100b   :  { %v1398_v27 = vpop.permute.xlu0 %1397 }
0x100c   :  { %v1400_v25 = vmul.f32 %v4488_v62, %v1398_v27  ;;  %v5284_v33 = vsel %vm1745_vm5, %v5225_v31, %v1735_v22  ;;  %v5288_v34 = vsel %vm1747_vm6, %v5229_v28, %v1722_v21  ;;  %vm3395_vm5 = vcmask 1044484  }
0x100e   :  { %1402 = vrot.lane.b32.xlu1 %v1400_v25, %s4743_s27 }
0x1012   :  { %1509 = vrot.lane.b32.xlu1 %v1400_v25, %s4749_s22 }
0x107c   :  { %v1407_v23 = vpop.permute.xlu0 %1406 }
0x1080   :  { %v1403_v24 = vpop.permute.xlu1 %1402 }
0x1081   :  { %v1409_v35 = vsel %vm130_vm1, %v1403_v24, %v1407_v23 }
0x1082   :  { %4206 = vmatmul.mubr.msk.f32.vlgmr.msra.gmra.mxu0 %vm245_vm2, %v1409_v35  ;;  %v4630_v35 = vld [vmem:[%s5894_s3 + $0x1] ss:$0 sm:$0xff] }
0x1083   :  { %4228 = vmatpush3.msra.mxu0 %v4617_v32  ;;  %4243 = vmatprep.mubr.msk.f32.mxu0 %vm4748_vm0, %v4747_v0  ;;  %vm3389_vm0 = vcmask 1041409  }
0x1084   :  { %v1510_v31 = vpop.permute.xlu1 %1509  ;;  %4229 = vmatprep.subr.mxu0 %v4747_v0 }
0x1085   :  { %v1512_v28 = vsel %vm130_vm1, %v1508_v26, %v1510_v31  ;;  %4230 = vmatpush3.msra.mxu0 %v4618_v39 }
0x1086   :  { %4225 = vmatmul.mubr.msk.f32.vlgmr.msra.gmra.mxu1 %vm245_vm2, %v1512_v28  ;;  %4231 = vmatprep.subr.mxu0 %v4747_v0 }
0x1087   :  { %4232 = vmatpush3.msra.mxu0 %v4619_v41  ;;  %4247 = vmatpush3.msra.mxu1 %v4620_v49 }
0x1088   :  { %4233 = vmatprep.subr.mxu0 %v4747_v0  ;;  %4248 = vmatprep.subr.mxu1 %v4621_v30 }
0x1089   :  { %4234 = vmatpush3.msra.mxu0 %v4622_v37  ;;  %4249 = vmatpush3.msra.mxu1 %v4621_v30 }
0x108a   :  { %4235 = vmatprep.subr.mxu0 %v4747_v0  ;;  %4250 = vmatprep.subr.mxu1 %v4623_v48 }
0x108b   :  { %4236 = vmatpush3.msra.mxu0 %v4624_v50  ;;  %4251 = vmatpush3.msra.mxu1 %v4623_v48 }
0x108c   :  { %4237 = vmatprep.subr.mxu0 %v4747_v0  ;;  %4252 = vmatprep.subr.mxu1 %v4625_v38 }
0x108d   :  { %4238 = vmatpush3.msra.mxu0 %v4626_v40  ;;  %4253 = vmatpush3.msra.mxu1 %v4625_v38 }
0x108e   :  { %4239 = vmatprep.subr.mxu0 %v4747_v0 }
0x108f   :  { %4240 = vmatpush3.msra.mxu0 %v4627_v42 }
0x1090   :  { %4241 = vmatprep.subr.mxu0 %v4747_v0 }
0x1091   :  { %4242 = vmatpush3.msra.mxu0 %v4628_v43 }
0x1142   :  { %v1479_v44 = vpop.f32.mrf.mxu0 }
0x1143   :  { %v1480_v45 = vadd.f32 %v5014_v57, %v1479_v44  ;;  %v1729_v44 = vrot.slane %v5031_v36, 2 }
0x1144   :  { %v4207_v46 = vpop.f32.mrf.mxu0 }
0x1145   :  { %4493 = vtanh.f32 %v1480_v45  ;;  %v3674_v0 = vmul.f32 -1.442695, %v1480_v45 }
0x1146   :  { %v1582_v51 = vpop.f32.mrf.mxu1 }
0x1147   :  { %v1583_v52 = vadd.f32 %v4629_v47, %v1582_v51 }
0x1148   :  { %v4226_v58 = vpop.f32.mrf.mxu1 }
0x1149   :  { %4495 = vtanh.f32 %v1583_v52  ;;  %v3676_v2 = vmul.f32 -1.442695, %v1583_v52 }
0x114a   :  { %4497 = vpow2.f32 %v3674_v0 }
0x114b   :  { %4499 = vpow2.f32 %v3676_v2 }
0x1152   :  { %v4494_v59 = vpop.eup %4493 }
0x1153   :  { %1492 = vrot.lane.b32.xlu0 %v4494_v59, %s4749_s22 }
0x1156   :  { %v4496_v1 = vpop.eup %4495 }
0x1157   :  { %1595 = vrot.lane.b32.xlu1 %v4496_v1, %s4749_s22  ;;  %v4498_v57 = vpop.eup %4497 }
0x1158   :  { %v1486_v3 = vadd.f32 1.0, %v4498_v57  ;;  %v4500_v4 = vpop.eup %4499 }
0x1159   :  { %v1589_v5 = vadd.f32 1.0, %v4500_v4 }
0x115a   :  { %4501 = vrcp.f32 %v1486_v3 }
0x115b   :  { %4503 = vrcp.f32 %v1589_v5 }
0x1167   :  { %v4502_v29 = vpop.eup %4501 }
0x1168   :  { %v4504_v7 = vpop.eup %4503  ;;  %v1490_v9 = vmul.f32 %v4502_v29, %v5272_v13 }
0x1169   :  { %v1593_v8 = vmul.f32 %v4504_v7, %v5276_v16 }
0x11c5   :  { %v1493_v6 = vpop.permute.xlu0 %1492 }
0x11c6   :  { %v1495_v60 = vmul.f32 %v4502_v29, %v1493_v6 }
0x11c8   :  { %1497 = vrot.lane.b32.xlu0 %v1495_v60, %s4743_s27 }
0x11c9   :  { %v1596_v61 = vpop.permute.xlu1 %1595 }
0x11ca   :  { %v1598_v11 = vmul.f32 %v4504_v7, %v1596_v61  ;;  %v3680_v61 = vld [vmem:[%s5895_s4 + $0x1] ss:$0 sm:$0xff] }
0x11cc   :  { %1600 = vrot.lane.b32.xlu1 %v1598_v11, %s4743_s27  ;;  %v3679_v11 = vld [vmem:[%s5895_s4] ss:$0 sm:$0xff] }
0x123a   :  { %v1498_v62 = vpop.permute.xlu0 %1497 }
0x123b   :  { %v1500_v63 = vadd.f32 %v1498_v62, %v1490_v9 }
0x123d   :  { %4505 = vtanh.f32 %v1500_v63 }
0x123e   :  { %v1601_v10 = vpop.permute.xlu1 %1600 }
0x123f   :  { %v1603_v12 = vadd.f32 %v1601_v10, %v1593_v8 }
0x1241   :  { %4507 = vtanh.f32 %v1603_v12 }
0x124a   :  { %v4506_v14 = vpop.eup %4505 }
0x124b   :  { %1503 = vrot.lane.b32.xlu0 %v4506_v14, %s4749_s22 }
0x124e   :  { %v4508_v15 = vpop.eup %4507 }
0x124f   :  { %1606 = vrot.lane.b32.xlu1 %v4508_v15, %s4749_s22 }
0x12bd   :  { %v1504_v17 = vpop.permute.xlu0 %1503 }
0x12be   :  { %v1506_v18 = vmul.f32 %v4502_v29, %v1504_v17 }
0x12c0   :  { %v1724_v19 = vrot.slane %v1506_v18, 3  ;;  %v1737_v20 = vrot.slane %v1506_v18, 5  ;;  %1615 = vrot.lane.b32.xlu1 %v1506_v18, %s4749_s22 }
0x12c1   :  { %v1607_v13 = vpop.permute.xlu1 %1606 }
0x12c2   :  { %v1609_v21 = vmul.f32 %v4504_v7, %v1607_v13  ;;  %v1758_v16 = vsel %vm1747_vm6, %v5284_v33, %v1737_v20  ;;  %v1750_v22 = vsel %vm1749_vm7, %v5288_v34, %v1724_v19  ;;  %vm3397_vm6 = vcmask 1045509  }
0x12c4   :  { %1611 = vrot.lane.b32.xlu0 %v1609_v21, %s4743_s27 }
0x1332   :  { %v1616_v27 = vpop.permute.xlu1 %1615 }
0x1336   :  { %v1612_v25 = vpop.permute.xlu0 %1611 }
0x1337   :  { %v1618_v23 = vsel %vm130_vm1, %v1612_v25, %v1616_v27 }
0x1338   :  { %4244 = vmatmul.mubr.msk.f32.vlgmr.msra.gmra.mxu0 %vm245_vm2, %v1618_v23 }
0x13f8   :  { %v1688_v24 = vpop.f32.mrf.mxu0 }
0x13f9   :  { %v1689_v26 = vadd.f32 %v4630_v35, %v1688_v24 }
0x13fa   :  { %v4245_v32 = vpop.f32.mrf.mxu0 }
0x13fb   :  { %4509 = vtanh.f32 %v1689_v26  ;;  %v3678_v34 = vmul.f32 -1.442695, %v1689_v26 }
0x13fd   :  { %4511 = vpow2.f32 %v3678_v34 }
0x1408   :  { %v4510_v33 = vpop.eup %4509 }
0x1409   :  { %1701 = vrot.lane.b32.xlu0 %v4510_v33, %s4749_s22 }
0x140a   :  { %v4512_v31 = vpop.eup %4511 }
0x140b   :  { %v1695_v28 = vadd.f32 1.0, %v4512_v31 }
0x140d   :  { %4513 = vrcp.f32 %v1695_v28  ;;  %v3643_v28 = vld [vmem:[%s5897_s6] ss:$0 sm:$0xff] }
0x141a   :  { %v4514_v39 = vpop.eup %4513 }
0x141b   :  { %v1699_v30 = vmul.f32 %v4514_v39, %v1500_v63 }
0x147b   :  { %v1702_v41 = vpop.permute.xlu0 %1701 }
0x147c   :  { %v1704_v49 = vmul.f32 %v4514_v39, %v1702_v41 }
0x147e   :  { %1706 = vrot.lane.b32.xlu1 %v1704_v49, %s4743_s27 }
0x14f0   :  { %v1707_v37 = vpop.permute.xlu1 %1706 }
0x14f1   :  { %v1709_v48 = vadd.f32 %v1707_v37, %v1699_v30 }
0x14f3   :  { %4515 = vtanh.f32 %v1709_v48 }
0x1500   :  { %v4516_v50 = vpop.eup %4515 }
0x1501   :  { %1712 = vrot.lane.b32.xlu0 %v4516_v50, %s4749_s22 }
0x1573   :  { %v1713_v38 = vpop.permute.xlu0 %1712 }
0x1574   :  { %v1715_v40 = vmul.f32 %v4514_v39, %v1713_v38  ;;  %v3416_v38 = vld [vmem:[#allocation7] sm:$0xff] }
0x1576   :  { %v1727_v42 = vrot.slane %v1715_v40, 2  ;;  %v1739_v43 = vrot.slane %v1715_v40, 4  ;;  %v3417_v40 = vld [vmem:[#allocation7 + $0x8] sm:$0xff] }
0x1578   :  { %v5333_v45 = vsel %vm1749_vm7, %v1758_v16, %v1739_v43  ;;  %v1752_v46 = vsel %vm1751_vm8, %v1750_v22, %v1727_v42  ;;  %v5412_v42 = vld [vmem:[%s5900_s9 + $0x8] sm:$0xff]  ;;  %v5419_v43 = vld [vmem:[%s5900_s9] sm:$0xff]  ;;  %vm3399_vm7 = vcmask 1046534  }
0x1579   :  { %1764 = vrot.lane.b32.xlu0 %v5333_v45, %s4743_s27  ;;  %v5338_v51 = vsel %vm1753_vm9, %v1752_v46, %v1729_v44  ;;  %v4751_v44 = vmov 1966171168   ;;  %v1929_v46 = vlaneseq }
0x157a   :  { %1762 = vrot.lane.b32.xlu1 %v5338_v51, %s4743_s27 }
0x15eb   :  { %v1765_v47 = vpop.permute.xlu0 %1764 }
0x15ec   :  { %v1763_v52 = vpop.permute.xlu1 %1762  ;;  %v1772_v58 = vsel %vm1771_vm10, %v1765_v47, 0.0  ;;  %v1930_v47 = vshrl.u32 %v1929_v46, 7 }
0x15ed   :  { %1773 = vadd.xlane.f32.xlu0 %v1772_v58  ;;  %v1768_v36 = vsel %vm130_vm1, %v1763_v52, 0.0 }
0x15ee   :  { %1769 = vadd.xlane.f32.xlu1 %v1768_v36 }
0x1676   :  { %v1774_v59 = vpop.xlane.xlu0 %1773 }
0x1677   :  { %v1777_v1 = vmul.f32 0.03125, %v1774_v59  ;;  %v1770_v0 = vpop.xlane.xlu1 %1769 }
0x1678   :  { %v1776_v2 = vmul.f32 0.03125, %v1770_v0 }
0x1679   :  { %v1779_v57 = vsub.f32 %v5333_v45, %v1777_v1 }
0x167a   :  { %v1778_v3 = vsub.f32 %v5338_v51, %v1776_v2 }
0x167b   :  { %v1781_v4 = vmul.f32 %v1779_v57, %v1779_v57 }
0x167c   :  { %v1780_v5 = vmul.f32 %v1778_v3, %v1778_v3 }
0x167d   :  { %1786 = vrot.lane.b32.xlu1 %v1781_v4, %s4743_s27 }
0x167e   :  { %1784 = vrot.lane.b32.xlu0 %v1780_v5, %s4743_s27 }
0x16ef   :  { %v1787_v29 = vpop.permute.xlu1 %1786 }
0x16f0   :  { %v1785_v6 = vpop.permute.xlu0 %1784  ;;  %v1793_v60 = vsel %vm1771_vm10, %v1787_v29, 0.0 }
0x16f1   :  { %1794 = vadd.xlane.f32.xlu0 %v1793_v60  ;;  %v1790_v7 = vsel %vm130_vm1, %v1785_v6, 0.0 }
0x16f2   :  { %1791 = vadd.xlane.f32.xlu1 %v1790_v7 }
0x1703   :  { %1833 = vrot.lane.b32.xlu1 %v3680_v61, %s4750_s23 }
0x1707   :  { %1823 = vrot.lane.b32.xlu0 %v3679_v11, %s4750_s23 }
0x177a   :  { %v1795_v9 = vpop.xlane.xlu0 %1794 }
0x177b   :  { %v1797_v62 = vmul.f32 0.03125, %v1795_v9  ;;  %v1792_v63 = vpop.xlane.xlu1 %1791 }
0x177c   :  { %v1796_v8 = vmul.f32 0.03125, %v1792_v63 }
0x177d   :  { %v1799_v10 = vadd.f32 1e-06, %v1797_v62 }
0x177e   :  { %v1798_v12 = vadd.f32 1e-06, %v1796_v8  ;;  %v1824_v25 = vpop.permute.xlu0 %1823 }
0x177f   :  { %4517 = vrsqrt.f32 %v1799_v10  ;;  %vm1809_vm11 = vcmp.eq.f32.partialorder %v1799_v10, inf  ;;  %v1812_v18 = vand.u32 2147483648, %v1799_v10  ;;  %vm1811_vm12 = vcmp.eq.f32.partialorder %v1799_v10, 0.0  ;;  %v1834_v26 = vpop.permute.xlu1 %1833 }
0x1780   :  { %4519 = vrsqrt.f32 %v1798_v12  ;;  %vm1802_vm13 = vcmp.eq.f32.partialorder %v1798_v12, inf  ;;  %v1805_v13 = vand.u32 2147483648, %v1798_v12  ;;  %vm1804_vm14 = vcmp.eq.f32.partialorder %v1798_v12, 0.0 }
0x178c   :  { %v4518_v14 = vpop.eup %4517 }
0x178d   :  { %v4520_v15 = vpop.eup %4519  ;;  %v1808_v17 = vmul.f32 %v4518_v14, %v1799_v10 }
0x178e   :  { %v1801_v19 = vmul.f32 %v4520_v15, %v1798_v12 }
0x178f   :  { %v1810_v20 = vsel %vm1809_vm11, %v1799_v10, %v1808_v17 }
0x1790   :  { %v1803_v21 = vsel %vm1802_vm13, %v1798_v12, %v1801_v19  ;;  %v1813_v16 = vsel %vm1811_vm12, %v1812_v18, %v1810_v20 }
0x1791   :  { %v1806_v22 = vsel %vm1804_vm14, %v1805_v13, %v1803_v21  ;;  %4521 = vrcp.f32 %v1813_v16 }
0x1792   :  { %4523 = vrcp.f32 %v1806_v22 }
0x179e   :  { %v4522_v27 = vpop.eup %4521 }
0x179f   :  { %v4524_v23 = vpop.eup %4523  ;;  %v1817_v24 = vmul.f32 %v4522_v27, %v1779_v57  ;;  %v1975_v57 = vsub.s32 0, %v1930_v47 }
0x17a0   :  { %v1815_v35 = vmul.f32 %v4524_v23, %v1778_v3 }
0x17a1   :  { %v1827_v32 = vmul.f32 %v1824_v25, %v1817_v24 }
0x17a2   :  { %v1826_v33 = vmul.f32 %v1824_v25, %v1815_v35 }
0x17a3   :  { %v1837_v34 = vadd.f32 %v1834_v26, %v1827_v32 }
0x17a4   :  { %v1836_v31 = vadd.f32 %v1834_v26, %v1826_v33 }
0x17a5   :  { %1843 = vrot.lane.b32.xlu0 %v1837_v34, %s4743_s27 }
0x17a6   :  { %1841 = vrot.lane.b32.xlu1 %v1836_v31, %s4743_s27 }
0x17aa   :  { %127 = vrot.lane.b32.xlu1 %v3643_v28, %s4750_s23 }
0x1817   :  { %v1844_v41 = vpop.permute.xlu0 %1843 }
0x1818   :  { %v1842_v39 = vpop.permute.xlu1 %1841 }
0x1819   :  { %4254 = vmatprep.mubr.msk.f32.mxu1 %vm130_vm1, %v1842_v39 }
0x181a   :  { %4255 = vmatmul.mubr.msk.f32.vlgmr.msra.gmra.mxu1 %vm130_vm1, %v1844_v41 }
0x181c   :  { %v128_v49 = vpop.permute.xlu1 %127 }
0x181d   :  { %v5367_v30 = vadd.f32 %v5005_v54, %v128_v49  ;;  %v5370_v37 = vadd.f32 %v5003_v53, %v128_v49  ;;  %v5377_v48 = vadd.f32 %v5009_v56, %v128_v49  ;;  %v5380_v50 = vadd.f32 %v5007_v55, %v128_v49  ;;  %v3418_v53 = vld [vmem:[#allocation7 + $0x10] sm:$0xff]  ;;  %v3419_v54 = vld [vmem:[#allocation7 + $0x18] sm:$0xff]  ;;  %v5405_v56 = vld [vmem:[%s5900_s9 + $0x10] sm:$0xff] }
0x181e   :  { %v5398_v55 = vld [vmem:[%s5900_s9 + $0x18] sm:$0xff] }
0x181f   :  { %2575 = vrot.lane.b32.xlu1 %v5370_v37, %s4750_s23  ;;  %2573 = vrot.lane.b32.xlu0 %v5367_v30, %s4750_s23 }
0x1820   :  { %4257 = vmatprep.subr.mxu0 %v5398_v55 }
0x1821   :  { %4258 = vmatpush3.msra.mxu0 %v5398_v55 }
0x1822   :  { %4259 = vmatprep.subr.mxu0 %v5405_v56 }
0x1823   :  { %3301 = vrot.lane.b32.xlu1 %v5380_v50, %s4750_s23  ;;  %3299 = vrot.lane.b32.xlu0 %v5377_v48, %s4750_s23 }
0x1824   :  { %4260 = vmatpush3.msra.mxu0 %v5405_v56 }
0x1825   :  { %4261 = vmatprep.subr.mxu0 %v5412_v42 }
0x1826   :  { %4262 = vmatpush3.msra.mxu0 %v5412_v42 }
0x1827   :  { %3428 = vrot.lane.b32.xlu1 %v3418_v53, %s4743_s27  ;;  %3430 = vrot.lane.b32.xlu0 %v3419_v54, %s4743_s27 }
0x1828   :  { %4263 = vmatprep.subr.mxu0 %v5419_v43 }
0x1829   :  { %4264 = vmatpush3.msra.mxu0 %v5419_v43 }
0x182b   :  { %3424 = vrot.lane.b32.xlu1 %v3416_v38, %s4743_s27  ;;  %3426 = vrot.lane.b32.xlu0 %v3417_v40, %s4743_s27 }
0x182f   :  { %3519 = vrot.lane.b32.xlu1 %v5338_v51, %s4749_s22  ;;  %3436 = vrot.lane.b32.xlu0 %v3643_v28, %s4743_s27 }
0x1833   :  { %3521 = vrot.lane.b32.xlu0 %v5333_v45, %s4749_s22  ;;  %v1927_v45 = vunpack.c.l.s4 %v4751_v44 }
0x1835   :  { %v1928_v51 = vunpack.c.0.s8 %v1927_v45 }
0x1837   :  { %v1931_v52 = vsub.s32 %v1928_v51, %v1930_v47 }
0x18da   :  { %v4256_v58 = vpop.f32.mrf.mxu1 }
0x18db   :  { %v1921_v36 = vadd.f32 %v4256_v58, %v3643_v28 }
0x18dc   :  { %v1915_v59 = vpop.f32.mrf.mxu1 }
0x18dd   :  { %v2658_v1 = vcombine.high %v1921_v36, %v1921_v36  ;;  %v2665_v0 = vrot.slane %v1921_v36, %v1931_v52  ;;  %v1916_v2 = vadd.f32 %v3643_v28, %v1915_v59  ;;  %v2393_v36 = vld [vmem:[%s5901_s10] sm:$0xff] }
0x18de   :  { %4286 = vmatprep.subr.mxu1 %v2393_v36  ;;  %4338 = vmatprep.subr.mxu0 %v2393_v36 }
0x18df   :  { %v2672_v3 = vrot.slane %v2658_v1, %v1931_v52  ;;  %v2673_v4 = vcombine.high %v2665_v0, %v2665_v0  ;;  %v2681_v5 = vrot.slane %v2665_v0, %v1931_v52  ;;  %v1925_v29 = vcombine.high %v1916_v2, %v1916_v2  ;;  %4287 = vmatpush3.msra.mxu1 %v2393_v36 }
0x18e0   :  { %v1932_v6 = vrot.slane %v1916_v2, %v1931_v52  ;;  %4309 = vmatprep.subr.mxu1 %v5398_v55 }
0x18e1   :  { %v2674_v60 = vcombine.high %v2672_v3, %v2672_v3  ;;  %v2688_v7 = vrot.slane %v2672_v3, %v1931_v52  ;;  %v2695_v61 = vrot.slane %v2673_v4, %v1931_v52  ;;  %v2703_v11 = vcombine.high %v2681_v5, %v2681_v5 }
0x18e2   :  { %v5423_v9 = vrot.slane %v2681_v5, %v1975_v57  ;;  %v1939_v62 = vrot.slane %v1925_v29, %v1931_v52  ;;  %v1940_v63 = vcombine.high %v1932_v6, %v1932_v6  ;;  %v1948_v8 = vrot.slane %v1932_v6, %v1931_v52 }
0x18e3   :  { %v2702_v10 = vrot.slane %v2674_v60, %v1931_v52  ;;  %v5425_v12 = vrot.slane %v2695_v61, %v1975_v57  ;;  %v5427_v14 = vrot.slane %v2703_v11, %v1975_v57  ;;  %v5429_v15 = vrot.slane %v2688_v7, %v1975_v57 }
0x18e4   :  { %v1941_v17 = vcombine.high %v1939_v62, %v1939_v62  ;;  %v1962_v18 = vrot.slane %v1940_v63, %v1931_v52  ;;  %v1970_v19 = vcombine.high %v1948_v8, %v1948_v8  ;;  %v1976_v20 = vrot.slane %v1948_v8, %v1975_v57 }
0x18e5   :  { %v2704_v23 = vcombine.high %v2695_v61, %v2695_v61  ;;  %v1955_v33 = vrot.slane %v1939_v62, %v1931_v52  ;;  %v5444_v39 = vrot.slane %v2702_v10, %v1975_v57 }
0x18e6   :  { %v1969_v13 = vrot.slane %v1941_v17, %v1931_v52  ;;  %v1980_v21 = vrot.slane %v1962_v18, %v1975_v57  ;;  %v2009_v16 = vmul.f32 %v1976_v20, %v5370_v37  ;;  %v2008_v22 = vmul.f32 %v1976_v20, %v5367_v30 }
0x18e7   :  { %v1972_v24 = vcombine.high %v1962_v18, %v1962_v18  ;;  %v1984_v35 = vrot.slane %v1970_v19, %v1975_v57  ;;  %v5441_v28 = vrot.slane %v2704_v23, %v1975_v57  ;;  %v1992_v49 = vrot.slane %v1955_v33, %v1975_v57 }
0x18e8   :  { %v2657_v27 = vcombine.high %v1969_v13, %v1969_v13  ;;  %v2010_v25 = vmul.f32 %v1980_v21, %v5367_v30  ;;  %4265 = vmatprep.mubr.msk.f32.mxu0 %vm130_vm1, %v2008_v22  ;;  %v2011_v32 = vmul.f32 %v1980_v21, %v5370_v37  ;;  %v1971_v38 = vcombine.high %v1955_v33, %v1955_v33 }
0x18e9   :  { %4266 = vmatmul.mubr.msk.f32.vlgmr.msra.gmra.mxu0 %vm130_vm1, %v2009_v16  ;;  %v2012_v34 = vmul.f32 %v1984_v35, %v5367_v30  ;;  %v1988_v31 = vrot.slane %v1972_v24, %v1975_v57  ;;  %v2013_v41 = vmul.f32 %v1984_v35, %v5370_v37  ;;  %v2016_v40 = vmul.f32 %v1992_v49, %v5367_v30 }
0x18ea   :  { %4268 = vmatprep.mubr.msk.f32.mxu0 %vm130_vm1, %v2010_v25  ;;  %v5437_v26 = vrot.slane %v2657_v27, %v1975_v57  ;;  %v1996_v44 = vrot.slane %v1969_v13, %v1975_v57  ;;  %v2017_v45 = vmul.f32 %v1992_v49, %v5370_v37  ;;  %v2000_v51 = vrot.slane %v1971_v38, %v1975_v57 }
0x18eb   :  { %v2014_v53 = vmul.f32 %v1988_v31, %v5367_v30  ;;  %v2015_v54 = vmul.f32 %v1988_v31, %v5370_v37  ;;  %4339 = vmatpush3.msra.mxu0 %v2393_v36 }
0x18ec   :  { %v2018_v46 = vmul.f32 %v1996_v44, %v5367_v30  ;;  %v2019_v47 = vmul.f32 %v1996_v44, %v5370_v37  ;;  %v2020_v52 = vmul.f32 %v2000_v51, %v5367_v30  ;;  %v2021_v58 = vmul.f32 %v2000_v51, %v5370_v37 }
0x18ed   :  { %4269 = vmatmul.mubr.msk.f32.gmra.mxu0 %vm130_vm1, %v2011_v32 }
0x18ee   :  { %4271 = vmatprep.mubr.msk.f32.mxu0 %vm130_vm1, %v2012_v34 }
0x18f1   :  { %4272 = vmatmul.mubr.msk.f32.gmra.mxu0 %vm130_vm1, %v2013_v41 }
0x18f2   :  { %4274 = vmatprep.mubr.msk.f32.mxu0 %vm130_vm1, %v2014_v53 }
0x18f5   :  { %4275 = vmatmul.mubr.msk.f32.gmra.mxu0 %vm130_vm1, %v2015_v54 }
0x18f6   :  { %4277 = vmatprep.mubr.msk.f32.mxu0 %vm130_vm1, %v2016_v40 }
0x18f9   :  { %4278 = vmatmul.mubr.msk.f32.gmra.mxu0 %vm130_vm1, %v2017_v45 }
0x18fa   :  { %4280 = vmatprep.mubr.msk.f32.mxu0 %vm130_vm1, %v2018_v46 }
0x18fd   :  { %4281 = vmatmul.mubr.msk.f32.gmra.mxu0 %vm130_vm1, %v2019_v47 }
0x18fe   :  { %4283 = vmatprep.mubr.msk.f32.mxu0 %vm130_vm1, %v2020_v52 }
0x1901   :  { %4284 = vmatmul.mubr.msk.f32.gmra.mxu0 %vm130_vm1, %v2021_v58 }
0x19a9   :  { %v4267_v59 = vpop.f32.mrf.mxu0 }
0x19aa   :  { %v2205_v1 = vsel %vm2203_vm15, %v4267_v59, -inf }
0x19ab   :  { %v2134_v30 = vpop.f32.mrf.mxu0 }
0x19ac   :  { %v2204_v0 = vsel %vm2203_vm15, %v2134_v30, -inf }
0x19ad   :  { %v2206_v37 = vmax.f32 %v2204_v0, %v2205_v1  ;;  %v4270_v2 = vpop.f32.mrf.mxu0 }
0x19ae   :  { %v2214_v4 = vsel %vm2203_vm15, %v4270_v2, -inf }
0x19af   :  { %v2207_v57 = vrot.slane %v2206_v37, 4  ;;  %v2144_v3 = vpop.f32.mrf.mxu0 }
0x19b0   :  { %v2213_v5 = vsel %vm2203_vm15, %v2144_v3, -inf }
0x19b1   :  { %v2208_v29 = vmax.f32 %v2206_v37, %v2207_v57  ;;  %v2215_v6 = vmax.f32 %v2213_v5, %v2214_v4  ;;  %v5473_v60 = vpop.f32.mrf.mxu0 }
0x19b2   :  { %v2223_v62 = vsel %vm2203_vm15, %v5473_v60, -inf }
0x19b3   :  { %v2209_v7 = vrot.slane %v2208_v29, 2  ;;  %v2216_v61 = vrot.slane %v2215_v6, 4  ;;  %v2154_v11 = vpop.f32.mrf.mxu0 }
0x19b4   :  { %v2222_v63 = vsel %vm2203_vm15, %v2154_v11, -inf }
0x19b5   :  { %v2210_v8 = vmax.f32 %v2208_v29, %v2209_v7  ;;  %v2217_v10 = vmax.f32 %v2215_v6, %v2216_v61  ;;  %v2224_v17 = vmax.f32 %v2222_v63, %v2223_v62  ;;  %v5478_v18 = vpop.f32.mrf.mxu0 }
0x19b6   :  { %v2232_v16 = vsel %vm2203_vm15, %v5478_v18, -inf }
0x19b7   :  { %v2211_v19 = vrot.slane %v2210_v8, 1  ;;  %v2218_v20 = vrot.slane %v2217_v10, 2  ;;  %v2225_v13 = vrot.slane %v2224_v17, 4  ;;  %v5480_v21 = vpop.f32.mrf.mxu0 }
0x19b8   :  { %v2231_v22 = vsel %vm2203_vm15, %v5480_v21, -inf }
0x19b9   :  { %v2212_v27 = vmax.f32 %v2210_v8, %v2211_v19  ;;  %v2219_v25 = vmax.f32 %v2217_v10, %v2218_v20  ;;  %v2226_v23 = vmax.f32 %v2224_v17, %v2225_v13  ;;  %v2233_v24 = vmax.f32 %v2231_v22, %v2232_v16  ;;  %v5486_v35 = vpop.f32.mrf.mxu0 }
0x19ba   :  { %v2241_v53 = vsel %vm2203_vm15, %v5486_v35, -inf }
0x19bb   :  { %v2267_v32 = vsub.f32 %v2134_v30, %v2212_v27  ;;  %v2268_v33 = vsub.f32 %v4267_v59, %v2212_v27  ;;  %v2220_v34 = vrot.slane %v2219_v25, 1  ;;  %v2227_v31 = vrot.slane %v2226_v23, 2  ;;  %v5488_v41 = vpop.f32.mrf.mxu0 }
0x19bc   :  { %v2234_v49 = vrot.slane %v2233_v24, 4  ;;  %v2240_v54 = vsel %vm2203_vm15, %v5488_v41, -inf }
0x19bd   :  { %v2281_v38 = vmul.f32 1.442695, %v2267_v32  ;;  %v2283_v40 = vmul.f32 1.442695, %v2268_v33  ;;  %v2221_v44 = vmax.f32 %v2219_v25, %v2220_v34  ;;  %v2228_v45 = vmax.f32 %v2226_v23, %v2227_v31  ;;  %v5494_v46 = vpop.f32.mrf.mxu0 }
0x19be   :  { %v2235_v51 = vmax.f32 %v2233_v24, %v2234_v49  ;;  %v2242_v47 = vmax.f32 %v2240_v54, %v2241_v53  ;;  %v2250_v52 = vsel %vm2203_vm15, %v5494_v46, -inf }
0x19bf   :  { %4525 = vpow2.f32 %v2281_v38  ;;  %v2269_v58 = vsub.f32 %v2144_v3, %v2221_v44  ;;  %v2270_v36 = vsub.f32 %v4270_v2, %v2221_v44  ;;  %v2229_v59 = vrot.slane %v2228_v45, 1  ;;  %v5498_v30 = vpop.f32.mrf.mxu0 }
0x19c0   :  { %4527 = vpow2.f32 %v2283_v40  ;;  %v2236_v1 = vrot.slane %v2235_v51, 2  ;;  %v2243_v0 = vrot.slane %v2242_v47, 4  ;;  %v2249_v37 = vsel %vm2203_vm15, %v5498_v30, -inf }
0x19c1   :  { %v2285_v57 = vmul.f32 1.442695, %v2269_v58  ;;  %v2287_v4 = vmul.f32 1.442695, %v2270_v36  ;;  %v2230_v5 = vmax.f32 %v2228_v45, %v2229_v59  ;;  %v2251_v29 = vmax.f32 %v2249_v37, %v2250_v52  ;;  %v5502_v6 = vpop.f32.mrf.mxu0 }
0x19c2   :  { %v2237_v7 = vmax.f32 %v2235_v51, %v2236_v1  ;;  %v2244_v61 = vmax.f32 %v2242_v47, %v2243_v0  ;;  %v2259_v2 = vsel %vm2203_vm15, %v5502_v6, -inf }
0x19c3   :  { %4529 = vpow2.f32 %v2285_v57  ;;  %v2271_v3 = vsub.f32 %v2154_v11, %v2230_v5  ;;  %v2272_v62 = vsub.f32 %v5473_v60, %v2230_v5  ;;  %v2252_v63 = vrot.slane %v2251_v29, 4  ;;  %v5507_v8 = vpop.f32.mrf.mxu0 }
0x19c4   :  { %4531 = vpow2.f32 %v2287_v4  ;;  %v2238_v10 = vrot.slane %v2237_v7, 1  ;;  %v2245_v17 = vrot.slane %v2244_v61, 2  ;;  %v2258_v19 = vsel %vm2203_vm15, %v5507_v8, -inf }
0x19c5   :  { %v2289_v20 = vmul.f32 1.442695, %v2271_v3  ;;  %v2291_v13 = vmul.f32 1.442695, %v2272_v62  ;;  %v2253_v16 = vmax.f32 %v2251_v29, %v2252_v63  ;;  %v2260_v22 = vmax.f32 %v2258_v19, %v2259_v2 }
0x19c6   :  { %v2239_v27 = vmax.f32 %v2237_v7, %v2238_v10  ;;  %v2246_v25 = vmax.f32 %v2244_v61, %v2245_v17 }
0x19c7   :  { %4533 = vpow2.f32 %v2289_v20  ;;  %v2254_v23 = vrot.slane %v2253_v16, 2  ;;  %v2261_v11 = vrot.slane %v2260_v22, 4 }
0x19c8   :  { %4535 = vpow2.f32 %v2291_v13  ;;  %v2273_v60 = vsub.f32 %v5480_v21, %v2239_v27  ;;  %v2274_v24 = vsub.f32 %v5478_v18, %v2239_v27  ;;  %v2247_v32 = vrot.slane %v2246_v25, 1 }
0x19c9   :  { %v2255_v33 = vmax.f32 %v2253_v16, %v2254_v23  ;;  %v2262_v34 = vmax.f32 %v2260_v22, %v2261_v11 }
0x19ca   :  { %v2293_v31 = vmul.f32 1.442695, %v2273_v60  ;;  %v2295_v49 = vmul.f32 1.442695, %v2274_v24  ;;  %v2248_v53 = vmax.f32 %v2246_v25, %v2247_v32 }
0x19cb   :  { %v2256_v54 = vrot.slane %v2255_v33, 1  ;;  %v2263_v38 = vrot.slane %v2262_v34, 2 }
0x19cc   :  { %v5513_v40 = vpop.eup %4525  ;;  %4537 = vpow2.f32 %v2293_v31  ;;  %v2275_v44 = vsub.f32 %v5488_v41, %v2248_v53  ;;  %v2276_v45 = vsub.f32 %v5486_v35, %v2248_v53 }
0x19cd   :  { %v5517_v51 = vpop.eup %4527  ;;  %v2309_v18 = vsel %vm2203_vm15, %v5513_v40, 0.0  ;;  %4539 = vpow2.f32 %v2295_v49  ;;  %v2257_v21 = vmax.f32 %v2255_v33, %v2256_v54  ;;  %v2264_v47 = vmax.f32 %v2262_v34, %v2263_v38 }
0x19ce   :  { %v2310_v52 = vsel %vm2203_vm15, %v5517_v51, 0.0  ;;  %v2297_v58 = vmul.f32 1.442695, %v2275_v44  ;;  %v2299_v36 = vmul.f32 1.442695, %v2276_v45 }
0x19cf   :  { %v2311_v59 = vadd.f32 %v2310_v52, %v2309_v18  ;;  %v2277_v1 = vsub.f32 %v5498_v30, %v2257_v21  ;;  %v2278_v41 = vsub.f32 %v5494_v46, %v2257_v21  ;;  %v2265_v0 = vrot.slane %v2264_v47, 1 }
0x19d0   :  { %v5525_v35 = vpop.eup %4529  ;;  %4541 = vpow2.f32 %v2297_v58 }
0x19d1   :  { %v5527_v37 = vpop.eup %4531  ;;  %v2312_v57 = vrot.slane %v2311_v59, 4  ;;  %v2318_v4 = vsel %vm2203_vm15, %v5525_v35, 0.0  ;;  %4543 = vpow2.f32 %v2299_v36  ;;  %v2301_v5 = vmul.f32 1.442695, %v2277_v1 }
0x19d2   :  { %v2319_v29 = vsel %vm2203_vm15, %v5527_v37, 0.0  ;;  %v2303_v7 = vmul.f32 1.442695, %v2278_v41  ;;  %v2266_v61 = vmax.f32 %v2264_v47, %v2265_v0 }
0x19d3   :  { %v2313_v30 = vadd.f32 %v2312_v57, %v2311_v59  ;;  %v2320_v2 = vadd.f32 %v2319_v29, %v2318_v4  ;;  %4545 = vpow2.f32 %v2301_v5 }
0x19d4   :  { %v5533_v46 = vpop.eup %4533  ;;  %4547 = vpow2.f32 %v2303_v7  ;;  %v2279_v3 = vsub.f32 %v5507_v8, %v2266_v61  ;;  %v2280_v62 = vsub.f32 %v5502_v6, %v2266_v61 }
0x19d5   :  { %v5537_v63 = vpop.eup %4535  ;;  %v2314_v10 = vrot.slane %v2313_v30, 2  ;;  %v2321_v17 = vrot.slane %v2320_v2, 4  ;;  %v2327_v19 = vsel %vm2203_vm15, %v5533_v46, 0.0 }
0x19d6   :  { %v2328_v20 = vsel %vm2203_vm15, %v5537_v63, 0.0  ;;  %v2305_v13 = vmul.f32 1.442695, %v2279_v3  ;;  %v2307_v16 = vmul.f32 1.442695, %v2280_v62 }
0x19d7   :  { %v2315_v22 = vadd.f32 %v2314_v10, %v2313_v30  ;;  %v2322_v27 = vadd.f32 %v2321_v17, %v2320_v2  ;;  %v2329_v25 = vadd.f32 %v2328_v20, %v2327_v19 }
0x19d8   :  { %4549 = vpow2.f32 %v2305_v13 }
0x19d9   :  { %v5543_v23 = vpop.eup %4537  ;;  %v2316_v8 = vrot.slane %v2315_v22, 1  ;;  %v2323_v6 = vrot.slane %v2322_v27, 2  ;;  %v2330_v11 = vrot.slane %v2329_v25, 4  ;;  %4551 = vpow2.f32 %v2307_v16 }
0x19da   :  { %v5545_v60 = vpop.eup %4539  ;;  %v2336_v24 = vsel %vm2203_vm15, %v5543_v23, 0.0 }
0x19db   :  { %v2324_v32 = vadd.f32 %v2323_v6, %v2322_v27  ;;  %v2331_v33 = vadd.f32 %v2330_v11, %v2329_v25  ;;  %v2337_v34 = vsel %vm2203_vm15, %v5545_v60, 0.0  ;;  %v2317_v31 = vadd.f32 %v2316_v8, %v2315_v22  ;;  %v5575_v25 = vpop.permute.xlu0 %2573 }
0x19dc   :  { %v2338_v49 = vadd.f32 %v2337_v34, %v2336_v24 }
0x19dd   :  { %v5551_v53 = vpop.eup %4541  ;;  %v2325_v54 = vrot.slane %v2324_v32, 1  ;;  %v2332_v38 = vrot.slane %v2331_v33, 2  ;;  %4553 = vrcp.f32 %v2317_v31 }
0x19de   :  { %v5553_v44 = vpop.eup %4543  ;;  %v2339_v45 = vrot.slane %v2338_v49, 4  ;;  %v2345_v18 = vsel %vm2203_vm15, %v5551_v53, 0.0 }
0x19df   :  { %v2333_v21 = vadd.f32 %v2332_v38, %v2331_v33  ;;  %v2346_v47 = vsel %vm2203_vm15, %v5553_v44, 0.0  ;;  %v2326_v52 = vadd.f32 %v2325_v54, %v2324_v32 }
0x19e0   :  { %v5559_v58 = vpop.eup %4545  ;;  %v2340_v36 = vadd.f32 %v2339_v45, %v2338_v49  ;;  %v2347_v59 = vadd.f32 %v2346_v47, %v2345_v18  ;;  %v5581_v18 = vpop.permute.xlu0 %3299 }
0x19e1   :  { %v5561_v1 = vpop.eup %4547  ;;  %v2334_v41 = vrot.slane %v2333_v21, 1  ;;  %v2354_v0 = vsel %vm2203_vm15, %v5559_v58, 0.0  ;;  %4555 = vrcp.f32 %v2326_v52 }
0x19e2   :  { %v2341_v57 = vrot.slane %v2340_v36, 2  ;;  %v2348_v4 = vrot.slane %v2347_v59, 4  ;;  %v2355_v5 = vsel %vm2203_vm15, %v5561_v1, 0.0 }
0x19e3   :  { %v2356_v29 = vadd.f32 %v2355_v5, %v2354_v0  ;;  %v2335_v7 = vadd.f32 %v2334_v41, %v2333_v21 }
0x19e4   :  { %v2342_v61 = vadd.f32 %v2341_v57, %v2340_v36  ;;  %v2349_v30 = vadd.f32 %v2348_v4, %v2347_v59  ;;  %v3431_v59 = vpop.permute.xlu0 %3430 }
0x19e5   :  { %v5567_v2 = vpop.eup %4549  ;;  %v2357_v3 = vrot.slane %v2356_v29, 4  ;;  %4557 = vrcp.f32 %v2335_v7  ;;  %v2742_v7 = vmul.f32 %v5423_v9, %v5377_v48 }
0x19e6   :  { %v5569_v62 = vpop.eup %4551  ;;  %v2343_v10 = vrot.slane %v2342_v61, 1  ;;  %v2350_v17 = vrot.slane %v2349_v30, 2  ;;  %v2363_v19 = vsel %vm2203_vm15, %v5567_v2, 0.0 }
0x19e7   :  { %v2358_v20 = vadd.f32 %v2357_v3, %v2356_v29  ;;  %v2364_v13 = vsel %vm2203_vm15, %v5569_v62, 0.0  ;;  %v2740_v29 = vmul.f32 %v5437_v26, %v5377_v48  ;;  %v2745_v3 = vmul.f32 %v5425_v12, %v5380_v50 }
0x19e8   :  { %v2351_v16 = vadd.f32 %v2350_v17, %v2349_v30  ;;  %v2365_v22 = vadd.f32 %v2364_v13, %v2363_v19  ;;  %v2344_v27 = vadd.f32 %v2343_v10, %v2342_v61  ;;  %v2743_v61 = vmul.f32 %v5423_v9, %v5380_v50  ;;  %v3427_v30 = vpop.permute.xlu0 %3426 }
0x19e9   :  { %v2359_v8 = vrot.slane %v2358_v20, 2  ;;  %v2746_v9 = vmul.f32 %v5427_v14, %v5377_v48  ;;  %v2748_v10 = vmul.f32 %v5441_v28, %v5377_v48  ;;  %v2750_v17 = vmul.f32 %v5429_v15, %v5377_v48 }
0x19ea   :  { %v4554_v6 = vpop.eup %4553  ;;  %v2352_v11 = vrot.slane %v2351_v16, 1  ;;  %v2366_v24 = vrot.slane %v2365_v22, 4  ;;  %4559 = vrcp.f32 %v2344_v27  ;;  %v2752_v19 = vmul.f32 %v5444_v39, %v5377_v48 }
0x19eb   :  { %v2360_v32 = vadd.f32 %v2359_v8, %v2358_v20  ;;  %v2373_v33 = vmul.f32 %v4554_v6, %v5513_v40  ;;  %v2374_v34 = vmul.f32 %v4554_v6, %v5517_v51 }
0x19ec   :  { %v2367_v31 = vadd.f32 %v2366_v24, %v2365_v22  ;;  %v2353_v49 = vadd.f32 %v2352_v11, %v2351_v16 }
0x19ed   :  { %v2361_v54 = vrot.slane %v2360_v32, 1  ;;  %4288 = vmatprep.mubr.msk.f32.mxu1 %vm2203_vm15, %v2373_v33 }
0x19ee   :  { %v4556_v38 = vpop.eup %4555  ;;  %v2368_v45 = vrot.slane %v2367_v31, 2  ;;  %4289 = vmatmul.mubr.msk.f32.vlgmr.msra.gmra.mxu1 %vm2203_vm15, %v2374_v34  ;;  %4561 = vrcp.f32 %v2353_v49 }
0x19ef   :  { %4310 = vmatpush3.msra.mxu1 %v5398_v55  ;;  %v2376_v21 = vmul.f32 %v4556_v38, %v5525_v35  ;;  %v2377_v40 = vmul.f32 %v4556_v38, %v5527_v37  ;;  %v2362_v47 = vadd.f32 %v2361_v54, %v2360_v32 }
0x19f0   :  { %v2369_v51 = vadd.f32 %v2368_v45, %v2367_v31  ;;  %4311 = vmatprep.subr.mxu1 %v5405_v56 }
0x19f1   :  { %4291 = vmatprep.mubr.msk.f32.mxu1 %vm2203_vm15, %v2376_v21  ;;  %4312 = vmatpush3.msra.mxu1 %v5405_v56  ;;  %4563 = vrcp.f32 %v2362_v47 }
0x19f2   :  { %v4558_v52 = vpop.eup %4557  ;;  %v2370_v36 = vrot.slane %v2369_v51, 1  ;;  %4292 = vmatmul.mubr.msk.f32.gmra.mxu1 %vm2203_vm15, %v2377_v40  ;;  %4313 = vmatprep.subr.mxu1 %v5412_v42 }
0x19f3   :  { %v2379_v55 = vmul.f32 %v4558_v52, %v5533_v46  ;;  %v2380_v35 = vmul.f32 %v4558_v52, %v5537_v63  ;;  %4314 = vmatpush3.msra.mxu1 %v5412_v42 }
0x19f4   :  { %4315 = vmatprep.subr.mxu1 %v5419_v43  ;;  %v2371_v37 = vadd.f32 %v2370_v36, %v2369_v51 }
0x19f5   :  { %4294 = vmatprep.mubr.msk.f32.mxu1 %vm2203_vm15, %v2379_v55  ;;  %4316 = vmatpush3.msra.mxu1 %v5419_v43  ;;  %v5604_v43 = vpop.permute.xlu1 %2575 }
0x19f6   :  { %4295 = vmatmul.mubr.msk.f32.gmra.mxu1 %vm2203_vm15, %v2380_v35  ;;  %4565 = vrcp.f32 %v2371_v37  ;;  %4361 = vmatprep.subr.mxu1 %v3431_v59 }
0x19f7   :  { %v4560_v56 = vpop.eup %4559 }
0x19f8   :  { %v2382_v41 = vmul.f32 %v4560_v56, %v5543_v23  ;;  %v2383_v46 = vmul.f32 %v4560_v56, %v5545_v60 }
0x19f9   :  { %v5612_v5 = vpop.permute.xlu1 %3301 }
0x19fa   :  { %4297 = vmatprep.mubr.msk.f32.mxu1 %vm2203_vm15, %v2382_v41 }
0x19fb   :  { %v4562_v42 = vpop.eup %4561  ;;  %4298 = vmatmul.mubr.msk.f32.gmra.mxu1 %vm2203_vm15, %v2383_v46 }
0x19fc   :  { %v2385_v63 = vmul.f32 %v4562_v42, %v5551_v53  ;;  %v2386_v0 = vmul.f32 %v4562_v42, %v5553_v44 }
0x19fe   :  { %v4564_v57 = vpop.eup %4563  ;;  %4300 = vmatprep.mubr.msk.f32.mxu1 %vm2203_vm15, %v2385_v63 }
0x19ff   :  { %4301 = vmatmul.mubr.msk.f32.gmra.mxu1 %vm2203_vm15, %v2386_v0  ;;  %v2388_v23 = vmul.f32 %v4564_v57, %v5559_v58  ;;  %v2389_v60 = vmul.f32 %v4564_v57, %v5561_v1  ;;  %v2741_v58 = vmul.f32 %v5437_v26, %v5380_v50  ;;  %v3429_v1 = vpop.permute.xlu1 %3428 }
0x1a01   :  { %4303 = vmatprep.mubr.msk.f32.mxu1 %vm2203_vm15, %v2388_v23 }
0x1a03   :  { %v4566_v4 = vpop.eup %4565  ;;  %4304 = vmatmul.mubr.msk.f32.gmra.mxu1 %vm2203_vm15, %v2389_v60  ;;  %v3425_v26 = vpop.permute.xlu1 %3424 }
0x1a04   :  { %v2391_v53 = vmul.f32 %v4566_v4, %v5567_v2  ;;  %v2392_v44 = vmul.f32 %v4566_v4, %v5569_v62  ;;  %v2744_v2 = vmul.f32 %v5425_v12, %v5377_v48  ;;  %v2747_v62 = vmul.f32 %v5427_v14, %v5380_v50 }
0x1a05   :  { %v2749_v12 = vmul.f32 %v5441_v28, %v5380_v50  ;;  %v2751_v14 = vmul.f32 %v5429_v15, %v5380_v50  ;;  %v2753_v28 = vmul.f32 %v5444_v39, %v5380_v50 }
0x1a06   :  { %4306 = vmatprep.mubr.msk.f32.mxu1 %vm2203_vm15, %v2391_v53 }
0x1a07   :  { %4307 = vmatmul.mubr.msk.f32.gmra.mxu1 %vm2203_vm15, %v2392_v44 }
0x1a08   :  { %4317 = vmatprep.mubr.msk.f32.mxu1 %vm130_vm1, %v2740_v29 }
0x1a0b   :  { %4318 = vmatmul.mubr.msk.f32.vlgmr.msra.gmra.mxu1 %vm130_vm1, %v2741_v58 }
0x1a0c   :  { %4320 = vmatprep.mubr.msk.f32.mxu1 %vm130_vm1, %v2742_v7  ;;  %4362 = vmatpush3.msra.mxu1 %v3431_v59 }
0x1a0d   :  { %4363 = vmatprep.subr.mxu1 %v3429_v1 }
0x1a0e   :  { %4364 = vmatpush3.msra.mxu1 %v3429_v1 }
0x1a0f   :  { %4321 = vmatmul.mubr.msk.f32.gmra.mxu1 %vm130_vm1, %v2743_v61  ;;  %4365 = vmatprep.subr.mxu1 %v3427_v30 }
0x1a10   :  { %4323 = vmatprep.mubr.msk.f32.mxu1 %vm130_vm1, %v2744_v2  ;;  %4366 = vmatpush3.msra.mxu1 %v3427_v30 }
0x1a11   :  { %4367 = vmatprep.subr.mxu1 %v3425_v26 }
0x1a12   :  { %4368 = vmatpush3.msra.mxu1 %v3425_v26 }
0x1a13   :  { %4324 = vmatmul.mubr.msk.f32.gmra.mxu1 %vm130_vm1, %v2745_v3 }
0x1a14   :  { %4326 = vmatprep.mubr.msk.f32.mxu1 %vm130_vm1, %v2746_v9 }
0x1a17   :  { %4327 = vmatmul.mubr.msk.f32.gmra.mxu1 %vm130_vm1, %v2747_v62 }
0x1a18   :  { %4329 = vmatprep.mubr.msk.f32.mxu1 %vm130_vm1, %v2748_v10 }
0x1a1b   :  { %4330 = vmatmul.mubr.msk.f32.gmra.mxu1 %vm130_vm1, %v2749_v12 }
0x1a1c   :  { %4332 = vmatprep.mubr.msk.f32.mxu1 %vm130_vm1, %v2750_v17 }
0x1a1f   :  { %4333 = vmatmul.mubr.msk.f32.gmra.mxu1 %vm130_vm1, %v2751_v14 }
0x1a20   :  { %4335 = vmatprep.mubr.msk.f32.mxu1 %vm130_vm1, %v2752_v19 }
0x1a23   :  { %4336 = vmatmul.mubr.msk.f32.gmra.mxu1 %vm130_vm1, %v2753_v28 }
0x1aae   :  { %v4290_v20 = vpop.f32.mrf.mxu1 }
0x1aaf   :  { %v2580_v13 = vmul.f32 %v4290_v20, %v5604_v43 }
0x1ab0   :  { %v2502_v16 = vpop.f32.mrf.mxu1 }
0x1ab1   :  { %v2579_v22 = vmul.f32 %v5575_v25, %v2502_v16  ;;  %v2594_v15 = vsel %vm130_vm1, %v2580_v13, 0.0 }
0x1ab2   :  { %v4293_v27 = vpop.f32.mrf.mxu1 }
0x1ab3   :  { %v2593_v48 = vsel %vm130_vm1, %v2579_v22, 0.0  ;;  %v2582_v8 = vmul.f32 %v4293_v27, %v5604_v43 }
0x1ab4   :  { %v2595_v6 = vadd.f32 %v2594_v15, %v2593_v48  ;;  %v2512_v11 = vpop.f32.mrf.mxu1 }
0x1ab5   :  { %v2581_v24 = vmul.f32 %v5575_v25, %v2512_v11  ;;  %v2603_v32 = vsel %vm130_vm1, %v2582_v8, 0.0 }
0x1ab6   :  { %v2596_v50 = vrot.slane %v2595_v6, 4  ;;  %v4296_v39 = vpop.f32.mrf.mxu1 }
0x1ab7   :  { %v2602_v33 = vsel %vm130_vm1, %v2581_v24, 0.0  ;;  %v2584_v34 = vmul.f32 %v4296_v39, %v5604_v43 }
0x1ab8   :  { %v2597_v31 = vadd.f32 %v2596_v50, %v2595_v6  ;;  %v2604_v49 = vadd.f32 %v2603_v32, %v2602_v33  ;;  %v2522_v54 = vpop.f32.mrf.mxu1 }
0x1ab9   :  { %v2583_v38 = vmul.f32 %v5575_v25, %v2522_v54  ;;  %v2612_v40 = vsel %vm130_vm1, %v2584_v34, 0.0 }
0x1aba   :  { %v2598_v45 = vrot.slane %v2597_v31, 2  ;;  %v2605_v21 = vrot.slane %v2604_v49, 4 }
0x1abb   :  { %v2611_v47 = vsel %vm130_vm1, %v2583_v38, 0.0  ;;  %v4299_v51 = vpop.f32.mrf.mxu1 }
0x1abc   :  { %v2599_v52 = vadd.f32 %v2598_v45, %v2597_v31  ;;  %v2606_v36 = vadd.f32 %v2605_v21, %v2604_v49  ;;  %v2613_v55 = vadd.f32 %v2612_v40, %v2611_v47  ;;  %v2586_v35 = vmul.f32 %v4299_v51, %v5604_v43 }
0x1abd   :  { %v2532_v37 = vpop.f32.mrf.mxu1 }
0x1abe   :  { %v2607_v59 = vrot.slane %v2606_v36, 2  ;;  %v2614_v56 = vrot.slane %v2613_v55, 4  ;;  %v2585_v41 = vmul.f32 %v5575_v25, %v2532_v37  ;;  %v2600_v42 = vrot.slane %v2599_v52, 1 }
0x1abf   :  { %v4302_v46 = vpop.f32.mrf.mxu1  ;;  %v2621_v57 = vsel %vm130_vm1, %v2586_v35, 0.0 }
0x1ac0   :  { %v2608_v63 = vadd.f32 %v2607_v59, %v2606_v36  ;;  %v2615_v0 = vadd.f32 %v2614_v56, %v2613_v55  ;;  %v2620_v23 = vsel %vm130_vm1, %v2585_v41, 0.0  ;;  %v2588_v60 = vmul.f32 %v4302_v46, %v5604_v43 }
0x1ac1   :  { %v2542_v4 = vpop.f32.mrf.mxu1  ;;  %v2622_v29 = vadd.f32 %v2621_v57, %v2620_v23  ;;  %v2601_v7 = vadd.f32 %v2600_v42, %v2599_v52 }
0x1ac2   :  { %v2609_v53 = vrot.slane %v2608_v63, 1  ;;  %v2616_v44 = vrot.slane %v2615_v0, 2  ;;  %v2587_v58 = vmul.f32 %v5575_v25, %v2542_v4  ;;  %v2630_v26 = vsel %vm130_vm1, %v2588_v60, 0.0 }
0x1ac3   :  { %v4305_v1 = vpop.f32.mrf.mxu1  ;;  %v2623_v2 = vrot.slane %v2622_v29, 4 }
0x1ac4   :  { %v2610_v61 = vadd.f32 %v2609_v53, %v2608_v63  ;;  %v2617_v30 = vadd.f32 %v2616_v44, %v2615_v0  ;;  %v2629_v3 = vsel %vm130_vm1, %v2587_v58, 0.0  ;;  %v2590_v9 = vmul.f32 %v4305_v1, %v5604_v43 }
0x1ac5   :  { %v2552_v62 = vpop.f32.mrf.mxu1  ;;  %v2624_v17 = vadd.f32 %v2623_v2, %v2622_v29  ;;  %v2631_v14 = vadd.f32 %v2630_v26, %v2629_v3 }
0x1ac6   :  { %v3390_v10 = vsel %vm3389_vm0, %v2610_v61, %v2601_v7  ;;  %v2618_v12 = vrot.slane %v2617_v30, 1  ;;  %v2589_v19 = vmul.f32 %v5575_v25, %v2552_v62  ;;  %v2639_v22 = vsel %vm130_vm1, %v2590_v9, 0.0 }
0x1ac7   :  { %v4308_v28 = vpop.f32.mrf.mxu1  ;;  %v2625_v13 = vrot.slane %v2624_v17, 2  ;;  %v2632_v16 = vrot.slane %v2631_v14, 4 }
0x1ac8   :  { %v2619_v20 = vadd.f32 %v2618_v12, %v2617_v30  ;;  %v2638_v27 = vsel %vm130_vm1, %v2589_v19, 0.0  ;;  %v2592_v15 = vmul.f32 %v4308_v28, %v5604_v43 }
0x1ac9   :  { %v2562_v48 = vpop.f32.mrf.mxu1  ;;  %v2626_v6 = vadd.f32 %v2625_v13, %v2624_v17  ;;  %v2633_v11 = vadd.f32 %v2632_v16, %v2631_v14  ;;  %v2640_v24 = vadd.f32 %v2639_v22, %v2638_v27 }
0x1aca   :  { %v3392_v8 = vsel %vm3391_vm3, %v2619_v20, %v3390_v10  ;;  %v2591_v50 = vmul.f32 %v5575_v25, %v2562_v48  ;;  %v2648_v31 = vsel %vm130_vm1, %v2592_v15, 0.0 }
0x1acb   :  { %v5688_v39 = vpop.f32.mrf.mxu1  ;;  %v2627_v32 = vrot.slane %v2626_v6, 1  ;;  %v2634_v33 = vrot.slane %v2633_v11, 2  ;;  %v2641_v34 = vrot.slane %v2640_v24, 4 }
0x1acc   :  { %v2647_v49 = vsel %vm130_vm1, %v2591_v50, 0.0  ;;  %v2932_v40 = vsel %vm2203_vm15, %v5688_v39, -inf }
0x1acd   :  { %v5692_v54 = vpop.f32.mrf.mxu1  ;;  %v2628_v43 = vadd.f32 %v2627_v32, %v2626_v6  ;;  %v2635_v38 = vadd.f32 %v2634_v33, %v2633_v11  ;;  %v2642_v45 = vadd.f32 %v2641_v34, %v2640_v24  ;;  %v2649_v21 = vadd.f32 %v2648_v31, %v2647_v49 }
0x1ace   :  { %v2931_v25 = vsel %vm2203_vm15, %v5692_v54, -inf }
0x1acf   :  { %v5698_v47 = vpop.f32.mrf.mxu1  ;;  %v2636_v51 = vrot.slane %v2635_v38, 1  ;;  %v2643_v52 = vrot.slane %v2642_v45, 2  ;;  %v2650_v36 = vrot.slane %v2649_v21, 4  ;;  %v2933_v55 = vmax.f32 %v2931_v25, %v2932_v40 }
0x1ad0   :  { %v3394_v37 = vsel %vm3393_vm4, %v2628_v43, %v3392_v8  ;;  %v2941_v42 = vsel %vm2203_vm15, %v5698_v47, -inf }
0x1ad1   :  { %v5700_v35 = vpop.f32.mrf.mxu1  ;;  %v2637_v59 = vadd.f32 %v2636_v51, %v2635_v38  ;;  %v2644_v56 = vadd.f32 %v2643_v52, %v2642_v45  ;;  %v2651_v41 = vadd.f32 %v2650_v36, %v2649_v21  ;;  %v2934_v46 = vrot.slane %v2933_v55, 4 }
0x1ad2   :  { %v2940_v63 = vsel %vm2203_vm15, %v5700_v35, -inf }
0x1ad3   :  { %v5707_v0 = vpop.f32.mrf.mxu1  ;;  %v2645_v57 = vrot.slane %v2644_v56, 1  ;;  %v2652_v23 = vrot.slane %v2651_v41, 2  ;;  %v2935_v60 = vmax.f32 %v2933_v55, %v2934_v46  ;;  %v2942_v4 = vmax.f32 %v2940_v63, %v2941_v42 }
0x1ad4   :  { %v3396_v44 = vsel %vm3395_vm5, %v2637_v59, %v3394_v37  ;;  %v2950_v61 = vsel %vm2203_vm15, %v5707_v0, -inf }
0x1ad5   :  { %v5709_v53 = vpop.f32.mrf.mxu1  ;;  %v2646_v29 = vadd.f32 %v2645_v57, %v2644_v56  ;;  %v2653_v58 = vadd.f32 %v2652_v23, %v2651_v41  ;;  %v2936_v1 = vrot.slane %v2935_v60, 2  ;;  %v2943_v7 = vrot.slane %v2942_v4, 4 }
0x1ad6   :  { %v2949_v30 = vsel %vm2203_vm15, %v5709_v53, -inf }
0x1ad7   :  { %v5716_v2 = vpop.f32.mrf.mxu1  ;;  %v2654_v26 = vrot.slane %v2653_v58, 1  ;;  %v2937_v3 = vmax.f32 %v2935_v60, %v2936_v1  ;;  %v2944_v9 = vmax.f32 %v2942_v4, %v2943_v7  ;;  %v2951_v62 = vmax.f32 %v2949_v30, %v2950_v61 }
0x1ad8   :  { %v3398_v12 = vsel %vm3397_vm6, %v2646_v29, %v3396_v44  ;;  %v2959_v20 = vsel %vm2203_vm15, %v5716_v2, -inf }
0x1ad9   :  { %v5718_v10 = vpop.f32.mrf.mxu1  ;;  %v2655_v17 = vadd.f32 %v2654_v26, %v2653_v58  ;;  %v2938_v14 = vrot.slane %v2937_v3, 1  ;;  %v2945_v19 = vrot.slane %v2944_v9, 2  ;;  %v2952_v28 = vrot.slane %v2951_v62, 4 }
0x1ada   :  { %v2958_v13 = vsel %vm2203_vm15, %v5718_v10, -inf }
0x1adb   :  { %v5725_v16 = vpop.f32.mrf.mxu1  ;;  %v2939_v22 = vmax.f32 %v2937_v3, %v2938_v14  ;;  %v2946_v27 = vmax.f32 %v2944_v9, %v2945_v19  ;;  %v2953_v15 = vmax.f32 %v2951_v62, %v2952_v28  ;;  %v2960_v48 = vmax.f32 %v2958_v13, %v2959_v20 }
0x1adc   :  { %v5729_v6 = vsel %vm3399_vm7, %v2655_v17, %v3398_v12  ;;  %v2968_v34 = vsel %vm2203_vm15, %v5725_v16, -inf }
0x1add   :  { %v5727_v8 = vpop.f32.mrf.mxu1  ;;  %v2994_v11 = vsub.f32 %v5692_v54, %v2939_v22  ;;  %v2995_v24 = vsub.f32 %v5688_v39, %v2939_v22  ;;  %v2947_v50 = vrot.slane %v2946_v27, 1  ;;  %v2954_v32 = vrot.slane %v2953_v15, 2 }
0x1ade   :  { %v2961_v33 = vrot.slane %v2960_v48, 4  ;;  %v2967_v31 = vsel %vm2203_vm15, %v5727_v8, -inf }
0x1adf   :  { %v5737_v49 = vpop.f32.mrf.mxu1  ;;  %v3008_v43 = vmul.f32 1.442695, %v2994_v11  ;;  %v3010_v38 = vmul.f32 1.442695, %v2995_v24  ;;  %v2948_v45 = vmax.f32 %v2946_v27, %v2947_v50  ;;  %v2955_v21 = vmax.f32 %v2953_v15, %v2954_v32 }
0x1ae0   :  { %v2962_v40 = vmax.f32 %v2960_v48, %v2961_v33  ;;  %v2969_v25 = vmax.f32 %v2967_v31, %v2968_v34  ;;  %v2977_v39 = vsel %vm2203_vm15, %v5737_v49, -inf }
0x1ae1   :  { %v5741_v54 = vpop.f32.mrf.mxu1  ;;  %4567 = vpow2.f32 %v3008_v43  ;;  %v2996_v51 = vsub.f32 %v5700_v35, %v2948_v45  ;;  %v2997_v52 = vsub.f32 %v5698_v47, %v2948_v45  ;;  %v2956_v36 = vrot.slane %v2955_v21, 1 }
0x1ae2   :  { %4569 = vpow2.f32 %v3010_v38  ;;  %v2963_v55 = vrot.slane %v2962_v40, 2  ;;  %v2970_v37 = vrot.slane %v2969_v25, 4  ;;  %v2976_v59 = vsel %vm2203_vm15, %v5741_v54, -inf }
0x1ae3   :  { %v5747_v56 = vpop.f32.mrf.mxu1  ;;  %v3012_v41 = vmul.f32 1.442695, %v2996_v51  ;;  %v3014_v46 = vmul.f32 1.442695, %v2997_v52  ;;  %v2957_v42 = vmax.f32 %v2955_v21, %v2956_v36  ;;  %v2978_v63 = vmax.f32 %v2976_v59, %v2977_v39 }
0x1ae4   :  { %v2964_v57 = vmax.f32 %v2962_v40, %v2963_v55  ;;  %v2971_v23 = vmax.f32 %v2969_v25, %v2970_v37  ;;  %v2986_v35 = vsel %vm2203_vm15, %v5747_v56, -inf }
0x1ae5   :  { %v5751_v60 = vpop.f32.mrf.mxu1  ;;  %4571 = vpow2.f32 %v3012_v41  ;;  %v2998_v47 = vsub.f32 %v5709_v53, %v2957_v42  ;;  %v2999_v4 = vsub.f32 %v5707_v0, %v2957_v42  ;;  %v2979_v44 = vrot.slane %v2978_v63, 4 }
0x1ae6   :  { %4573 = vpow2.f32 %v3014_v46  ;;  %v2965_v29 = vrot.slane %v2964_v57, 1  ;;  %v2972_v58 = vrot.slane %v2971_v23, 2  ;;  %v2985_v1 = vsel %vm2203_vm15, %v5751_v60, -inf }
0x1ae7   :  { %v3016_v7 = vmul.f32 1.442695, %v2998_v47  ;;  %v3018_v61 = vmul.f32 1.442695, %v2999_v4  ;;  %v2980_v30 = vmax.f32 %v2978_v63, %v2979_v44  ;;  %v2987_v26 = vmax.f32 %v2985_v1, %v2986_v35 }
0x1ae8   :  { %v2966_v3 = vmax.f32 %v2964_v57, %v2965_v29  ;;  %v2973_v9 = vmax.f32 %v2971_v23, %v2972_v58 }
0x1ae9   :  { %4575 = vpow2.f32 %v3016_v7  ;;  %v2981_v62 = vrot.slane %v2980_v30, 2  ;;  %v2988_v12 = vrot.slane %v2987_v26, 4 }
0x1aea   :  { %4577 = vpow2.f32 %v3018_v61  ;;  %v3000_v53 = vsub.f32 %v5718_v10, %v2966_v3  ;;  %v3001_v0 = vsub.f32 %v5716_v2, %v2966_v3  ;;  %v2974_v17 = vrot.slane %v2973_v9, 1 }
0x1aeb   :  { %v2982_v14 = vmax.f32 %v2980_v30, %v2981_v62  ;;  %v2989_v19 = vmax.f32 %v2987_v26, %v2988_v12 }
0x1aec   :  { %v3020_v28 = vmul.f32 1.442695, %v3000_v53  ;;  %v3022_v20 = vmul.f32 1.442695, %v3001_v0  ;;  %v2975_v13 = vmax.f32 %v2973_v9, %v2974_v17 }
0x1aed   :  { %v2983_v22 = vrot.slane %v2982_v14, 1  ;;  %v2990_v27 = vrot.slane %v2989_v19, 2 }
0x1aee   :  { %v5759_v15 = vpop.eup %4567  ;;  %4579 = vpow2.f32 %v3020_v28  ;;  %v3002_v48 = vsub.f32 %v5727_v8, %v2975_v13  ;;  %v3003_v11 = vsub.f32 %v5725_v16, %v2975_v13 }
0x1aef   :  { %v5763_v24 = vpop.eup %4569  ;;  %v3036_v2 = vsel %vm2203_vm15, %v5759_v15, 0.0  ;;  %4581 = vpow2.f32 %v3022_v20  ;;  %v2984_v10 = vmax.f32 %v2982_v14, %v2983_v22  ;;  %v2991_v50 = vmax.f32 %v2989_v19, %v2990_v27 }
0x1af0   :  { %v3037_v32 = vsel %vm2203_vm15, %v5763_v24, 0.0  ;;  %v3024_v33 = vmul.f32 1.442695, %v3002_v48  ;;  %v3026_v34 = vmul.f32 1.442695, %v3003_v11 }
0x1af1   :  { %v3038_v31 = vadd.f32 %v3037_v32, %v3036_v2  ;;  %v3004_v43 = vsub.f32 %v5741_v54, %v2984_v10  ;;  %v3005_v8 = vsub.f32 %v5737_v49, %v2984_v10  ;;  %v2992_v38 = vrot.slane %v2991_v50, 1 }
0x1af2   :  { %v5771_v16 = vpop.eup %4571  ;;  %4583 = vpow2.f32 %v3024_v33 }
0x1af3   :  { %v5773_v45 = vpop.eup %4573  ;;  %v3039_v21 = vrot.slane %v3038_v31, 4  ;;  %v3045_v40 = vsel %vm2203_vm15, %v5771_v16, 0.0  ;;  %4585 = vpow2.f32 %v3026_v34  ;;  %v3028_v25 = vmul.f32 1.442695, %v3004_v43 }
0x1af4   :  { %v3046_v39 = vsel %vm2203_vm15, %v5773_v45, 0.0  ;;  %v3030_v51 = vmul.f32 1.442695, %v3005_v8  ;;  %v2993_v52 = vmax.f32 %v2991_v50, %v2992_v38 }
0x1af5   :  { %v3040_v54 = vadd.f32 %v3039_v21, %v3038_v31  ;;  %v3047_v36 = vadd.f32 %v3046_v39, %v3045_v40  ;;  %4587 = vpow2.f32 %v3028_v25 }
0x1af6   :  { %v5779_v49 = vpop.eup %4575  ;;  %4589 = vpow2.f32 %v3030_v51  ;;  %v3006_v55 = vsub.f32 %v5751_v60, %v2993_v52  ;;  %v3007_v37 = vsub.f32 %v5747_v56, %v2993_v52 }
0x1af7   :  { %v5783_v59 = vpop.eup %4577  ;;  %v3041_v41 = vrot.slane %v3040_v54, 2  ;;  %v3048_v46 = vrot.slane %v3047_v36, 4  ;;  %v3054_v42 = vsel %vm2203_vm15, %v5779_v49, 0.0 }
0x1af8   :  { %v3055_v63 = vsel %vm2203_vm15, %v5783_v59, 0.0  ;;  %v3032_v57 = vmul.f32 1.442695, %v3006_v55  ;;  %v3034_v23 = vmul.f32 1.442695, %v3007_v37 }
0x1af9   :  { %v3042_v35 = vadd.f32 %v3041_v41, %v3040_v54  ;;  %v3049_v47 = vadd.f32 %v3048_v46, %v3047_v36  ;;  %v3056_v4 = vadd.f32 %v3055_v63, %v3054_v42 }
0x1afa   :  { %4591 = vpow2.f32 %v3032_v57 }
0x1afb   :  { %v5789_v44 = vpop.eup %4579  ;;  %v3043_v60 = vrot.slane %v3042_v35, 1  ;;  %v3050_v56 = vrot.slane %v3049_v47, 2  ;;  %v3057_v29 = vrot.slane %v3056_v4, 4  ;;  %4593 = vpow2.f32 %v3034_v23 }
0x1afc   :  { %v5791_v58 = vpop.eup %4581  ;;  %v3063_v1 = vsel %vm2203_vm15, %v5789_v44, 0.0 }
0x1afd   :  { %v3051_v7 = vadd.f32 %v3050_v56, %v3049_v47  ;;  %v3058_v61 = vadd.f32 %v3057_v29, %v3056_v4  ;;  %v3064_v30 = vsel %vm2203_vm15, %v5791_v58, 0.0  ;;  %v3044_v26 = vadd.f32 %v3043_v60, %v3042_v35 }
0x1afe   :  { %v3065_v3 = vadd.f32 %v3064_v30, %v3063_v1 }
0x1aff   :  { %v5797_v9 = vpop.eup %4583  ;;  %v3052_v62 = vrot.slane %v3051_v7, 1  ;;  %v3059_v12 = vrot.slane %v3058_v61, 2  ;;  %4595 = vrcp.f32 %v3044_v26 }
0x1b00   :  { %v5799_v53 = vpop.eup %4585  ;;  %v3066_v0 = vrot.slane %v3065_v3, 4  ;;  %v3072_v17 = vsel %vm2203_vm15, %v5797_v9, 0.0 }
0x1b01   :  { %v3060_v14 = vadd.f32 %v3059_v12, %v3058_v61  ;;  %v3073_v19 = vsel %vm2203_vm15, %v5799_v53, 0.0  ;;  %v3053_v28 = vadd.f32 %v3052_v62, %v3051_v7 }
0x1b02   :  { %v5805_v20 = vpop.eup %4587  ;;  %v3067_v13 = vadd.f32 %v3066_v0, %v3065_v3  ;;  %v3074_v22 = vadd.f32 %v3073_v19, %v3072_v17  ;;  %v3532_v19 = vld [vmem:[#allocation8 + $0x28] sm:$0xff] }
0x1b03   :  { %v5807_v27 = vpop.eup %4589  ;;  %v3061_v48 = vrot.slane %v3060_v14, 1  ;;  %v3081_v11 = vsel %vm2203_vm15, %v5805_v20, 0.0  ;;  %4597 = vrcp.f32 %v3053_v28  ;;  %v3531_v28 = vld [vmem:[#allocation8 + $0x20] sm:$0xff] }
0x1b04   :  { %v3068_v2 = vrot.slane %v3067_v13, 2  ;;  %v3075_v10 = vrot.slane %v3074_v22, 4  ;;  %v3082_v50 = vsel %vm2203_vm15, %v5807_v27, 0.0 }
0x1b05   :  { %v3083_v32 = vadd.f32 %v3082_v50, %v3081_v11  ;;  %v3062_v33 = vadd.f32 %v3061_v48, %v3060_v14 }
0x1b06   :  { %v3069_v34 = vadd.f32 %v3068_v2, %v3067_v13  ;;  %v3076_v31 = vadd.f32 %v3075_v10, %v3074_v22  ;;  %v3529_v13 = vld [vmem:[#allocation8 + $0x10] sm:$0xff]  ;;  %v3528_v22 = vld [vmem:[#allocation8 + $0x8] sm:$0xff] }
0x1b07   :  { %v4592_v43 = vpop.eup %4591  ;;  %v3084_v8 = vrot.slane %v3083_v32, 4  ;;  %4599 = vrcp.f32 %v3062_v33 }
0x1b08   :  { %v4594_v38 = vpop.eup %4593  ;;  %v3070_v21 = vrot.slane %v3069_v34, 1  ;;  %v3077_v40 = vrot.slane %v3076_v31, 2  ;;  %v3090_v25 = vsel %vm2203_vm15, %v4592_v43, 0.0 }
0x1b09   :  { %v3085_v39 = vadd.f32 %v3084_v8, %v3083_v32  ;;  %v3091_v51 = vsel %vm2203_vm15, %v4594_v38, 0.0 }
0x1b0a   :  { %v3078_v52 = vadd.f32 %v3077_v40, %v3076_v31  ;;  %v3092_v54 = vadd.f32 %v3091_v51, %v3090_v25  ;;  %v3071_v36 = vadd.f32 %v3070_v21, %v3069_v34 }
0x1b0b   :  { %v3086_v55 = vrot.slane %v3085_v39, 2 }
0x1b0c   :  { %v4596_v37 = vpop.eup %4595  ;;  %v3079_v41 = vrot.slane %v3078_v52, 1  ;;  %v3093_v46 = vrot.slane %v3092_v54, 4  ;;  %4601 = vrcp.f32 %v3071_v36 }
0x1b0d   :  { %v3087_v42 = vadd.f32 %v3086_v55, %v3085_v39  ;;  %v3100_v63 = vmul.f32 %v4596_v37, %v5759_v15  ;;  %v3101_v57 = vmul.f32 %v4596_v37, %v5763_v24 }
0x1b0e   :  { %v3094_v23 = vadd.f32 %v3093_v46, %v3092_v54  ;;  %v3080_v35 = vadd.f32 %v3079_v41, %v3078_v52 }
0x1b0f   :  { %v3088_v47 = vrot.slane %v3087_v42, 1  ;;  %4340 = vmatprep.mubr.msk.f32.mxu0 %vm2203_vm15, %v3100_v63 }
0x1b10   :  { %v4598_v4 = vpop.eup %4597  ;;  %v3095_v60 = vrot.slane %v3094_v23, 2  ;;  %4341 = vmatmul.mubr.msk.f32.vlgmr.msra.gmra.mxu0 %vm2203_vm15, %v3101_v57  ;;  %4603 = vrcp.f32 %v3080_v35 }
0x1b11   :  { %v3103_v56 = vmul.f32 %v4598_v4, %v5771_v16  ;;  %v3104_v29 = vmul.f32 %v4598_v4, %v5773_v45  ;;  %v3089_v1 = vadd.f32 %v3088_v47, %v3087_v42 }
0x1b12   :  { %v3096_v7 = vadd.f32 %v3095_v60, %v3094_v23 }
0x1b13   :  { %4343 = vmatprep.mubr.msk.f32.mxu0 %vm2203_vm15, %v3103_v56  ;;  %4605 = vrcp.f32 %v3089_v1 }
0x1b14   :  { %v4600_v15 = vpop.eup %4599  ;;  %v3097_v24 = vrot.slane %v3096_v7, 1  ;;  %4344 = vmatmul.mubr.msk.f32.gmra.mxu0 %vm2203_vm15, %v3104_v29 }
0x1b15   :  { %v3106_v61 = vmul.f32 %v4600_v15, %v5779_v49  ;;  %v3107_v30 = vmul.f32 %v4600_v15, %v5783_v59 }
0x1b16   :  { %v3098_v26 = vadd.f32 %v3097_v24, %v3096_v7 }
0x1b17   :  { %4346 = vmatprep.mubr.msk.f32.mxu0 %vm2203_vm15, %v3106_v61 }
0x1b18   :  { %4347 = vmatmul.mubr.msk.f32.gmra.mxu0 %vm2203_vm15, %v3107_v30  ;;  %4607 = vrcp.f32 %v3098_v26 }
0x1b19   :  { %v4602_v16 = vpop.eup %4601 }
0x1b1a   :  { %v3109_v45 = vmul.f32 %v4602_v16, %v5789_v44  ;;  %v3110_v3 = vmul.f32 %v4602_v16, %v5791_v58 }
0x1b1c   :  { %4349 = vmatprep.mubr.msk.f32.mxu0 %vm2203_vm15, %v3109_v45 }
0x1b1d   :  { %v4604_v62 = vpop.eup %4603  ;;  %4350 = vmatmul.mubr.msk.f32.gmra.mxu0 %vm2203_vm15, %v3110_v3 }
0x1b1e   :  { %v3112_v49 = vmul.f32 %v4604_v62, %v5797_v9  ;;  %v3113_v59 = vmul.f32 %v4604_v62, %v5799_v53  ;;  %v3534_v9 = vld [vmem:[#allocation8 + $0x38] sm:$0xff]  ;;  %v3533_v53 = vld [vmem:[#allocation8 + $0x30] sm:$0xff] }
0x1b1f   :  { %4372 = vmatprep.subr.mxu0 %v3534_v9 }
0x1b20   :  { %v4606_v12 = vpop.eup %4605  ;;  %4352 = vmatprep.mubr.msk.f32.mxu0 %vm2203_vm15, %v3112_v49  ;;  %4373 = vmatpush3.msra.mxu0 %v3534_v9 }
0x1b21   :  { %4353 = vmatmul.mubr.msk.f32.gmra.mxu0 %vm2203_vm15, %v3113_v59  ;;  %v3115_v0 = vmul.f32 %v4606_v12, %v5805_v20  ;;  %v3116_v44 = vmul.f32 %v4606_v12, %v5807_v27  ;;  %4374 = vmatprep.subr.mxu0 %v3533_v53  ;;  %v3530_v20 = vld [vmem:[#allocation8 + $0x18] sm:$0xff] }
0x1b22   :  { %4375 = vmatpush3.msra.mxu0 %v3533_v53 }
0x1b23   :  { %4355 = vmatprep.mubr.msk.f32.mxu0 %vm2203_vm15, %v3115_v0  ;;  %4376 = vmatprep.subr.mxu0 %v3532_v19 }
0x1b24   :  { %4377 = vmatpush3.msra.mxu0 %v3532_v19 }
0x1b25   :  { %v4608_v58 = vpop.eup %4607  ;;  %4356 = vmatmul.mubr.msk.f32.gmra.mxu0 %vm2203_vm15, %v3116_v44  ;;  %4378 = vmatprep.subr.mxu0 %v3531_v28 }
0x1b26   :  { %v3118_v17 = vmul.f32 %v4608_v58, %v4592_v43  ;;  %v3119_v14 = vmul.f32 %v4608_v58, %v4594_v38  ;;  %4379 = vmatpush3.msra.mxu0 %v3531_v28 }
0x1b27   :  { %4380 = vmatprep.subr.mxu0 %v3530_v20 }
0x1b28   :  { %4358 = vmatprep.mubr.msk.f32.mxu0 %vm2203_vm15, %v3118_v17  ;;  %4381 = vmatpush3.msra.mxu0 %v3530_v20 }
0x1b29   :  { %4359 = vmatmul.mubr.msk.f32.gmra.mxu0 %vm2203_vm15, %v3119_v14  ;;  %4382 = vmatprep.subr.mxu0 %v3529_v13 }
0x1b2a   :  { %4383 = vmatpush3.msra.mxu0 %v3529_v13 }
0x1b2b   :  { %4384 = vmatprep.subr.mxu0 %v3528_v22 }
0x1b2c   :  { %4385 = vmatpush3.msra.mxu0 %v3528_v22 }
0x1bd0   :  { %v4342_v27 = vpop.f32.mrf.mxu0 }
0x1bd1   :  { %v3306_v48 = vmul.f32 %v4342_v27, %v5612_v5 }
0x1bd2   :  { %v3228_v11 = vpop.f32.mrf.mxu0 }
0x1bd3   :  { %v3305_v2 = vmul.f32 %v5581_v18, %v3228_v11  ;;  %v3320_v50 = vsel %vm130_vm1, %v3306_v48, 0.0 }
0x1bd4   :  { %v4345_v10 = vpop.f32.mrf.mxu0 }
0x1bd5   :  { %v3319_v32 = vsel %vm130_vm1, %v3305_v2, 0.0  ;;  %v3308_v25 = vmul.f32 %v4345_v10, %v5612_v5 }
0x1bd6   :  { %v3321_v33 = vadd.f32 %v3320_v50, %v3319_v32  ;;  %v3238_v34 = vpop.f32.mrf.mxu0 }
0x1bd7   :  { %v3307_v8 = vmul.f32 %v5581_v18, %v3238_v34  ;;  %v3329_v46 = vsel %vm130_vm1, %v3308_v25, 0.0 }
0x1bd8   :  { %v3322_v31 = vrot.slane %v3321_v33, 4  ;;  %v4348_v43 = vpop.f32.mrf.mxu0 }
0x1bd9   :  { %v3310_v38 = vmul.f32 %v4348_v43, %v5612_v5  ;;  %v3328_v52 = vsel %vm130_vm1, %v3307_v8, 0.0 }
0x1bda   :  { %v3323_v21 = vadd.f32 %v3322_v31, %v3321_v33  ;;  %v3248_v40 = vpop.f32.mrf.mxu0  ;;  %v3330_v23 = vadd.f32 %v3329_v46, %v3328_v52 }
0x1bdb   :  { %v3309_v39 = vmul.f32 %v5581_v18, %v3248_v40  ;;  %v3338_v54 = vsel %vm130_vm1, %v3310_v38, 0.0 }
0x1bdc   :  { %v3324_v51 = vrot.slane %v3323_v21, 2  ;;  %v3331_v15 = vrot.slane %v3330_v23, 4 }
0x1bdd   :  { %v3337_v36 = vsel %vm130_vm1, %v3309_v39, 0.0  ;;  %v4351_v55 = vpop.f32.mrf.mxu0 }
0x1bde   :  { %v3325_v37 = vadd.f32 %v3324_v51, %v3323_v21  ;;  %v3339_v41 = vadd.f32 %v3338_v54, %v3337_v36  ;;  %v3312_v42 = vmul.f32 %v4351_v55, %v5612_v5  ;;  %v3332_v12 = vadd.f32 %v3331_v15, %v3330_v23 }
0x1bdf   :  { %v3258_v63 = vpop.f32.mrf.mxu0 }
0x1be0   :  { %v3326_v57 = vrot.slane %v3325_v37, 1  ;;  %v3311_v35 = vmul.f32 %v5581_v18, %v3258_v63  ;;  %v3340_v4 = vrot.slane %v3339_v41, 4  ;;  %v3347_v56 = vsel %vm130_vm1, %v3312_v42, 0.0 }
0x1be1   :  { %v4354_v47 = vpop.f32.mrf.mxu0  ;;  %v3333_v13 = vrot.slane %v3332_v12, 2 }
0x1be2   :  { %v3327_v60 = vadd.f32 %v3326_v57, %v3325_v37  ;;  %v3346_v29 = vsel %vm130_vm1, %v3311_v35, 0.0  ;;  %v3314_v1 = vmul.f32 %v4354_v47, %v5612_v5  ;;  %v3341_v16 = vadd.f32 %v3340_v4, %v3339_v41 }
0x1be3   :  { %v3268_v7 = vpop.f32.mrf.mxu0  ;;  %v3348_v24 = vadd.f32 %v3347_v56, %v3346_v29  ;;  %v3334_v34 = vadd.f32 %v3333_v13, %v3332_v12  ;;  %v3527_v56 = vld [vmem:[#allocation8] sm:$0xff]  ;;  %v3437_v29 = vpop.permute.xlu0 %3436 }
0x1be4   :  { %v3313_v61 = vmul.f32 %v5581_v18, %v3268_v7  ;;  %v3415_v26 = vsel %vm1753_vm9, %v5729_v6, %v3327_v60  ;;  %v3356_v3 = vsel %vm130_vm1, %v3314_v1, 0.0  ;;  %v3342_v14 = vrot.slane %v3341_v16, 2  ;;  %4386 = vmatprep.subr.mxu0 %v3527_v56 }
0x1be5   :  { %v4357_v30 = vpop.f32.mrf.mxu0  ;;  %v3349_v45 = vrot.slane %v3348_v24, 4  ;;  %4369 = vmatprep.mubr.msk.f32.mxu1 %vm130_vm1, %v3415_v26  ;;  %v3335_v25 = vrot.slane %v3334_v34, 1  ;;  %4387 = vmatpush3.msra.mxu0 %v3527_v56 }
0x1be6   :  { %v3355_v62 = vsel %vm130_vm1, %v3313_v61, 0.0  ;;  %v3316_v49 = vmul.f32 %v4357_v30, %v5612_v5  ;;  %v3343_v11 = vadd.f32 %v3342_v14, %v3341_v16  ;;  %v3520_v61 = vpop.permute.xlu1 %3519 }
0x1be7   :  { %v3278_v59 = vpop.f32.mrf.mxu0  ;;  %v3350_v0 = vadd.f32 %v3349_v45, %v3348_v24  ;;  %v3357_v44 = vadd.f32 %v3356_v3, %v3355_v62  ;;  %v3336_v37 = vadd.f32 %v3335_v25, %v3334_v34  ;;  %v3522_v30 = vpop.permute.xlu0 %3521  ;;  %v3741_v45 = vld [vmem:[%s5899_s8] ss:$0 sm:$0xff] }
0x1be8   :  { %v3315_v58 = vmul.f32 %v5581_v18, %v3278_v59  ;;  %v3365_v53 = vsel %vm130_vm1, %v3316_v49, 0.0  ;;  %v3344_v38 = vrot.slane %v3343_v11, 1 }
0x1be9   :  { %v4360_v17 = vpop.f32.mrf.mxu0  ;;  %v3358_v9 = vrot.slane %v3357_v44, 4  ;;  %v3351_v6 = vrot.slane %v3350_v0, 2 }
0x1bea   :  { %v3364_v19 = vsel %vm130_vm1, %v3315_v58, 0.0  ;;  %v3318_v28 = vmul.f32 %v4360_v17, %v5612_v5  ;;  %v3345_v52 = vadd.f32 %v3344_v38, %v3343_v11 }
0x1beb   :  { %v3288_v20 = vpop.f32.mrf.mxu0  ;;  %v3359_v22 = vadd.f32 %v3358_v9, %v3357_v44  ;;  %v3366_v27 = vadd.f32 %v3365_v53, %v3364_v19  ;;  %v3352_v50 = vadd.f32 %v3351_v6, %v3350_v0 }
0x1bec   :  { %v3317_v48 = vmul.f32 %v5581_v18, %v3288_v20  ;;  %v3374_v32 = vsel %vm130_vm1, %v3318_v28, 0.0  ;;  %v3409_v63 = vsel %vm3389_vm0, %v3345_v52, %v3336_v37 }
0x1bed   :  { %v3360_v2 = vrot.slane %v3359_v22, 2  ;;  %v3367_v10 = vrot.slane %v3366_v27, 4  ;;  %v3353_v40 = vrot.slane %v3352_v50, 1 }
0x1bee   :  { %v3373_v33 = vsel %vm130_vm1, %v3317_v48, 0.0 }
0x1bef   :  { %v3361_v31 = vadd.f32 %v3360_v2, %v3359_v22  ;;  %v3368_v43 = vadd.f32 %v3367_v10, %v3366_v27  ;;  %v3375_v8 = vadd.f32 %v3374_v32, %v3373_v33  ;;  %v3354_v55 = vadd.f32 %v3353_v40, %v3352_v50 }
0x1bf1   :  { %v3369_v5 = vrot.slane %v3368_v43, 2  ;;  %v3376_v21 = vrot.slane %v3375_v8, 4  ;;  %v3362_v39 = vrot.slane %v3361_v31, 1  ;;  %v3410_v23 = vsel %vm3391_vm3, %v3354_v55, %v3409_v63 }
0x1bf3   :  { %v3370_v51 = vadd.f32 %v3369_v5, %v3368_v43  ;;  %v3377_v18 = vadd.f32 %v3376_v21, %v3375_v8  ;;  %v3363_v41 = vadd.f32 %v3362_v39, %v3361_v31 }
0x1bf5   :  { %v3371_v54 = vrot.slane %v3370_v51, 1  ;;  %v3378_v36 = vrot.slane %v3377_v18, 2  ;;  %v3411_v47 = vsel %vm3393_vm4, %v3363_v41, %v3410_v23 }
0x1bf7   :  { %v3379_v46 = vadd.f32 %v3378_v36, %v3377_v18  ;;  %v3372_v42 = vadd.f32 %v3371_v54, %v3370_v51 }
0x1bf9   :  { %v3380_v57 = vrot.slane %v3379_v46, 1  ;;  %v3412_v4 = vsel %vm3395_vm5, %v3372_v42, %v3411_v47 }
0x1bfb   :  { %v3381_v35 = vadd.f32 %v3380_v57, %v3379_v46 }
0x1bfd   :  { %v3413_v60 = vsel %vm3397_vm6, %v3381_v35, %v3412_v4 }
0x1bfe   :  { %4370 = vmatmul.mubr.msk.f32.vlgmr.msra.gmra.mxu1 %vm130_vm1, %v3413_v60 }
0x1cbe   :  { %v4371_v1 = vpop.f32.mrf.mxu1 }
0x1cbf   :  { %v3516_v7 = vadd.f32 %v4371_v1, %v3437_v29 }
0x1cc0   :  { %v3510_v15 = vpop.f32.mrf.mxu1 }
0x1cc1   :  { %v3511_v24 = vadd.f32 %v3510_v15, %v3437_v29  ;;  %v3526_v16 = vsel %vm130_vm1, %v3516_v7, %v3522_v30 }
0x1cc3   :  { %v3525_v26 = vsel %vm130_vm1, %v3511_v24, %v3520_v61 }
0x1cc4   :  { %4388 = vmatprep.mubr.msk.f32.mxu0 %vm245_vm2, %v3525_v26 }
0x1cc5   :  { %4389 = vmatmul.mubr.msk.f32.vlgmr.msra.gmra.mxu0 %vm245_vm2, %v3526_v16 }
0x1d85   :  { %v4390_v3 = vpop.f32.mrf.mxu0 }
0x1d86   :  { %v3619_v62 = vadd.f32 %v4390_v3, %v3741_v45 }
0x1d87   :  { %v3613_v49 = vpop.f32.mrf.mxu0 }
0x1d88   :  { %3623 = vst [vmem:[#allocation10 + $0x8] sm:$0x3f] %v3619_v62  ;;  %v3614_v59 = vadd.f32 %v3741_v45, %v3613_v49 }
0x1d8a   :  { %3622 = vst [vmem:[#allocation10] sm:$0xff] %v3614_v59 }
0x1d8b   :  { %4722 = shalt.err (!%p4719_p10)
}
0x1d8c   :  { %3635 = dma.vmem_to_hbm [thread:$0]  %s3630_s12, 256, %s5902_s11, [#allocation4], %s4740_s20, %s4740_s20, %s4741_s21  }
0x1d8d   :  { %4737 = dma.done.wait [#allocation4], 256  }
0x1d8e   :  { %4738 = vsyncadd [#allocation4], 4294967040 }
0x1d8f   :  { %3639 = vsyncpa [#allocation3], 1 }
0x1d90   :  { %3640 = vsyncpa [#allocation6], 1 }
0x1d91   :  { %3641 = vsyncpa [#allocation9], 1 }
0x1d92   :  { %3642 = vsyncpa [#allocation4], 1 }

</bundles_post_ra>
